<compile_context>
chip_gen: v7x
topology: tpu7x:2x2x1
jax: 0.10.0
libtpu: 0.0.40
codegen_flags: <defaults>
</compile_context>

<pallas_src>
import jax
import jax.numpy as jnp
from jax.experimental import pallas as pl
from jax.experimental.pallas import tpu as pltpu


_LANE_TILE = 4096  # lanes per grid step in the large-batch (gridded) path


def dnn_kernel(x_ref, pk_ref, w2_ref, out_ref):
    # x_ref : (1, T)        batch mapped to lanes
    # pk_ref: (Hr+8, Lw)    packed small params (see prepare_params)
    # w2_ref: (H, H)        Lin_2 weight (torch layout)
    H = w2_ref.shape[0]
    Hr = pk_ref.shape[0] - 8          # sublane-aligned row holding Wf

    xT = x_ref[...]                    # (1, T)
    w1x = pk_ref[0:H, 0:1]             # (H, 1)  W1[:, 0]  (x weight)
    c1 = pk_ref[0:H, 1:2]              # (H, 1)  W1[:, 1]*eig + b1 (folded at prep)
    b2 = pk_ref[0:H, 2:3]              # (H, 1)
    bf = pk_ref[0:1, 3:4]              # (1, 1)  final bias
    wf = pk_ref[Hr:Hr + 1, 0:H]        # (1, H)  final weight row

    # Lin_1(cat([x, eig], 1)) in transposed layout: contraction dim is 2, so the
    # eigenvalue column is pre-folded into c1 -> plain VPU broadcast FMA.
    h1 = jnp.sin(w1x * xT + c1)                                        # (H, T)

    # Lin_2 on the MXU: (H, H) @ (H, T).
    h2 = jnp.sin(
        jnp.dot(w2_ref[...], h1, preferred_element_type=jnp.float32) + b2)

    # final on the MXU: (1, H) @ (H, T) -> lane-dense (1, T).
    out = jnp.dot(wf, h2, preferred_element_type=jnp.float32) + bf

    out_ref[...] = out.astype(out_ref.dtype)


def prepare_params(params):
    """One-time packing of torch-layout params into the kernel's inputs.

    Returns dict with:
      pk  : (Hr+8, Lw) f32 slab  (col0=W1[:,0], col1=c1, col2=b2, [0,3]=bf,
                                   row Hr = Wf)
      W2  : (H, H) f32
      eig : () f32  -- Ein(1) = We*1 + be, the per-row eigenvalue scalar
    """
    We, be, W1, b1, W2, b2, Wf, bf = params
    H = W1.shape[0]
    Hr = ((H + 7) // 8) * 8
    Lw = max(128, ((H + 127) // 128) * 128)

    eig = (We.reshape(()) + be.reshape(())).astype(jnp.float32)   # Ein(ones) scalar
    c1 = (W1[:, 1].astype(jnp.float32) * eig + b1.astype(jnp.float32))

    pk = jnp.zeros((Hr + 8, Lw), jnp.float32)
    pk = pk.at[:H, 0].set(W1[:, 0].astype(jnp.float32))
    pk = pk.at[:H, 1].set(c1)
    pk = pk.at[:H, 2].set(b2.astype(jnp.float32))
    pk = pk.at[0, 3].set(bf.reshape(()).astype(jnp.float32))
    pk = pk.at[Hr, :H].set(Wf.reshape(H).astype(jnp.float32))

    return {"pk": pk, "W2": W2.astype(jnp.float32), "eig": eig}


def dnn_forward(x, prep):
    """x: (N, 1) float32. prep: output of prepare_params.
    Returns (out (N,1), eigenvalue (N,1))."""
    pk, W2, eig = prep["pk"], prep["W2"], prep["eig"]
    H = W2.shape[0]
    N = x.shape[0]

    if N <= _LANE_TILE:
        Np = max(128, ((N + 127) // 128) * 128)   # pad batch to a lane multiple
        tile = Np
        grid = None
    else:
        Np = ((N + _LANE_TILE - 1) // _LANE_TILE) * _LANE_TILE
        tile = _LANE_TILE
        grid = (Np // _LANE_TILE,)

    # Batch on lanes; zero-pad the tail (sliced off below).
    xT = jnp.pad(x.reshape(-1).astype(jnp.float32), (0, Np - N)).reshape(1, Np)

    cost = pl.CostEstimate(
        flops=2 * Np * H * H + 2 * Np * H + 4 * Np * H,
        transcendentals=2 * Np * H,
        bytes_accessed=4 * (2 * Np + pk.size + H * H),
    )

    if grid is None:
        # Single-shot: whole problem fits comfortably in VMEM on all generations.
        outT = pl.pallas_call(
            dnn_kernel,
            out_shape=jax.ShapeDtypeStruct((1, Np), jnp.float32),
            in_specs=[
                pl.BlockSpec(memory_space=pltpu.MemorySpace.VMEM),  # xT
                pl.BlockSpec(memory_space=pltpu.MemorySpace.VMEM),  # packed params
                pl.BlockSpec(memory_space=pltpu.MemorySpace.VMEM),  # W2
            ],
            out_specs=pl.BlockSpec(memory_space=pltpu.MemorySpace.VMEM),
            cost_estimate=cost,
        )(xT, pk, W2)
    else:
        # Large batch: 1-D parallel grid over the lane/batch dim; weights resident.
        outT = pl.pallas_call(
            dnn_kernel,
            out_shape=jax.ShapeDtypeStruct((1, Np), jnp.float32),
            grid=grid,
            in_specs=[
                pl.BlockSpec((1, tile), lambda i: (0, i)),
                pl.BlockSpec(pk.shape, lambda i: (0, 0)),
                pl.BlockSpec(W2.shape, lambda i: (0, 0)),
            ],
            out_specs=pl.BlockSpec((1, tile), lambda i: (0, i)),
            compiler_params=pltpu.CompilerParams(
                dimension_semantics=("parallel",)),
            cost_estimate=cost,
        )(xT, pk, W2)

    out = outT[0, :N].reshape(N, 1)
    eig_out = jnp.full((N, 1), eig, dtype=jnp.float32)
    return out, eig_out


def init_params(key, hidden_size):
    """Deterministic init mimicking torch.nn.Linear (U(-1/sqrt(fan_in), ...)),
    stored in PyTorch convention: W (out_features, in_features), b (out_features,)."""
    ks = jax.random.split(key, 8)

    def lin(kw, kb, fan_in, fan_out):
        bound = 1.0 / (fan_in ** 0.5)
        w = jax.random.uniform(kw, (fan_out, fan_in), jnp.float32, -bound, bound)
        b = jax.random.uniform(kb, (fan_out,), jnp.float32, -bound, bound)
        return w, b

    We, be = lin(ks[0], ks[1], 1, 1)                       # Ein: Linear(1,1)
    W1, b1 = lin(ks[2], ks[3], 2, hidden_size)             # Lin_1: Linear(2,H)
    W2, b2 = lin(ks[4], ks[5], hidden_size, hidden_size)   # Lin_2: Linear(H,H)
    Wf, bf = lin(ks[6], ks[7], hidden_size, 1)             # final: Linear(H,1)
    return (We, be, W1, b1, W2, b2, Wf, bf)


def dnn_reference(x, params):
    We, be, W1, b1, W2, b2, Wf, bf = params
    hp = jax.lax.Precision.HIGHEST
    eig = jnp.ones_like(x) @ We.T + be
    h1 = jnp.sin(jnp.dot(jnp.concatenate([x, eig], axis=1), W1.T, precision=hp) + b1)
    h2 = jnp.sin(jnp.dot(h1, W2.T, precision=hp) + b2)
    out = jnp.dot(h2, Wf.T, precision=hp) + bf
    return out, eig


if __name__ == "__main__":
    key = jax.random.PRNGKey(0)
    k_param, _ = jax.random.split(key)

    HIDDEN = 32   # constructor arg hidden_size (default 10; 32 kept for TPU friendliness)
    N = 400       # matches the original script's torch.linspace(0, 1, 400)

    params = init_params(k_param, HIDDEN)
    prep = prepare_params(params)          # one-time packing (out of hot path)

    x = jnp.linspace(0.0, 1.0, N, dtype=jnp.float32).reshape(-1, 1)
    out, eig = dnn_forward(x, prep)
    jax.block_until_ready((out, eig))

    out_ref, eig_ref = dnn_reference(x, params)
    assert out.shape == (N, 1) and eig.shape == (N, 1)
    assert jnp.allclose(out, out_ref, atol=1e-4, rtol=1e-4), \
        float(jnp.max(jnp.abs(out - out_ref)))
    assert jnp.allclose(eig, eig_ref, atol=1e-6, rtol=1e-6)

    # Exercise the large-batch (gridded, megacore-parallel) path as well.
    N2 = 10_000
    x2 = jnp.linspace(0.0, 1.0, N2, dtype=jnp.float32).reshape(-1, 1)
    out2, eig2 = dnn_forward(x2, prep)
    jax.block_until_ready((out2, eig2))
    out2_ref, eig2_ref = dnn_reference(x2, params)
    assert jnp.allclose(out2, out2_ref, atol=1e-4, rtol=1e-4), \
        float(jnp.max(jnp.abs(out2 - out2_ref)))
    assert jnp.allclose(eig2, eig2_ref, atol=1e-6, rtol=1e-6)

    print("KERNEL_OK")
</pallas_src>

<mosaic_0001>
module attributes {stable_mosaic.version = 11 : i64} {
  func.func @dnn_kernel(%arg0: memref<1x512xf32, #tpu.memory_space<vmem>>, %arg1: memref<40x128xf32, #tpu.memory_space<vmem>>, %arg2: memref<32x32xf32, #tpu.memory_space<vmem>>, %arg3: memref<1x512xf32, #tpu.memory_space<vmem>>) attributes {dimension_semantics = [], scalar_prefetch = 0 : i64, scratch_operands = 0 : i64, tpu.core_type = #tpu.core_type<tc>} {
    %c0 = arith.constant 0 : index
    %c0_0 = arith.constant 0 : index
    %0 = vector.load %arg0[%c0, %c0_0] : memref<1x512xf32, #tpu.memory_space<vmem>>, vector<1x512xf32>
    %c0_1 = arith.constant 0 : index
    %c0_2 = arith.constant 0 : index
    %1 = vector.load %arg1[%c0_1, %c0_2] : memref<40x128xf32, #tpu.memory_space<vmem>>, vector<32x1xf32>
    %c0_3 = arith.constant 0 : index
    %c1 = arith.constant 1 : index
    %2 = vector.load %arg1[%c0_3, %c1] : memref<40x128xf32, #tpu.memory_space<vmem>>, vector<32x1xf32>
    %c0_4 = arith.constant 0 : index
    %c2 = arith.constant 2 : index
    %3 = vector.load %arg1[%c0_4, %c2] : memref<40x128xf32, #tpu.memory_space<vmem>>, vector<32x1xf32>
    %c0_5 = arith.constant 0 : index
    %c3 = arith.constant 3 : index
    %4 = vector.load %arg1[%c0_5, %c3] : memref<40x128xf32, #tpu.memory_space<vmem>>, vector<1x1xf32>
    %c32 = arith.constant 32 : index
    %c0_6 = arith.constant 0 : index
    %5 = vector.load %arg1[%c32, %c0_6] : memref<40x128xf32, #tpu.memory_space<vmem>>, vector<1x32xf32>
    %6 = vector.broadcast %1 : vector<32x1xf32> to vector<32x512xf32>
    %7 = vector.broadcast %0 : vector<1x512xf32> to vector<32x512xf32>
    %8 = arith.mulf %6, %7 : vector<32x512xf32>
    %9 = vector.broadcast %2 : vector<32x1xf32> to vector<32x512xf32>
    %10 = arith.addf %8, %9 : vector<32x512xf32>
    %11 = math.sin %10 : vector<32x512xf32>
    %c0_7 = arith.constant 0 : index
    %c0_8 = arith.constant 0 : index
    %12 = vector.load %arg2[%c0_7, %c0_8] : memref<32x32xf32, #tpu.memory_space<vmem>>, vector<32x32xf32>
    %cst = arith.constant dense<0.000000e+00> : vector<32x512xf32>
    %13 = tpu.matmul %12, %11, %cst {dimension_numbers = #tpu.dot_dimension_numbers<[1], [0], [0], [1], [0, 0, 1, 1], [], []>} : vector<32x32xf32>, vector<32x512xf32>, vector<32x512xf32> -> vector<32x512xf32>
    %14 = vector.broadcast %3 : vector<32x1xf32> to vector<32x512xf32>
    %15 = arith.addf %13, %14 : vector<32x512xf32>
    %16 = math.sin %15 : vector<32x512xf32>
    %cst_9 = arith.constant dense<0.000000e+00> : vector<1x512xf32>
    %17 = tpu.matmul %5, %16, %cst_9 {dimension_numbers = #tpu.dot_dimension_numbers<[1], [0], [0], [1], [0, 0, 1, 1], [], []>} : vector<1x32xf32>, vector<32x512xf32>, vector<1x512xf32> -> vector<1x512xf32>
    %18 = vector.broadcast %4 : vector<1x1xf32> to vector<1x512xf32>
    %19 = arith.addf %17, %18 : vector<1x512xf32>
    %c0_10 = arith.constant 0 : index
    %c0_11 = arith.constant 0 : index
    %20 = vector.load %arg3[%c0_10, %c0_11] : memref<1x512xf32, #tpu.memory_space<vmem>>, vector<1x512xf32>
    tpu.vector_store %arg3[%c0_10, %c0_11], %19 {strides = array<i32>} : memref<1x512xf32, #tpu.memory_space<vmem>>, vector<1x512xf32>,
    return
  }
}

</mosaic_0001>

<bundles_post_ra>
// kernel: tpu_custom_call.1
= control target key start
LH: loop header
LB: loop body
LE: loop exit
PB: predicated region body
PF: predicated region fallthrough
CT: control target
= control target key end

     0   :  { %8 = vsyncpa [#allocation3], 0  ;;  %s7920_s0 = inlined_call_operand.hbm [shape: f32[1,512], index: 0, kind: input, shape index: {}]   ;;  %s7921_s1 = inlined_call_operand.hbm [shape: f32[40,128], index: 1, kind: input, shape index: {}]   ;;  %s7922_s2 = inlined_call_operand.hbm [shape: f32[32,32], index: 2, kind: input, shape index: {}]   ;;  %s7923_s3 = inlined_call_operand.hbm [shape: f32[1,512], index: 3, kind: output, shape index: {}]  }
   0x1   :  { %9 = vsyncpa [#allocation6], 0 }
   0x2   :  { %10 = vsyncpa [#allocation4], 0  ;;  %s4439_s12 = smov [#allocation5]   ;;  %s4345_s16 = scalar_lea.hbm %s7921_s1, 640 }
   0x3   :  { %s26_s13 = sshll.u32 %s4439_s12, 4  ;;  %p4346_p0 = scmp.ne.s32.totalorder %s7921_s1, %s4345_s16  ;;  %s27_s13 = int_to_ptr.vmem [resolvable:$true] %s26_s13 }
   0x4   :  { %p4349_p1 = scmp.lt.u32.totalorder %s4345_s16, %s7921_s1 }
   0x6   :  { %p4351_p2 = pnand %p4349_p1, %p4346_p0 }
   0x8   :  { %4354 = shalt.err (!%p4351_p2)
}
   0x9   :  { %s4355_s21 = scalar_lea.vmem %s27_s13, 640  ;;  %p4360_p4 = scmp.lt.s32.totalorder %s27_s13, %s27_s13 }
   0xa   :  { %p4356_p3 = scmp.ne.s32.totalorder %s27_s13, %s4355_s21  ;;  %p4361_p5 = scmp.lt.s32.totalorder %s4355_s21, %s4355_s21 }
   0xc   :  { %p4362_p6 = por %p4361_p5, %p4360_p4 }
   0xe   :  { %p4363_p7 = pnand %p4362_p6, %p4356_p3 }
  0x10   :  { %4366 = shalt.err (!%p4363_p7)
}
  0x11   :  { %s4440_s22 = smov 128   ;;  %s4441_s23 = smov 8  }
  0x12   :  { %32 = dma.hbm_to_vmem [thread:$0]  %s7921_s1, 640, %s27_s13, [#allocation6], %s4440_s22, %s4440_s22, %s4441_s23  }
  0x13   :  { %s4442_s26 = smov [#allocation2]   ;;  %s4443_s28 = smov [#allocation7]  }
  0x14   :  { %s17_s27 = sshll.u32 %s4442_s26, 4  ;;  %s38_s29 = sshll.u32 %s4443_s28, 4  ;;  %s18_s27 = int_to_ptr.vmem [resolvable:$true] %s17_s27  ;;  %s39_s29 = int_to_ptr.vmem [resolvable:$true] %s38_s29 }
  0x15   :  { %s4367_s5 = scalar_lea.hbm %s7920_s0, 64 }
  0x16   :  { %p4368_p8 = scmp.ne.s32.totalorder %s7920_s0, %s4367_s5  ;;  %p4371_p9 = scmp.lt.u32.totalorder %s4367_s5, %s7920_s0 }
  0x18   :  { %p4373_p10 = pnand %p4371_p9, %p4368_p8 }
  0x1a   :  { %4376 = shalt.err (!%p4373_p10)
}
  0x1b   :  { %s4377_s1 = scalar_lea.vmem %s18_s27, 64  ;;  %p4382_p12 = scmp.lt.s32.totalorder %s18_s27, %s18_s27 }
  0x1c   :  { %p4378_p11 = scmp.ne.s32.totalorder %s18_s27, %s4377_s1  ;;  %p4383_p13 = scmp.lt.s32.totalorder %s4377_s1, %s4377_s1 }
  0x1e   :  { %p4384_p0 = por %p4383_p13, %p4382_p12 }
  0x20   :  { %p4385_p1 = pnand %p4384_p0, %p4378_p11 }
  0x22   :  { %4388 = shalt.err (!%p4385_p1)
}
  0x23   :  { %20 = dma.hbm_to_vmem [thread:$0]  %s7920_s0, 64, %s18_s27, [#allocation3]  }
  0x24   :  { %s4389_s14 = scalar_lea.hbm %s7922_s2, 512 }
  0x25   :  { %p4390_p2 = scmp.ne.s32.totalorder %s7922_s2, %s4389_s14  ;;  %p4393_p3 = scmp.lt.u32.totalorder %s4389_s14, %s7922_s2 }
  0x27   :  { %p4395_p4 = pnand %p4393_p3, %p4390_p2 }
  0x29   :  { %4398 = shalt.err (!%p4395_p4)
}
  0x2a   :  { %s4399_s19 = scalar_lea.vmem %s39_s29, 512  ;;  %p4404_p6 = scmp.lt.s32.totalorder %s39_s29, %s39_s29 }
  0x2b   :  { %p4400_p5 = scmp.ne.s32.totalorder %s39_s29, %s4399_s19  ;;  %p4405_p7 = scmp.lt.s32.totalorder %s4399_s19, %s4399_s19 }
  0x2d   :  { %p4406_p8 = por %p4405_p7, %p4404_p6 }
  0x2f   :  { %p4407_p9 = pnand %p4406_p8, %p4400_p5 }
  0x31   :  { %4410 = shalt.err (!%p4407_p9)
}
  0x32   :  { %44 = dma.hbm_to_vmem [thread:$0]  %s7922_s2, 512, %s39_s29, [#allocation6], %s4440_s22, %s4440_s22, %s4441_s23  }
  0x33   :  { %4433 = dma.done.wait [#allocation3], 64  }
  0x34   :  { %4434 = vsyncadd [#allocation3], 4294967232 }
  0x35   :  { %4435 = dma.done.wait [#allocation6], 1152  }
  0x36   :  { %4436 = vsyncadd [#allocation6], 4294966144  ;;  %v4444_v0 = vmov 1   ;;  %v4445_v1 = vmov 0   ;;  %v55_v2 = vld [vmem:[#allocation5] sm:$0xff]  ;;  %v56_v3 = vld [vmem:[#allocation5 + $0x8] sm:$0xff]  ;;  %v7924_v6 = vlaneseq }
  0x37   :  { %4206 = vset.pattern.permute.xlu1 %v4444_v0  ;;  %4205 = vset.pattern.permute.xlu0 %v4445_v1  ;;  %v57_v4 = vld [vmem:[#allocation5 + $0x10] sm:$0xff]  ;;  %v58_v5 = vld [vmem:[#allocation5 + $0x18] sm:$0xff]  ;;  %s4456_s2 = smov [#allocation8]  }
  0x38   :  { %119 = vperm.xlu1 %4206, %v55_v2   ;;  %63 = vperm.xlu0 %4205, %v55_v2   ;;  %v4520_v7 = vshrl.u32 %v7924_v6, 7  ;;  %v54_v10 = vld [vmem:[#allocation2] sm:$0xf]  ;;  %s3879_s21 = sshll.u32 %s4456_s2, 4  ;;  %s3880_s21 = int_to_ptr.vmem [resolvable:$true] %s3879_s21 }
  0x39   :  { %s4411_s22 = scalar_lea.vmem %s3880_s21, 64  ;;  %p4416_p11 = scmp.lt.s32.totalorder %s3880_s21, %s3880_s21 }
  0x3a   :  { %8048 = vst [vmem:[#allocation12_spill] sm:$0xff] %v4520_v7  ;;  %v84_v8 = vsub.s32 0, %v4520_v7  ;;  %v92_v9 = vsub.s32 2, %v4520_v7  ;;  %v88_v17 = vsub.s32 1, %v4520_v7  ;;  %v96_v20 = vsub.s32 3, %v4520_v7  ;;  %p4412_p10 = scmp.ne.s32.totalorder %s3880_s21, %s4411_s22  ;;  %p4417_p12 = scmp.lt.s32.totalorder %s4411_s22, %s4411_s22 }
  0x3b   :  { %v7942_v7 = vmov 2102212464  }
  0x3c   :  { %123 = vperm.xlu1 %4206, %v56_v3   ;;  %68 = vperm.xlu0 %4205, %v56_v3   ;;  %v85_v11 = vrot.slane %v54_v10, %v84_v8  ;;  %v93_v12 = vrot.slane %v54_v10, %v92_v9  ;;  %v4530_v22 = vrot.slane %v54_v10, %v88_v17  ;;  %p4418_p13 = por %p4417_p12, %p4416_p11 }
  0x3d   :  { %v4532_v26 = vrot.slane %v54_v10, %v96_v20 }
  0x3e   :  { %p4419_p0 = pnand %p4418_p13, %p4412_p10 }
  0x40   :  { %4207 = vset.pattern.permute.xlu1 %v4445_v1  ;;  %73 = vperm.xlu0 %4205, %v57_v4  }
  0x41   :  { %78 = vperm.xlu1 %4207, %v58_v5  }
  0x44   :  { %4208 = vset.pattern.permute.xlu0 %v4444_v0 }
  0x45   :  { %4209 = vset.pattern.permute.xlu1 %v4444_v0  ;;  %127 = vperm.xlu0 %4208, %v57_v4  }
  0x46   :  { %131 = vperm.xlu1 %4209, %v58_v5  }
  0xb7   :  { %v64_v13 = vpop.permute.xlu0 %63  ;;  %v120_v14 = vpop.permute.xlu1 %119 }
  0xb8   :  { %v102_v15 = vmul.f32 %v85_v11, %v64_v13  ;;  %v104_v16 = vmul.f32 %v93_v12, %v64_v13  ;;  %v103_v29 = vmul.f32 %v4530_v22, %v64_v13  ;;  %v105_v30 = vmul.f32 %v4532_v26, %v64_v13 }
  0xba   :  { %v4525_v18 = vadd.f32 %v120_v14, %v102_v15  ;;  %v4527_v19 = vadd.f32 %v120_v14, %v104_v16  ;;  %v4540_v31 = vadd.f32 %v120_v14, %v103_v29  ;;  %v4542_v32 = vadd.f32 %v120_v14, %v105_v30 }
  0xbb   :  { %v69_v21 = vpop.permute.xlu0 %68  ;;  %v124_v25 = vpop.permute.xlu1 %123 }
  0xbc   :  { %8049 = vst [vmem:[#allocation13_spill] sm:$0xff] %v4527_v19  ;;  %v106_v23 = vmul.f32 %v85_v11, %v69_v21  ;;  %v108_v24 = vmul.f32 %v93_v12, %v69_v21  ;;  %v153_v34 = vand.u32 2139095040, %v4525_v18  ;;  %v257_v35 = vand.u32 2139095040, %v4540_v31 }
  0xbd   :  { %v361_v37 = vand.u32 2139095040, %v4527_v19  ;;  %v107_v38 = vmul.f32 %v4530_v22, %v69_v21  ;;  %v465_v40 = vand.u32 2139095040, %v4542_v32  ;;  %v109_v43 = vmul.f32 %v4532_v26, %v69_v21 }
  0xbe   :  { %v4534_v27 = vadd.f32 %v124_v25, %v106_v23  ;;  %v4536_v28 = vadd.f32 %v124_v25, %v108_v24  ;;  %v154_v42 = vshrl.u32 %v153_v34, 23  ;;  %v258_v45 = vshrl.u32 %v257_v35, 23 }
  0xbf   :  { %v74_v33 = vpop.permute.xlu0 %73  ;;  %v362_v46 = vshrl.u32 %v361_v37, 23  ;;  %v4555_v47 = vadd.f32 %v124_v25, %v107_v38  ;;  %v466_v49 = vshrl.u32 %v465_v40, 23  ;;  %v4561_v53 = vadd.f32 %v124_v25, %v109_v43 }
  0xc0   :  { %8050 = vst [vmem:[#allocation14_spill] sm:$0xff] %v4536_v28  ;;  %v4546_v36 = vpop.permute.xlu1 %78  ;;  %v110_v39 = vmul.f32 %v85_v11, %v74_v33  ;;  %v112_v41 = vmul.f32 %v93_v12, %v74_v33  ;;  %v111_v50 = vmul.f32 %v4530_v22, %v74_v33  ;;  %v3889_v52 = vadd.s32 4294967169, %v154_v42 }
  0xc1   :  { %v4553_v44 = vmul.f32 %v85_v11, %v4546_v36  ;;  %v4559_v51 = vmul.f32 %v93_v12, %v4546_v36  ;;  %v3893_v54 = vadd.s32 4294967169, %v258_v45  ;;  %v569_v55 = vand.u32 2139095040, %v4534_v27 }
  0xc2   :  { %v3897_v58 = vadd.s32 4294967169, %v362_v46  ;;  %v673_v59 = vand.u32 2139095040, %v4555_v47  ;;  %v777_v60 = vand.u32 2139095040, %v4536_v28  ;;  %v3901_v61 = vadd.s32 4294967169, %v466_v49 }
  0xc3   :  { %v160_v0 = vadd.s32 1, %v3889_v52  ;;  %v881_v1 = vand.u32 2139095040, %v4561_v53  ;;  %v264_v2 = vadd.s32 1, %v3893_v54  ;;  %v570_v3 = vshrl.u32 %v569_v55, 23 }
  0xc4   :  { %v128_v48 = vpop.permute.xlu0 %127  ;;  %v368_v5 = vadd.s32 1, %v3897_v58  ;;  %v674_v8 = vshrl.u32 %v673_v59, 23  ;;  %v778_v9 = vshrl.u32 %v777_v60, 23  ;;  %v472_v11 = vadd.s32 1, %v3901_v61 }
  0xc5   :  { %v4564_v56 = vadd.f32 %v128_v48, %v110_v39  ;;  %v4566_v57 = vadd.f32 %v128_v48, %v111_v50  ;;  %v4573_v10 = vadd.f32 %v128_v48, %v112_v41  ;;  %vm161_vm0 = vcmp.gt.s32.totalorder %v160_v0, 0  ;;  %v132_v52 = vpop.permute.xlu1 %131 }
  0xc6   :  { %v882_v13 = vshrl.u32 %v881_v1, 23  ;;  %vm265_vm1 = vcmp.gt.s32.totalorder %v264_v2, 0  ;;  %v3905_v14 = vadd.s32 4294967169, %v570_v3  ;;  %v113_v15 = vmul.f32 %v4532_v26, %v74_v33 }
  0xc7   :  { %8051 = vst [vmem:[#allocation15_spill] sm:$0xff] %v4564_v56  ;;  %8052 = vst [vmem:[#allocation16_spill] sm:$0xff] %v4566_v57  ;;  %v985_v62 = vand.u32 2139095040, %v4564_v56  ;;  %v1089_v63 = vand.u32 2139095040, %v4566_v57  ;;  %vm369_vm2 = vcmp.gt.s32.totalorder %v368_v5, 0  ;;  %v3909_v17 = vadd.s32 4294967169, %v674_v8 }
  0xc8   :  { %8053 = vst [vmem:[#allocation17_spill] sm:$0xff] %v4573_v10  ;;  %v3913_v20 = vadd.s32 4294967169, %v778_v9  ;;  %v1193_v21 = vand.u32 2139095040, %v4573_v10  ;;  %vm473_vm3 = vcmp.gt.s32.totalorder %v472_v11, 0  ;;  %v4577_v23 = vadd.f32 %v128_v48, %v113_v15 }
  0xc9   :  { %v986_v4 = vshrl.u32 %v985_v62, 23  ;;  %v1090_v12 = vshrl.u32 %v1089_v63, 23  ;;  %v162_v25 = vsel %vm161_vm0, %v160_v0, 0  ;;  %v3917_v29 = vadd.s32 4294967169, %v882_v13 }
  0xca   :  { %8054 = vst [vmem:[#allocation18_spill] sm:$0xff] %v4577_v23  ;;  %v266_v30 = vsel %vm265_vm1, %v264_v2, 0  ;;  %v370_v34 = vsel %vm369_vm2, %v368_v5, 0  ;;  %v576_v35 = vadd.s32 1, %v3905_v14  ;;  %v474_v38 = vsel %vm473_vm3, %v472_v11, 0 }
  0xcb   :  { %v3921_v16 = vadd.s32 4294967169, %v986_v4  ;;  %v3925_v24 = vadd.s32 4294967169, %v1090_v12  ;;  %v680_v39 = vadd.s32 1, %v3909_v17  ;;  %v784_v40 = vadd.s32 1, %v3913_v20 }
  0xcc   :  { %v1194_v33 = vshrl.u32 %v1193_v21, 23  ;;  %v4579_v41 = vshrl.u32 %v162_v25, 5  ;;  %v4581_v42 = vand.u32 31, %v162_v25  ;;  %v1297_v45 = vand.u32 2139095040, %v4577_v23 }
  0xcd   :  { %v992_v37 = vadd.s32 1, %v3921_v16  ;;  %v1096_v43 = vadd.s32 1, %v3925_v24  ;;  %v4584_v46 = vshrl.u32 %v266_v30, 5  ;;  %v4586_v48 = vand.u32 31, %v266_v30 }
  0xce   :  { %v4588_v49 = vshrl.u32 %v370_v34, 5  ;;  %v888_v50 = vadd.s32 1, %v3917_v29  ;;  %v4590_v54 = vand.u32 31, %v370_v34  ;;  %v4592_v55 = vshrl.u32 %v474_v38, 5 }
  0xcf   :  { %vm577_vm4 = vcmp.gt.s32.totalorder %v576_v35, 0  ;;  %vm993_vm5 = vcmp.gt.s32.totalorder %v992_v37, 0  ;;  %vm681_vm6 = vcmp.gt.s32.totalorder %v680_v39, 0  ;;  %vm785_vm7 = vcmp.gt.s32.totalorder %v784_v40, 0 }
  0xd0   :  { %8055 = vst [vmem:[#allocation19_spill] sm:$0xff] %v4588_v49  ;;  %8056 = vst [vmem:[#allocation20_spill] sm:$0xff] %v4590_v54  ;;  %v115_v58 = vmul.f32 %v4530_v22, %v4546_v36  ;;  %v3929_v59 = vadd.s32 4294967169, %v1194_v33  ;;  %v4596_v60 = vand.u32 31, %v474_v38  ;;  %vm1097_vm8 = vcmp.gt.s32.totalorder %v1096_v43, 0 }
  0xd1   :  { %v1298_v61 = vshrl.u32 %v1297_v45, 23  ;;  %v4599_v62 = vadd.f32 %v132_v52, %v4553_v44  ;;  %vm889_vm9 = vcmp.gt.s32.totalorder %v888_v50, 0  ;;  %v117_v63 = vmul.f32 %v4532_v26, %v4546_v36 }
  0xd2   :  { %v994_v0 = vsel %vm993_vm5, %v992_v37, 0  ;;  %v4603_v1 = vadd.f32 %v132_v52, %v115_v58  ;;  %v4606_v2 = vsub.s32 32, %v4581_v42  ;;  %v578_v3 = vsel %vm577_vm4, %v576_v35, 0 }
  0xd3   :  { %8057 = vst [vmem:[#allocation21_spill] sm:$0xff] %v4599_v62  ;;  %v682_v22 = vsel %vm681_vm6, %v680_v39, 0  ;;  %v786_v4 = vsel %vm785_vm7, %v784_v40, 0  ;;  %v1098_v5 = vsel %vm1097_vm8, %v1096_v43, 0  ;;  %v1200_v8 = vadd.s32 1, %v3929_v59 }
  0xd4   :  { %8058 = vst [vmem:[#allocation22_spill] sm:$0xff] %v4603_v1  ;;  %v4609_v9 = vadd.f32 %v132_v52, %v4559_v51  ;;  %v4611_v44 = vadd.f32 %v132_v52, %v117_v63  ;;  %v890_v11 = vsel %vm889_vm9, %v888_v50, 0  ;;  %v4613_v12 = vand.u32 31, %v994_v0 }
  0xd5   :  { %v3933_v26 = vadd.s32 4294967169, %v1298_v61  ;;  %v1401_v36 = vand.u32 2139095040, %v4599_v62  ;;  %v4617_v13 = vsub.s32 32, %v4586_v48  ;;  %v4619_v14 = vand.u32 31, %v578_v3 }
  0xd6   :  { %8059 = vst [vmem:[#allocation23_spill] sm:$0xff] %v4609_v9  ;;  %8060 = vst [vmem:[#allocation24_spill] sm:$0xff] %v4611_v44  ;;  %v4621_v15 = vand.u32 31, %v682_v22  ;;  %v1505_v16 = vand.u32 2139095040, %v4603_v1  ;;  %v4625_v51 = vsub.s32 32, %v4590_v54  ;;  %v4628_v17 = vsub.s32 32, %v4596_v60 }
  0xd7   :  { %8061 = vst [vmem:[#allocation25_spill] sm:$0xff] %v4613_v12  ;;  %v4630_v20 = vand.u32 31, %v786_v4  ;;  %v4632_v21 = vand.u32 31, %v1098_v5  ;;  %v4634_v24 = vand.u32 31, %v890_v11  ;;  %vm1201_vm10 = vcmp.gt.s32.totalorder %v1200_v8, 0 }
  0xd8   :  { %8062 = vst [vmem:[#allocation26_spill] sm:$0xff] %v4625_v51  ;;  %v1609_v25 = vand.u32 2139095040, %v4609_v9  ;;  %v1713_v29 = vand.u32 2139095040, %v4611_v44  ;;  %v4638_v30 = vshrl.u32 %v578_v3, 5  ;;  %v4641_v34 = vsub.s32 32, %v4613_v12 }
  0xd9   :  { %8063 = vst [vmem:[#allocation27_spill] sm:$0xff] %v4630_v20  ;;  %8064 = vst [vmem:[#allocation28_spill] sm:$0xff] %v4632_v21  ;;  %v1304_v35 = vadd.s32 1, %v3933_v26  ;;  %v1402_v37 = vshrl.u32 %v1401_v36, 23  ;;  %v4644_v38 = vsub.s32 32, %v4619_v14  ;;  %v4646_v39 = vshrl.u32 %v682_v22, 5 }
  0xda   :  { %8065 = vst [vmem:[#allocation29_spill] sm:$0xff] %v4641_v34  ;;  %v4649_v40 = vsub.s32 32, %v4621_v15  ;;  %v1506_v33 = vshrl.u32 %v1505_v16, 23  ;;  %v4651_v43 = vshrl.u32 %v786_v4, 5  ;;  %v4653_v45 = vshrl.u32 %v890_v11, 5 }
  0xdb   :  { %v4656_v50 = vsub.s32 32, %v4632_v21  ;;  %v1202_v52 = vsel %vm1201_vm10, %v1200_v8, 0  ;;  %v4659_v58 = vsub.s32 32, %v4630_v20  ;;  %v4662_v59 = vsub.s32 32, %v4634_v24 }
  0xdc   :  { %8066 = vst [vmem:[#allocation30_spill] sm:$0xff] %v4651_v43  ;;  %v1610_v61 = vshrl.u32 %v1609_v25, 23  ;;  %v1714_v63 = vshrl.u32 %v1713_v29, 23  ;;  %v7948_v3 = vmov 920167782   ;;  %vm1305_vm11 = vcmp.gt.s32.totalorder %v1304_v35, 0 }
  0xdd   :  { %8067 = vst [vmem:[#allocation31_spill] sm:$0xff] %v4656_v50  ;;  %8068 = vst [vmem:[#allocation32_spill] sm:$0xff] %v4659_v58  ;;  %v1009_v22 = vshrl.u32 %v7948_v3, %v4641_v34  ;;  %v7938_v4 = vmov 1326507024   ;;  %v3937_v26 = vadd.s32 4294967169, %v1402_v37  ;;  %v4668_v36 = vshrl.u32 %v994_v0, 5 }
  0xde   :  { %v1012_v11 = vshrl.u32 %v7938_v4, %v4641_v34  ;;  %v4670_v8 = vshrl.u32 %v1098_v5, 5  ;;  %v4672_v16 = vand.u32 31, %v1202_v52  ;;  %v3941_v6 = vadd.s32 4294967169, %v1506_v33 }
  0xdf   :  { %8069 = vst [vmem:[#allocation33_spill] sm:$0xff] %v4668_v36  ;;  %v1008_v25 = vshll.u32 %v7942_v7, %v4613_v12  ;;  %v1011_v29 = vshll.u32 %v7948_v3, %v4613_v12  ;;  %v1113_v9 = vshrl.u32 %v7948_v3, %v4656_v50  ;;  %v1116_v37 = vshrl.u32 %v7938_v4, %v4656_v50 }
  0xe0   :  { %8070 = vst [vmem:[#allocation34_spill] sm:$0xff] %v4670_v8  ;;  %8071 = vst [vmem:[#allocation35_spill] sm:$0xff] %v4672_v16  ;;  %v1112_v0 = vshll.u32 %v7942_v7, %v4632_v21  ;;  %v1306_v5 = vsel %vm1305_vm11, %v1304_v35, 0  ;;  %v4684_v10 = vadd.s32 4294967169, %v1610_v61  ;;  %v4686_v33 = vadd.s32 4294967169, %v1714_v63 }
  0xe1   :  { %v4688_v62 = vor.u32 %v1009_v22, %v1008_v25  ;;  %v1013_v34 = vor.u32 %v1012_v11, %v1011_v29  ;;  %v1115_v12 = vshll.u32 %v7948_v3, %v4632_v21  ;;  %v7947_v56 = vand.u32 2147483647, %v4540_v31 }
  0xe2   :  { %vm1017_vm12 = vcmp.lt.s32.totalorder %v4668_v36, 4  ;;  %v4695_v4 = vsub.s32 32, %v4672_v16  ;;  %v4697_v44 = vadd.s32 1, %v3937_v26  ;;  %v4699_v35 = vadd.s32 1, %v3941_v6 }
  0xe3   :  { %8072 = vst [vmem:[#allocation36_spill] sm:$0xff] %v4688_v62  ;;  %v4701_v61 = vor.u32 %v1113_v9, %v1112_v0  ;;  %v1117_v63 = vor.u32 %v1116_v37, %v1115_v12  ;;  %vm1121_vm13 = vcmp.lt.s32.totalorder %v4670_v8, 4  ;;  %v4704_v22 = vand.u32 31, %v1306_v5 }
  0xe4   :  { %8073 = vst [vmem:[#allocation37_spill] sm:$0xff] %v4695_v4  ;;  %v4706_v11 = vshrl.u32 %v1202_v52, 5  ;;  %v1216_v25 = vshll.u32 %v7942_v7, %v4672_v16  ;;  %v4712_v29 = vshll.u32 %v7948_v3, %v4672_v16  ;;  %v4714_v26 = vshrl.u32 %v1306_v5, 5 }
  0xe5   :  { %8074 = vst [vmem:[#allocation38_spill] sm:$0xff] %v4701_v61  ;;  %8075 = vst [vmem:[#allocation39_spill] sm:$0xff] %v4704_v22  ;;  %v4719_v6 = vsel %vm1017_vm12, %v4688_v62, 920167782  ;;  %v4723_v9 = vsel %vm1017_vm12, %v1013_v34, 1326507024  ;;  %v1217_v0 = vshrl.u32 %v7948_v3, %v4695_v4 }
  0xe6   :  { %8076 = vst [vmem:[#allocation40_spill] sm:$0xff] %v4706_v11  ;;  %8077 = vst [vmem:[#allocation41_spill] sm:$0xff] %v4719_v6  ;;  %v261_v12 = vand.u32 8388607, %v7947_v56  ;;  %v7952_v52 = vmov 2475754826  }
  0xe7   :  { %8078 = vst [vmem:[#allocation42_spill] sm:$0xff] %v4723_v9  ;;  %v272_v37 = vshrl.u32 %v7952_v52, %v4617_v13  ;;  %v7950_v5 = vmov 683565275   ;;  %v274_v16 = vshll.u32 %v7952_v52, %v4586_v48  ;;  %v7954_v62 = vmov 2131351028  }
  0xe8   :  { %v271_v7 = vshll.u32 %v7950_v5, %v4586_v48  ;;  %v275_v34 = vshrl.u32 %v7954_v62, %v4617_v13  ;;  %v4740_v56 = vsel %vm1121_vm13, %v4701_v61, 920167782  ;;  %v4744_v9 = vsel %vm1121_vm13, %v1117_v63, 1326507024 }
  0xe9   :  { %8079 = vst [vmem:[#allocation43_spill] sm:$0xff] %v4740_v56  ;;  %8080 = vst [vmem:[#allocation44_spill] sm:$0xff] %v4744_v9  ;;  %v8081_v3 = vmov 1326507024   ;;  %v4751_v5 = vsub.s32 32, %v4704_v22  ;;  %vm1409_vm14 = vcmp.gt.s32.totalorder %v4697_v44, 0  ;;  %v4775_v58 = vor.u32 %v1217_v0, %v1216_v25 }
  0xea   :  { %v4748_v6 = vshrl.u32 %v8081_v3, %v4695_v4  ;;  %v273_v52 = vor.u32 %v272_v37, %v271_v7  ;;  %v276_v62 = vor.u32 %v275_v34, %v274_v16  ;;  %v8083_v36 = vmov 2131351028  }
  0xeb   :  { %8082 = vst [vmem:[#allocation45_spill] sm:$0xff] %v4751_v5  ;;  %v277_v23 = vshll.u32 %v8083_v36, %v4586_v48  ;;  %v8084_v1 = vmov 2102212464   ;;  %v262_v9 = vor.u32 8388608, %v261_v12  ;;  %v8085_v56 = vmov 920167782  }
  0xec   :  { %v278_v61 = vshrl.u32 %v8084_v1, %v4617_v13  ;;  %v4760_v63 = vshll.u32 %v8084_v1, %v4704_v22  ;;  %v280_v4 = vshll.u32 %v8084_v1, %v4586_v48  ;;  %v281_v8 = vshrl.u32 %v8085_v56, %v4617_v13  ;;  %8087 = vst [vmem:[#allocation46_spill] sm:$0xff] %v4775_v58 }
  0xed   :  { %v8086_v7 = vmov 683565275   ;;  %v283_v34 = vshll.u32 %v8085_v56, %v4586_v48  ;;  %v284_v21 = vshrl.u32 %v8081_v3, %v4617_v13  ;;  %vm286_vm15 = vcmp.lt.s32.totalorder %v4584_v46, 1 }
  0xee   :  { %v270_v16 = vshrl.u32 %v8086_v7, %v4617_v13  ;;  %v279_v37 = vor.u32 %v278_v61, %v277_v23  ;;  %v282_v50 = vor.u32 %v281_v8, %v280_v4  ;;  %vm288_vm0 = vcmp.lt.s32.totalorder %v4584_v46, 3 }
  0xef   :  { %vm289_vm1 = vcmp.lt.s32.totalorder %v4584_v46, 4  ;;  %v285_v12 = vor.u32 %v284_v21, %v283_v34  ;;  %v294_v20 = vsel %vm286_vm15, %v273_v52, %v276_v62  ;;  %vm287_vm2 = vcmp.lt.s32.totalorder %v4584_v46, 2 }
  0xf0   :  { %v290_v57 = vsel %vm286_vm15, %v270_v16, %v273_v52  ;;  %v291_v43 = vsel %vm289_vm1, %v279_v37, 2102212464  ;;  %v295_v48 = vsel %vm289_vm1, %v282_v50, 920167782  ;;  %v298_v61 = vsel %vm286_vm15, %v276_v62, %v279_v37 }
  0xf1   :  { %v292_v23 = vsel %vm288_vm0, %v276_v62, %v291_v43  ;;  %v296_v13 = vsel %vm288_vm0, %v279_v37, %v295_v48  ;;  %v299_v4 = vsel %vm289_vm1, %v285_v12, 1326507024  ;;  %v302_v8 = vshll.u32 %v262_v9, 8 }
  0xf2   :  { %v293_v28 = vsel %vm287_vm2, %v290_v57, %v292_v23  ;;  %v297_v49 = vsel %vm287_vm2, %v294_v20, %v296_v13  ;;  %v300_v21 = vsel %vm288_vm0, %v282_v50, %v299_v4  ;;  %v7980_v25 = vand.u32 2147483647, %v4555_v47 }
  0xf3   :  { %v1221_v52 = vor.u32 %v4748_v6, %v4712_v29  ;;  %v301_v43 = vsel %vm287_vm2, %v298_v61, %v300_v21  ;;  %v4787_v0 = vmul.u32.u64.low %v302_v8, %v297_v49  ;;  %v4788_v62 = vmul.u32.u64.high %v302_v8, %v297_v49, %v4787_v0 }
  0xf4   :  { %v1321_v16 = vshrl.u32 %v8085_v56, %v4751_v5  ;;  %v4793_v37 = vmul.u32.u64.low %v302_v8, %v301_v43  ;;  %v4794_v9 = vmul.u32.u64.high %v302_v8, %v301_v43, %v4793_v37  ;;  %v677_v57 = vand.u32 8388607, %v7980_v25 }
  0xf5   :  { %v1410_v46 = vsel %vm1409_vm14, %v4697_v44, 0  ;;  %vm1513_vm3 = vcmp.gt.s32.totalorder %v4699_v35, 0  ;;  %v309_v20 = vmul.u32 %v302_v8, %v293_v28  ;;  %v687_v49 = vshll.u32 %v8086_v7, %v4621_v15 }
  0xf6   :  { %v8088_v50 = vmov 2475754826   ;;  %v691_v34 = vshrl.u32 %v8083_v36, %v4649_v40  ;;  %v693_v12 = vshll.u32 %v8083_v36, %v4621_v15  ;;  %v694_v44 = vshrl.u32 %v8084_v1, %v4649_v40 }
  0xf7   :  { %v688_v29 = vshrl.u32 %v8088_v50, %v4649_v40  ;;  %v690_v6 = vshll.u32 %v8088_v50, %v4621_v15  ;;  %v312_v28 = vadd.s32 1, %v4788_v62  ;;  %v696_v48 = vshll.u32 %v8084_v1, %v4621_v15 }
  0xf8   :  { %v697_v61 = vshrl.u32 %v8085_v56, %v4649_v40  ;;  %vm1225_vm4 = vcmp.lt.s32.totalorder %v4706_v11, 4  ;;  %vm311_vm5 = vc.u32 %v4794_v9, %v4787_v0  ;;  %v678_v13 = vor.u32 8388608, %v677_v57 }
  0xf9   :  { %v689_v23 = vor.u32 %v688_v29, %v687_v49  ;;  %v692_v4 = vor.u32 %v691_v34, %v690_v6  ;;  %v695_v8 = vor.u32 %v694_v44, %v693_v12  ;;  %v313_v21 = vsel %vm311_vm5, %v312_v28, %v4788_v62 }
  0xfa   :  { %v698_v43 = vor.u32 %v697_v61, %v696_v48  ;;  %v699_v37 = vshll.u32 %v8085_v56, %v4621_v15  ;;  %v700_v49 = vshrl.u32 %v8081_v3, %v4649_v40  ;;  %v314_v29 = vadd.s32 %v313_v21, %v309_v20 }
  0xfb   :  { %v686_v25 = vshrl.u32 %v8086_v7, %v4649_v40  ;;  %vm702_vm6 = vcmp.lt.s32.totalorder %v4646_v39, 1  ;;  %vm703_vm7 = vcmp.lt.s32.totalorder %v4646_v39, 2  ;;  %vm704_vm8 = vcmp.lt.s32.totalorder %v4646_v39, 3 }
  0xfc   :  { %v701_v57 = vor.u32 %v700_v49, %v699_v37  ;;  %vm705_vm9 = vcmp.lt.s32.totalorder %v4646_v39, 4  ;;  %v710_v62 = vsel %vm702_vm6, %v689_v23, %v692_v4  ;;  %v315_v6 = vadd.s32 536870912, %v314_v29 }
  0xfd   :  { %v707_v34 = vsel %vm705_vm9, %v695_v8, 2102212464  ;;  %v711_v15 = vsel %vm705_vm9, %v698_v43, 920167782  ;;  %v714_v12 = vsel %vm702_vm6, %v692_v4, %v695_v8  ;;  %v706_v44 = vsel %vm702_vm6, %v686_v25, %v689_v23 }
  0xfe   :  { %v712_v28 = vsel %vm704_vm8, %v695_v8, %v711_v15  ;;  %v715_v20 = vsel %vm705_vm9, %v701_v57, 1326507024  ;;  %v718_v48 = vshll.u32 %v678_v13, 8  ;;  %v316_v61 = vshrl.u32 %v315_v6, 30 }
  0xff   :  { %v708_v40 = vsel %vm704_vm8, %v692_v4, %v707_v34  ;;  %v713_v21 = vsel %vm703_vm7, %v710_v62, %v712_v28  ;;  %v716_v51 = vsel %vm704_vm8, %v698_v43, %v715_v20  ;;  %v4837_v37 = vshrl.u32 %v8081_v3, %v4751_v5 }
 0x100   :  { %v717_v49 = vsel %vm703_vm7, %v714_v12, %v716_v51  ;;  %v4841_v54 = vmul.u32.u64.low %v718_v48, %v713_v21  ;;  %v4842_v19 = vmul.u32.u64.high %v718_v48, %v713_v21, %v4841_v54  ;;  %v1514_v25 = vsel %vm1513_vm3, %v4699_v35, 0 }
 0x101   :  { %v317_v23 = vshll.u32 %v316_v61, 30  ;;  %v4848_v13 = vmul.u32.u64.low %v718_v48, %v717_v49  ;;  %v4849_v4 = vmul.u32.u64.high %v718_v48, %v717_v49, %v4848_v13  ;;  %v4854_v8 = vsel %vm1225_vm4, %v4775_v58, 920167782 }
 0x102   :  { %8089 = vst [vmem:[#allocation47_spill] sm:$0xff] %v4854_v8  ;;  %v4858_v51 = vshll.u32 %v8085_v56, %v4704_v22  ;;  %v4860_v43 = vand.u32 31, %v1410_v46  ;;  %v709_v57 = vsel %vm703_vm7, %v706_v44, %v708_v40  ;;  %v4866_v35 = vsel %vm1225_vm4, %v1221_v52, 1326507024 }
 0x103   :  { %8091 = vst [vmem:[#allocation49_spill] sm:$0xff] %v4866_v35  ;;  %v4869_v62 = vor.u32 %v1321_v16, %v4760_v63  ;;  %v4871_v6 = vshrl.u32 %v1410_v46, 5  ;;  %v4873_v34 = vsub.s32 %v314_v29, %v317_v23  ;;  %v4877_v12 = vshrl.u32 %v1514_v25, 5 }
 0x104   :  { %8090 = vst [vmem:[#allocation48_spill] sm:$0xff] %v4860_v43  ;;  %v340_v28 = vsub.s32 4, %v316_v61  ;;  %v728_v39 = vadd.s32 1, %v4842_v19  ;;  %v725_v20 = vmul.u32 %v718_v48, %v709_v57  ;;  %vm727_vm10 = vc.u32 %v4849_v4, %v4841_v54 }
 0x105   :  { %8092 = vst [vmem:[#allocation50_spill] sm:$0xff] %v4871_v6  ;;  %8093 = vst [vmem:[#allocation51_spill] sm:$0xff] %v4877_v12  ;;  %v320_v44 = vsub.s32 0, %v4873_v34  ;;  %v7986_v63 = vand.u32 2147483647, %v4542_v32  ;;  %v4885_v52 = vsub.s32 32, %v4860_v43  ;;  %v4889_v16 = vshll.u32 %v8084_v1, %v4860_v43 }
 0x106   :  { %v4891_v46 = vand.u32 31, %v1514_v25  ;;  %v729_v29 = vsel %vm727_vm10, %v728_v39, %v4842_v19  ;;  %v4896_v40 = vshll.u32 %v8085_v56, %v4860_v43  ;;  %vm256_vm11 = vcmp.lt.s32.totalorder %v4540_v31, 0 }
 0x107   :  { %v3894_v48 = vmin.u32 %v320_v44, %v4873_v34  ;;  %v730_v21 = vadd.s32 %v729_v29, %v725_v20  ;;  %v8094_v49 = vand.u32 2147483647, %v4540_v31  ;;  %v310_v25 = vadd.s32 %v4787_v0, %v4794_v9 }
 0x108   :  { %v341_v19 = vsel %vm256_vm11, %v340_v28, %v316_v61  ;;  %v489_v13 = vshrl.u32 %v8085_v56, %v4628_v17  ;;  %v469_v39 = vand.u32 8388607, %v7986_v63  ;;  %v478_v44 = vshrl.u32 %v8086_v7, %v4628_v17 }
 0x109   :  { %vm4902_vm14 = vcmp.le.f32.partialorder %v8094_v49, 0.7853982  ;;  %v322_v57 = vclz %v3894_v48  ;;  %v480_v20 = vshrl.u32 %v8088_v50, %v4628_v17  ;;  %v731_v29 = vadd.s32 536870912, %v730_v21 }
 0x10a   :  { %v483_v0 = vshrl.u32 %v8083_v36, %v4628_v17  ;;  %v486_v9 = vshrl.u32 %v8084_v1, %v4628_v17  ;;  %v488_v61 = vshll.u32 %v8084_v1, %v4596_v60  ;;  %v343_v48 = vsel %vm4902_vm14, 0, %v341_v19 }
 0x10b   :  { %v3895_v28 = vadd.s32 4294967294, %v322_v57  ;;  %v479_v49 = vshll.u32 %v8086_v7, %v4596_v60  ;;  %v492_v63 = vshrl.u32 %v8081_v3, %v4628_v17  ;;  %v732_v15 = vshrl.u32 %v731_v29, 30 }
 0x10c   :  { %v482_v8 = vshll.u32 %v8088_v50, %v4596_v60  ;;  %v485_v58 = vshll.u32 %v8083_v36, %v4596_v60  ;;  %v490_v35 = vor.u32 %v489_v13, %v488_v61  ;;  %vm672_vm0 = vcmp.lt.s32.totalorder %v4555_v47, 0 }
 0x10d   :  { %vm3896_vm15 = vcmp.lt.s32.totalorder %v3895_v28, 0  ;;  %v470_v57 = vor.u32 8388608, %v469_v39  ;;  %v481_v11 = vor.u32 %v480_v20, %v479_v49  ;;  %v491_v19 = vshll.u32 %v8085_v56, %v4596_v60 }
 0x10e   :  { %v325_v43 = vsel %vm3896_vm15, 0, %v3895_v28  ;;  %v733_v22 = vshll.u32 %v732_v15, 30  ;;  %v484_v5 = vor.u32 %v483_v0, %v482_v8  ;;  %v487_v17 = vor.u32 %v486_v9, %v485_v58 }
 0x10f   :  { %v326_v29 = vsub.s32 32, %v325_v43  ;;  %v330_v12 = vsub.s32 4294967266, %v325_v43  ;;  %v493_v6 = vor.u32 %v492_v63, %v491_v19  ;;  %vm497_vm1 = vcmp.lt.s32.totalorder %v4592_v55, 4 }
 0x110   :  { %vm1329_vm2 = vcmp.lt.s32.totalorder %v4714_v26, 4  ;;  %v4939_v13 = vsub.s32 %v730_v21, %v733_v22  ;;  %vm494_vm3 = vcmp.lt.s32.totalorder %v4592_v55, 1  ;;  %vm496_vm5 = vcmp.lt.s32.totalorder %v4592_v55, 3 }
 0x111   :  { %v503_v60 = vsel %vm497_vm1, %v490_v35, 920167782  ;;  %v327_v39 = vshll.u32 %v4873_v34, %v325_v43  ;;  %v328_v8 = vshrl.u32 %v310_v25, %v326_v29  ;;  %v331_v58 = vadd.s32 127, %v330_v12 }
 0x112   :  { %v756_v20 = vsub.s32 4, %v732_v15  ;;  %v736_v63 = vsub.s32 0, %v4939_v13  ;;  %v502_v0 = vsel %vm494_vm3, %v481_v11, %v484_v5  ;;  %v504_v22 = vsel %vm496_vm5, %v487_v17, %v503_v60 }
 0x113   :  { %v506_v21 = vsel %vm494_vm3, %v484_v5, %v487_v17  ;;  %v329_v9 = vor.u32 %v328_v8, %v327_v39  ;;  %v332_v61 = vshll.u32 %v331_v58, 23  ;;  %v499_v28 = vsel %vm497_vm1, %v487_v17, 2102212464 }
 0x114   :  { %v507_v43 = vsel %vm497_vm1, %v493_v6, 1326507024  ;;  %v347_v34 = vadd.s32 3, %v343_v48  ;;  %v3910_v12 = vmin.u32 %v736_v63, %v4939_v13  ;;  %vm495_vm6 = vcmp.lt.s32.totalorder %v4592_v55, 2 }
 0x115   :  { %v508_v25 = vsel %vm496_vm5, %v490_v35, %v507_v43  ;;  %v333_v49 = vor.u32 4788187, %v332_v61  ;;  %v505_v19 = vsel %vm495_vm6, %v502_v0, %v504_v22  ;;  %v510_v60 = vshll.u32 %v470_v57, 8 }
 0x116   :  { %v509_v29 = vsel %vm495_vm6, %v506_v21, %v508_v25  ;;  %v738_v17 = vclz %v3910_v12  ;;  %v757_v6 = vsel %vm672_vm0, %v756_v20, %v732_v15  ;;  %v498_v48 = vsel %vm494_vm3, %v478_v44, %v481_v11 }
 0x117   :  { %v500_v39 = vsel %vm496_vm5, %v484_v5, %v499_v28  ;;  %v334_v8 = vand.u32 2147483647, %v333_v49  ;;  %v336_v35 = vcvt.s32.f32 %v329_v9  ;;  %v8097_v0 = vand.u32 2147483647, %v4555_v47 }
 0x118   :  { %v4971_v58 = vmul.u32.u64.low %v510_v60, %v509_v29  ;;  %v4972_v63 = vmul.u32.u64.high %v510_v60, %v509_v29, %v4971_v58  ;;  %v3911_v57 = vadd.s32 4294967294, %v738_v17  ;;  %v4987_v11 = vsel %vm1329_vm2, %v4869_v62, 920167782 }
 0x119   :  { %vm4976_vm7 = vcmp.le.f32.partialorder %v8097_v0, 0.7853982  ;;  %v4980_v21 = vmul.u32.u64.low %v510_v60, %v505_v19  ;;  %v4981_v15 = vmul.u32.u64.high %v510_v60, %v505_v19, %v4980_v21  ;;  %v337_v5 = vmul.f32 %v336_v35, %v334_v8 }
 0x11a   :  { %v759_v44 = vsel %vm4976_vm7, 0, %v757_v6  ;;  %v878_v20 = vand.u32 2147483647, %v4561_v53  ;;  %v8100_v9 = vor.u32 %v4837_v37, %v4858_v51  ;;  %v726_v28 = vadd.s32 %v4841_v54, %v4849_v4 }
 0x11b   :  { %vm3912_vm8 = vcmp.lt.s32.totalorder %v3911_v57, 0  ;;  %v501_v43 = vsel %vm495_vm6, %v498_v48, %v500_v39  ;;  %v338_v12 = vxor.u32 2147483648, %v337_v5  ;;  %v5003_v25 = vand.u32 3, %v347_v34 }
 0x11c   :  { %v4997_v61 = vsel %vm1329_vm2, %v8100_v9, 1326507024  ;;  %v741_v49 = vsel %vm3912_vm8, 0, %v3911_v57  ;;  %vm519_vm9 = vc.u32 %v4972_v63, %v4980_v21  ;;  %v763_v51 = vadd.s32 3, %v759_v44 }
 0x11d   :  { %v742_v19 = vsub.s32 32, %v741_v49  ;;  %v746_v37 = vsub.s32 4294967266, %v741_v49  ;;  %v520_v29 = vadd.s32 1, %v4981_v15  ;;  %v339_v17 = vsel %vm256_vm11, %v338_v12, %v337_v5 }
 0x11e   :  { %v743_v54 = vshll.u32 %v4939_v13, %v741_v49  ;;  %v517_v4 = vmul.u32 %v510_v60, %v501_v43  ;;  %v5013_v55 = vand.u32 8388607, %v878_v20  ;;  %v342_v34 = vsel %vm4902_vm14, %v4540_v31, %v339_v17 }
 0x11f   :  { %v744_v6 = vshrl.u32 %v726_v28, %v742_v19  ;;  %v747_v48 = vadd.s32 127, %v746_v37  ;;  %v521_v39 = vsel %vm519_vm9, %v520_v29, %v4981_v15  ;;  %4213 = vcosq.f32 %v342_v34 }
 0x120   :  { %v522_v8 = vadd.s32 %v521_v39, %v517_v4  ;;  %v896_v35 = vshrl.u32 %v8088_v50, %v4662_v59  ;;  %v899_v13 = vshrl.u32 %v8083_v36, %v4662_v59  ;;  %4215 = vsinq.f32 %v342_v34 }
 0x121   :  { %v745_v60 = vor.u32 %v744_v6, %v743_v54  ;;  %v748_v58 = vshll.u32 %v747_v48, 23  ;;  %v902_v0 = vshrl.u32 %v8084_v1, %v4662_v59  ;;  %v895_v57 = vshll.u32 %v8086_v7, %v4634_v24 }
 0x122   :  { %v523_v23 = vadd.s32 536870912, %v522_v8  ;;  %v904_v15 = vshll.u32 %v8084_v1, %v4634_v24  ;;  %v905_v5 = vshrl.u32 %v8085_v56, %v4662_v59  ;;  %v898_v9 = vshll.u32 %v8088_v50, %v4634_v24 }
 0x123   :  { %v749_v44 = vor.u32 4788187, %v748_v58  ;;  %v901_v28 = vshll.u32 %v8083_v36, %v4634_v24  ;;  %v908_v43 = vshrl.u32 %v8081_v3, %v4662_v59  ;;  %v897_v49 = vor.u32 %v896_v35, %v895_v57 }
 0x124   :  { %v524_v12 = vshrl.u32 %v523_v23, 30  ;;  %v906_v19 = vor.u32 %v905_v5, %v904_v15  ;;  %v907_v37 = vshll.u32 %v8085_v56, %v4634_v24  ;;  %vm350_vm10 = vcmp.eq.s32.totalorder %v5003_v25, 0 }
 0x125   :  { %vm353_vm11 = vcmp.eq.s32.totalorder %v5003_v25, 2  ;;  %v750_v29 = vand.u32 2147483647, %v749_v44  ;;  %v752_v17 = vcvt.s32.f32 %v745_v60  ;;  %v900_v54 = vor.u32 %v899_v13, %v898_v9 }
 0x126   :  { %v903_v4 = vor.u32 %v902_v0, %v901_v28  ;;  %v5041_v34 = vand.u32 3, %v763_v51  ;;  %vm464_vm14 = vcmp.lt.s32.totalorder %v4542_v32, 0  ;;  %v525_v6 = vshll.u32 %v524_v12, 30 }
 0x127   :  { %v909_v48 = vor.u32 %v908_v43, %v907_v37  ;;  %vm913_vm15 = vcmp.lt.s32.totalorder %v4653_v45, 4  ;;  %v753_v39 = vmul.f32 %v752_v17, %v750_v29  ;;  %v886_v35 = vor.u32 8388608, %v5013_v55 }
 0x128   :  { %v894_v24 = vshrl.u32 %v8086_v7, %v4662_v59  ;;  %v919_v58 = vsel %vm913_vm15, %v906_v19, 920167782  ;;  %v5050_v60 = vsub.s32 %v522_v8, %v525_v6  ;;  %vm910_vm1 = vcmp.lt.s32.totalorder %v4653_v45, 1 }
 0x129   :  { %vm911_vm3 = vcmp.lt.s32.totalorder %v4653_v45, 2  ;;  %vm912_vm5 = vcmp.lt.s32.totalorder %v4653_v45, 3  ;;  %v754_v51 = vxor.u32 2147483648, %v753_v39  ;;  %v548_v13 = vsub.s32 4, %v524_v12  ;;  %v4214_v23 = vpop.eup %4213 }
 0x12a   :  { %v915_v0 = vsel %vm913_vm15, %v903_v4, 2102212464  ;;  %v918_v55 = vsel %vm910_vm1, %v897_v49, %v900_v54  ;;  %v528_v59 = vsub.s32 0, %v5050_v60  ;;  %v920_v57 = vsel %vm912_vm5, %v903_v4, %v919_v58  ;;  %v4216_v5 = vpop.eup %4215 }
 0x12b   :  { %v922_v8 = vsel %vm910_vm1, %v900_v54, %v903_v4  ;;  %v923_v15 = vsel %vm913_vm15, %v909_v48, 1326507024  ;;  %v354_v44 = vxor.u32 2147483648, %v4214_v23  ;;  %v755_v9 = vsel %vm672_vm0, %v754_v51, %v753_v39 }
 0x12c   :  { %v914_v28 = vsel %vm910_vm1, %v894_v24, %v897_v49  ;;  %v924_v43 = vsel %vm912_vm5, %v906_v19, %v923_v15  ;;  %v351_v37 = vxor.u32 2147483648, %v4216_v5  ;;  %v758_v29 = vsel %vm4976_vm7, %v4555_v47, %v755_v9 }
 0x12d   :  { %v3902_v17 = vmin.u32 %v528_v59, %v5050_v60  ;;  %v916_v4 = vsel %vm912_vm5, %v900_v54, %v915_v0  ;;  %4217 = vcosq.f32 %v758_v29  ;;  %v921_v6 = vsel %vm911_vm3, %v918_v55, %v920_v57 }
 0x12e   :  { %v925_v49 = vsel %vm911_vm3, %v922_v8, %v924_v43  ;;  %v926_v48 = vshll.u32 %v886_v35, 8  ;;  %v352_v19 = vsel %vm350_vm10, %v4214_v23, %v351_v37  ;;  %v355_v22 = vsel %vm353_vm11, %v354_v44, %v4216_v5 }
 0x12f   :  { %4219 = vsinq.f32 %v758_v29  ;;  %v530_v39 = vclz %v3902_v17  ;;  %v5081_v24 = vsub.s32 32, %v4891_v46  ;;  %v5085_v54 = vshll.u32 %v8084_v1, %v4891_v46 }
 0x130   :  { %vm349_vm0 = vcmp.lt.s32.totalorder %v5003_v25, 2  ;;  %v5090_v35 = vsel %vm464_vm14, %v548_v13, %v524_v12  ;;  %v917_v51 = vsel %vm911_vm3, %v914_v28, %v916_v4  ;;  %v7999_v8 = vand.u32 2147483647, %v4525_v18 }
 0x131   :  { %v3903_v58 = vadd.s32 4294967294, %v530_v39  ;;  %v5094_v0 = vmul.u32.u64.low %v926_v48, %v925_v49  ;;  %v5095_v55 = vmul.u32.u64.high %v926_v48, %v925_v49, %v5094_v0  ;;  %v356_v23 = vsel %vm349_vm0, %v352_v19, %v355_v22 }
 0x132   :  { %v5097_v59 = vmul.u32.u64.low %v926_v48, %v921_v6  ;;  %v5098_v57 = vmul.u32.u64.high %v926_v48, %v921_v6, %v5097_v59  ;;  %vm346_vm6 = vweird.f32 %v4540_v31  ;;  %vm766_vm7 = vcmp.eq.s32.totalorder %v5041_v34, 0 }
 0x133   :  { %v8101_v25 = vand.u32 2147483647, %v4542_v32  ;;  %vm3904_vm9 = vcmp.lt.s32.totalorder %v3903_v58, 0  ;;  %vm765_vm10 = vcmp.lt.s32.totalorder %v5041_v34, 2  ;;  %vm769_vm11 = vcmp.eq.s32.totalorder %v5041_v34, 2 }
 0x134   :  { %v518_v45 = vadd.s32 %v4980_v21, %v4972_v63  ;;  %v533_v13 = vsel %vm3904_vm9, 0, %v3903_v58  ;;  %v357_v15 = vsel %vm346_vm6, nan, %v356_v23  ;;  %vm762_vm15 = vweird.f32 %v4555_v47 }
 0x135   :  { %vm5106_vm8 = vcmp.le.f32.partialorder %v8101_v25, 0.7853982  ;;  %v534_v5 = vsub.s32 32, %v533_v13  ;;  %v538_v44 = vsub.s32 4294967266, %v533_v13  ;;  %v933_v9 = vmul.u32 %v926_v48, %v917_v51 }
 0x136   :  { %v551_v31 = vsel %vm5106_vm8, 0, %v5090_v35  ;;  %vm935_vm1 = vc.u32 %v5095_v55, %v5097_v59  ;;  %v936_v28 = vadd.s32 1, %v5098_v57  ;;  %v157_v43 = vand.u32 8388607, %v7999_v8 }
 0x137   :  { %v168_v63 = vshrl.u32 %v8088_v50, %v4606_v2  ;;  %v535_v21 = vshll.u32 %v5050_v60, %v533_v13  ;;  %v536_v37 = vshrl.u32 %v518_v45, %v534_v5  ;;  %v539_v29 = vadd.s32 127, %v538_v44  ;;  %v4218_v4 = vpop.eup %4217 }
 0x138   :  { %v167_v17 = vshll.u32 %v8086_v7, %v4581_v42  ;;  %v937_v6 = vsel %vm935_vm1, %v936_v28, %v5098_v57  ;;  %v170_v49 = vshll.u32 %v8088_v50, %v4581_v42  ;;  %v171_v48 = vshrl.u32 %v8083_v36, %v4606_v2 }
 0x139   :  { %v177_v19 = vshrl.u32 %v8085_v56, %v4606_v2  ;;  %v4220_v22 = vpop.eup %4219  ;;  %v770_v39 = vxor.u32 2147483648, %v4218_v4  ;;  %v537_v60 = vor.u32 %v536_v37, %v535_v21  ;;  %v540_v35 = vshll.u32 %v539_v29, 23 }
 0x13a   :  { %v938_v58 = vadd.s32 %v937_v6, %v933_v9  ;;  %v767_v51 = vxor.u32 2147483648, %v4220_v22  ;;  %v169_v0 = vor.u32 %v168_v63, %v167_v17  ;;  %v174_v23 = vshrl.u32 %v8084_v1, %v4606_v2 }
 0x13b   :  { %v176_v57 = vshll.u32 %v8084_v1, %v4581_v42  ;;  %v771_v25 = vsel %vm769_vm11, %v770_v39, %v4220_v22  ;;  %v541_v45 = vor.u32 4788187, %v540_v35  ;;  %v173_v5 = vshll.u32 %v8083_v36, %v4581_v42 }
 0x13c   :  { %v939_v13 = vadd.s32 536870912, %v938_v58  ;;  %v768_v44 = vsel %vm766_vm7, %v4218_v4, %v767_v51  ;;  %v179_v28 = vshll.u32 %v8085_v56, %v4581_v42  ;;  %v180_v63 = vshrl.u32 %v8081_v3, %v4606_v2 }
 0x13d   :  { %v178_v9 = vor.u32 %v177_v19, %v176_v57  ;;  %v772_v21 = vsel %vm765_vm10, %v768_v44, %v771_v25  ;;  %v542_v37 = vand.u32 2147483647, %v541_v45  ;;  %v544_v29 = vcvt.s32.f32 %v537_v60 }
 0x13e   :  { %v940_v17 = vshrl.u32 %v939_v13, 30  ;;  %v773_v6 = vsel %vm762_vm15, nan, %v772_v21  ;;  %v172_v22 = vor.u32 %v171_v48, %v170_v49  ;;  %v175_v39 = vor.u32 %v174_v23, %v173_v5 }
 0x13f   :  { %v181_v35 = vor.u32 %v180_v63, %v179_v28  ;;  %v4027_v4 = vpack.c.bf16 %v773_v6, %v357_v15  ;;  %v545_v19 = vmul.f32 %v544_v29, %v542_v37  ;;  %vm185_vm3 = vcmp.lt.s32.totalorder %v4579_v41, 4 }
 0x140   :  { %v941_v51 = vshll.u32 %v940_v17, 30  ;;  %v555_v42 = vadd.s32 3, %v551_v31  ;;  %v158_v57 = vor.u32 8388608, %v157_v43  ;;  %v166_v34 = vshrl.u32 %v8086_v7, %v4606_v2 }
 0x141   :  { %v191_v60 = vsel %vm185_vm3, %v178_v9, 920167782  ;;  %4028 = vmatprep.subr.bf16.mxu0 %v4027_v4  ;;  %v546_v25 = vxor.u32 2147483648, %v545_v19  ;;  %vm182_vm5 = vcmp.lt.s32.totalorder %v4579_v41, 1  ;;  %vm184_vm0 = vcmp.lt.s32.totalorder %v4579_v41, 3 }
 0x142   :  { %v5158_v47 = vsub.s32 %v938_v58, %v941_v51  ;;  %v190_v15 = vsel %vm182_vm5, %v169_v0, %v172_v22  ;;  %v192_v31 = vsel %vm184_vm0, %v175_v39, %v191_v60  ;;  %v194_v2 = vsel %vm182_vm5, %v172_v22, %v175_v39 }
 0x143   :  { %v195_v43 = vsel %vm185_vm3, %v181_v35, 1326507024  ;;  %v547_v49 = vsel %vm464_vm14, %v546_v25, %v545_v19  ;;  %v964_v58 = vsub.s32 4, %v940_v17  ;;  %vm183_vm6 = vcmp.lt.s32.totalorder %v4579_v41, 2 }
 0x144   :  { %v944_v48 = vsub.s32 0, %v5158_v47  ;;  %v550_v23 = vsel %vm5106_vm8, %v4542_v32, %v547_v49  ;;  %v187_v45 = vsel %vm185_vm3, %v175_v39, 2102212464  ;;  %v196_v13 = vsel %vm184_vm0, %v178_v9, %v195_v43 }
 0x145   :  { %v198_v5 = vshll.u32 %v158_v57, 8  ;;  %4221 = vcosq.f32 %v550_v23  ;;  %v193_v28 = vsel %vm183_vm6, %v190_v15, %v192_v31  ;;  %v197_v63 = vsel %vm183_vm6, %v194_v2, %v196_v13 }
 0x146   :  { %v3918_v44 = vmin.u32 %v944_v48, %v5158_v47  ;;  %v5188_v12 = vshrl.u32 %v8085_v56, %v4885_v52  ;;  %v5192_v21 = vshrl.u32 %v8081_v3, %v4885_v52  ;;  %v5199_v29 = vshll.u32 %v8085_v56, %v4891_v46 }
 0x147   :  { %v5194_v37 = vmul.u32.u64.low %v198_v5, %v197_v63  ;;  %v5195_v9 = vmul.u32.u64.high %v198_v5, %v197_v63, %v5194_v37  ;;  %v186_v39 = vsel %vm182_vm5, %v166_v34, %v169_v0  ;;  %v188_v35 = vsel %vm184_vm0, %v172_v22, %v187_v45 }
 0x148   :  { %v946_v6 = vclz %v3918_v44  ;;  %v5207_v4 = vshrl.u32 %v8085_v56, %v5081_v24  ;;  %vm880_vm14 = vcmp.lt.s32.totalorder %v4561_v53, 0  ;;  %4223 = vsinq.f32 %v550_v23 }
 0x149   :  { %v5210_v19 = vmul.u32.u64.low %v198_v5, %v193_v28  ;;  %v5211_v51 = vmul.u32.u64.high %v198_v5, %v193_v28, %v5210_v19  ;;  %v5214_v57 = vand.u32 3, %v555_v42  ;;  %v965_v0 = vsel %vm880_vm14, %v964_v58, %v940_v17  ;;  %v8106_v42 = vld [vmem:[#allocation13_spill] sm:$0xff] }
 0x14a   :  { %v3919_v60 = vadd.s32 4294967294, %v946_v6  ;;  %v5220_v22 = vshrl.u32 %v8081_v3, %v5081_v24  ;;  %v5223_v34 = vadd.s32 1, %v4684_v10  ;;  %v189_v25 = vsel %vm183_vm6, %v186_v39, %v188_v35 }
 0x14b   :  { %v7998_v15 = vand.u32 2147483647, %v4534_v27  ;;  %v5229_v31 = vadd.s32 1, %v4686_v33  ;;  %vm5233_vm7 = vcmp.le.f32.partialorder %v878_v20, 0.7853982  ;;  %vm207_vm9 = vc.u32 %v5195_v9, %v5210_v19 }
 0x14c   :  { %vm3920_vm8 = vcmp.lt.s32.totalorder %v3919_v60, 0  ;;  %v934_v10 = vadd.s32 %v5097_v59, %v5095_v55  ;;  %v967_v17 = vsel %vm5233_vm7, 0, %v965_v0  ;;  %v208_v33 = vadd.s32 1, %v5211_v51 }
 0x14d   :  { %v949_v41 = vsel %vm3920_vm8, 0, %v3919_v60  ;;  %vm561_vm10 = vcmp.eq.s32.totalorder %v5214_v57, 2  ;;  %v205_v43 = vmul.u32 %v198_v5, %v189_v25  ;;  %v583_v49 = vshll.u32 %v8086_v7, %v4619_v14 }
 0x14e   :  { %v950_v2 = vsub.s32 32, %v949_v41  ;;  %v954_v20 = vsub.s32 4294967266, %v949_v41  ;;  %v209_v48 = vsel %vm207_vm9, %v208_v33, %v5211_v51  ;;  %v573_v58 = vand.u32 8388607, %v7998_v15 }
 0x14f   :  { %v584_v55 = vshrl.u32 %v8088_v50, %v4644_v38  ;;  %v593_v59 = vshrl.u32 %v8085_v56, %v4644_v38  ;;  %v4222_v23 = vpop.eup %4221  ;;  %v951_v45 = vshll.u32 %v5158_v47, %v949_v41  ;;  %v210_v5 = vadd.s32 %v209_v48, %v205_v43 }
 0x150   :  { %v952_v13 = vshrl.u32 %v934_v10, %v950_v2  ;;  %v955_v44 = vadd.s32 127, %v954_v20  ;;  %v587_v28 = vshrl.u32 %v8083_v36, %v4644_v38  ;;  %v590_v63 = vshrl.u32 %v8084_v1, %v4644_v38 }
 0x151   :  { %v592_v37 = vshll.u32 %v8084_v1, %v4619_v14  ;;  %v596_v6 = vshrl.u32 %v8081_v3, %v4644_v38  ;;  %vm558_vm11 = vcmp.eq.s32.totalorder %v5214_v57, 0  ;;  %v211_v47 = vadd.s32 536870912, %v210_v5 }
 0x152   :  { %v953_v39 = vor.u32 %v952_v13, %v951_v45  ;;  %v956_v35 = vshll.u32 %v955_v44, 23  ;;  %v586_v51 = vshll.u32 %v8088_v50, %v4619_v14  ;;  %v562_v60 = vxor.u32 2147483648, %v4222_v23  ;;  %v4224_v41 = vpop.eup %4223 }
 0x153   :  { %v589_v0 = vshll.u32 %v8083_v36, %v4619_v14  ;;  %v594_v25 = vor.u32 %v593_v59, %v592_v37  ;;  %v595_v10 = vshll.u32 %v8085_v56, %v4619_v14  ;;  %v971_v2 = vadd.s32 3, %v967_v17 }
 0x154   :  { %v957_v33 = vor.u32 4788187, %v956_v35  ;;  %v5270_v20 = vshrl.u32 %v211_v47, 30  ;;  %v582_v43 = vshrl.u32 %v8086_v7, %v4644_v38  ;;  %vm557_vm15 = vcmp.lt.s32.totalorder %v5214_v57, 2 }
 0x155   :  { %v585_v48 = vor.u32 %v584_v55, %v583_v49  ;;  %v588_v45 = vor.u32 %v587_v28, %v586_v51  ;;  %v591_v13 = vor.u32 %v590_v63, %v589_v0  ;;  %v597_v44 = vor.u32 %v596_v6, %v595_v10 }
 0x156   :  { %v958_v15 = vand.u32 2147483647, %v957_v33  ;;  %v960_v8 = vcvt.s32.f32 %v953_v39  ;;  %v213_v59 = vshll.u32 %v5270_v20, 30  ;;  %vm601_vm1 = vcmp.lt.s32.totalorder %v4638_v30, 4 }
 0x157   :  { %v559_v14 = vxor.u32 2147483648, %v4224_v41  ;;  %v563_v17 = vsel %vm561_vm10, %v562_v60, %v4224_v41  ;;  %v574_v37 = vor.u32 8388608, %v573_v58  ;;  %v607_v38 = vsel %vm601_vm1, %v594_v25, 920167782 }
 0x158   :  { %v961_v35 = vmul.f32 %v960_v8, %v958_v15  ;;  %v5281_v47 = vsub.s32 %v210_v5, %v213_v59  ;;  %vm598_vm3 = vcmp.lt.s32.totalorder %v4638_v30, 1  ;;  %vm600_vm5 = vcmp.lt.s32.totalorder %v4638_v30, 3 }
 0x159   :  { %v606_v49 = vsel %vm598_vm3, %v585_v48, %v588_v45  ;;  %v608_v55 = vsel %vm600_vm5, %v591_v13, %v607_v38  ;;  %v610_v28 = vsel %vm598_vm3, %v588_v45, %v591_v13  ;;  %v611_v63 = vsel %vm601_vm1, %v597_v44, 1326507024 }
 0x15a   :  { %v962_v6 = vxor.u32 2147483648, %v961_v35  ;;  %v216_v58 = vsub.s32 0, %v5281_v47  ;;  %vm599_vm0 = vcmp.lt.s32.totalorder %v4638_v30, 2  ;;  %v603_v8 = vsel %vm601_vm1, %v591_v13, 2102212464 }
 0x15b   :  { %v560_v15 = vsel %vm558_vm11, %v4222_v23, %v559_v14  ;;  %v602_v5 = vsel %vm598_vm3, %v582_v43, %v585_v48  ;;  %v612_v39 = vsel %vm600_vm5, %v594_v25, %v611_v63  ;;  %v614_v51 = vshll.u32 %v574_v37, 8  ;;  %v8108_v63 = vld [vmem:[#allocation26_spill] sm:$0xff] }
 0x15c   :  { %v963_v60 = vsel %vm880_vm14, %v962_v6, %v961_v35  ;;  %v3890_v0 = vmin.u32 %v216_v58, %v5281_v47  ;;  %v609_v10 = vsel %vm599_vm0, %v606_v49, %v608_v55  ;;  %v613_v41 = vsel %vm599_vm0, %v610_v28, %v612_v39  ;;  %v8107_v55 = vld [vmem:[#allocation20_spill] sm:$0xff] }
 0x15d   :  { %v966_v23 = vsel %vm5233_vm7, %v4561_v53, %v963_v60  ;;  %v604_v33 = vsel %vm600_vm5, %v588_v45, %v603_v8  ;;  %v5309_v25 = vmul.u32.u64.low %v614_v51, %v613_v41  ;;  %v5310_v43 = vmul.u32.u64.high %v614_v51, %v613_v41, %v5309_v25 }
 0x15e   :  { %v564_v48 = vsel %vm557_vm15, %v560_v15, %v563_v17  ;;  %4225 = vcosq.f32 %v966_v23  ;;  %v5314_v13 = vand.u32 3, %v971_v2  ;;  %v218_v44 = vclz %v3890_v0 }
 0x15f   :  { %4227 = vsinq.f32 %v966_v23  ;;  %v5316_v59 = vmul.u32.u64.low %v614_v51, %v609_v10  ;;  %v5317_v14 = vmul.u32.u64.high %v614_v51, %v609_v10, %v5316_v59  ;;  %v8000_v37 = vand.u32 2147483647, %v8106_v42 }
 0x160   :  { %v5323_v45 = vor.u32 %v5188_v12, %v4889_v16  ;;  %v1429_v38 = vor.u32 %v5192_v21, %v4896_v40  ;;  %v3891_v57 = vadd.s32 4294967294, %v218_v44  ;;  %v605_v2 = vsel %vm599_vm0, %v602_v5, %v604_v33 }
 0x161   :  { %v5331_v17 = vor.u32 %v5207_v4, %v5085_v54  ;;  %vm554_vm6 = vweird.f32 %v4542_v32  ;;  %v206_v16 = vadd.s32 %v5210_v19, %v5195_v9  ;;  %vm977_vm14 = vcmp.eq.s32.totalorder %v5314_v13, 2 }
 0x162   :  { %v5338_v12 = vsel %vm554_vm6, nan, %v564_v48  ;;  %vm3892_vm7 = vcmp.lt.s32.totalorder %v3891_v57, 0  ;;  %v236_v30 = vsub.s32 4, %v5270_v20  ;;  %vm623_vm8 = vc.u32 %v5310_v43, %v5316_v59 }
 0x163   :  { %vm974_vm9 = vcmp.eq.s32.totalorder %v5314_v13, 0  ;;  %v221_v54 = vsel %vm3892_vm7, 0, %v3891_v57  ;;  %v621_v4 = vmul.u32 %v614_v51, %v605_v2  ;;  %v624_v49 = vadd.s32 1, %v5317_v14 }
 0x164   :  { %v5348_v32 = vand.u32 8388607, %v8000_v37  ;;  %vm973_vm10 = vcmp.lt.s32.totalorder %v5314_v13, 2  ;;  %v222_v9 = vsub.s32 32, %v221_v54  ;;  %v226_v19 = vsub.s32 4294967266, %v221_v54 }
 0x165   :  { %v375_v28 = vshll.u32 %v8086_v7, %v8107_v55  ;;  %v376_v6 = vshrl.u32 %v8088_v50, %v8108_v63  ;;  %vm970_vm11 = vweird.f32 %v4561_v53  ;;  %v223_v58 = vshll.u32 %v5281_v47, %v221_v54 }
 0x166   :  { %v625_v8 = vsel %vm623_vm8, %v624_v49, %v5317_v14  ;;  %v379_v15 = vshrl.u32 %v8083_v36, %v8108_v63  ;;  %v382_v5 = vshrl.u32 %v8084_v1, %v8108_v63  ;;  %v224_v39 = vshrl.u32 %v206_v16, %v222_v9 }
 0x167   :  { %v227_v51 = vadd.s32 127, %v226_v19  ;;  %v626_v60 = vadd.s32 %v625_v8, %v621_v4  ;;  %v385_v0 = vshrl.u32 %v8085_v56, %v8108_v63  ;;  %v366_v10 = vor.u32 8388608, %v5348_v32 }
 0x168   :  { %v378_v41 = vshll.u32 %v8088_v50, %v8107_v55  ;;  %v381_v47 = vshll.u32 %v8083_v36, %v8107_v55  ;;  %v384_v23 = vshll.u32 %v8084_v1, %v8107_v55  ;;  %v4226_v33 = vpop.eup %4225  ;;  %vm152_vm15 = vcmp.lt.s32.totalorder %v4525_v18, 0 }
 0x169   :  { %v225_v25 = vor.u32 %v224_v39, %v223_v58  ;;  %v228_v48 = vshll.u32 %v227_v51, 23  ;;  %v627_v44 = vadd.s32 536870912, %v626_v60  ;;  %v377_v14 = vor.u32 %v376_v6, %v375_v28  ;;  %v4228_v57 = vpop.eup %4227 }
 0x16a   :  { %v978_v2 = vxor.u32 2147483648, %v4226_v33  ;;  %v380_v16 = vor.u32 %v379_v15, %v378_v41  ;;  %v386_v54 = vor.u32 %v385_v0, %v384_v23  ;;  %v388_v4 = vshrl.u32 %v8081_v3, %v8108_v63  ;;  %v8112_v15 = vld [vmem:[#allocation19_spill] sm:$0xff]  ;;  %v8113_v0 = vld [vmem:[#allocation50_spill] sm:$0xff] }
 0x16b   :  { %v975_v49 = vxor.u32 2147483648, %v4228_v57  ;;  %v229_v32 = vor.u32 4788187, %v228_v48  ;;  %v628_v9 = vshrl.u32 %v627_v44, 30  ;;  %v383_v19 = vor.u32 %v382_v5, %v381_v47 }
 0x16c   :  { %v979_v8 = vsel %vm977_vm14, %v978_v2, %v4228_v57  ;;  %v8109_v37 = vand.u32 2147483647, %v4525_v18  ;;  %v232_v28 = vcvt.s32.f32 %v225_v25  ;;  %v387_v6 = vshll.u32 %v8085_v56, %v8107_v55 }
 0x16d   :  { %vm390_vm3 = vcmp.lt.s32.totalorder %v8112_v15, 1  ;;  %v976_v39 = vsel %vm974_vm9, %v4226_v33, %v975_v49  ;;  %v230_v51 = vand.u32 2147483647, %v229_v32  ;;  %v629_v5 = vshll.u32 %v628_v9, 30 }
 0x16e   :  { %vm5378_vm1 = vcmp.le.f32.partialorder %v8109_v37, 0.7853982  ;;  %vm393_vm5 = vcmp.lt.s32.totalorder %v8112_v15, 4  ;;  %vm1433_vm0 = vcmp.lt.s32.totalorder %v8113_v0, 4  ;;  %v980_v37 = vsel %vm973_vm10, %v976_v39, %v979_v8 }
 0x16f   :  { %v389_v41 = vor.u32 %v388_v4, %v387_v6  ;;  %vm392_vm6 = vcmp.lt.s32.totalorder %v8112_v15, 3  ;;  %v399_v55 = vsel %vm393_vm5, %v386_v54, 920167782  ;;  %v981_v47 = vsel %vm970_vm11, nan, %v980_v37 }
 0x170   :  { %v233_v23 = vmul.f32 %v232_v28, %v230_v51  ;;  %v5396_v33 = vsub.s32 %v626_v60, %v629_v5  ;;  %v398_v25 = vsel %vm390_vm3, %v377_v14, %v380_v16  ;;  %v4035_v48 = vpack.c.bf16 %v981_v47, %v5338_v12 }
 0x171   :  { %v374_v13 = vshrl.u32 %v8086_v7, %v8108_v63  ;;  %vm391_vm14 = vcmp.lt.s32.totalorder %v8112_v15, 2  ;;  %v400_v44 = vsel %vm392_vm6, %v383_v19, %v399_v55  ;;  %v395_v60 = vsel %vm393_vm5, %v383_v19, 2102212464 }
 0x172   :  { %v234_v57 = vxor.u32 2147483648, %v233_v23  ;;  %v632_v53 = vsub.s32 0, %v5396_v33  ;;  %v402_v2 = vsel %vm390_vm3, %v380_v16, %v383_v19  ;;  %4036 = vmatprep.subr.bf16.mxu1 %v4035_v48  ;;  %v237_v12 = vsel %vm152_vm15, %v236_v30, %v5270_v20 }
 0x173   :  { %v401_v63 = vsel %vm391_vm14, %v398_v25, %v400_v44  ;;  %v403_v4 = vsel %vm393_vm5, %v389_v41, 1326507024  ;;  %v406_v49 = vshll.u32 %v366_v10, 8  ;;  %v394_v19 = vsel %vm390_vm3, %v374_v13, %v377_v14 }
 0x174   :  { %v235_v32 = vsel %vm152_vm15, %v234_v57, %v233_v23  ;;  %v3906_v8 = vmin.u32 %v632_v53, %v5396_v33  ;;  %v404_v28 = vsel %vm392_vm6, %v386_v54, %v403_v4  ;;  %v396_v20 = vsel %vm392_vm6, %v380_v16, %v395_v60 }
 0x175   :  { %v405_v30 = vsel %vm391_vm14, %v402_v2, %v404_v28  ;;  %v5431_v6 = vmul.u32.u64.low %v406_v49, %v401_v63  ;;  %v5432_v39 = vmul.u32.u64.high %v406_v49, %v401_v63, %v5431_v6  ;;  %v238_v10 = vsel %vm5378_vm1, %v4525_v18, %v235_v32 }
 0x176   :  { %v239_v14 = vsel %vm5378_vm1, 0, %v237_v12  ;;  %v634_v51 = vclz %v3906_v8  ;;  %v652_v5 = vsub.s32 4, %v628_v9  ;;  %vm1617_vm7 = vcmp.gt.s32.totalorder %v5223_v34, 0 }
 0x177   :  { %vm1721_vm8 = vcmp.gt.s32.totalorder %v5229_v31, 0  ;;  %v5442_v16 = vmul.u32.u64.low %v406_v49, %v405_v30  ;;  %v5443_v54 = vmul.u32.u64.high %v406_v49, %v405_v30, %v5442_v16  ;;  %v5448_v37 = vsel %vm1433_vm0, %v5323_v45, 920167782 }
 0x178   :  { %v5455_v58 = vsel %vm1433_vm0, %v1429_v38, 1326507024  ;;  %v3907_v41 = vadd.s32 4294967294, %v634_v51  ;;  %v397_v55 = vsel %vm391_vm14, %v394_v19, %v396_v20  ;;  %4229 = vcosq.f32 %v238_v10 }
 0x179   :  { %v243_v47 = vadd.s32 3, %v239_v14  ;;  %vm568_vm9 = vcmp.lt.s32.totalorder %v4534_v27, 0  ;;  %v416_v23 = vadd.s32 1, %v5432_v39  ;;  %v5462_v25 = vsel %vm1617_vm7, %v5223_v34, 0  ;;  %v8119_v14 = vld [vmem:[#allocation27_spill] sm:$0xff] }
 0x17a   :  { %v5465_v48 = vsel %vm1721_vm8, %v5229_v31, 0  ;;  %vm3908_vm10 = vcmp.lt.s32.totalorder %v3907_v41, 0  ;;  %v653_v40 = vsel %vm568_vm9, %v652_v5, %v628_v9  ;;  %v8114_v21 = vand.u32 2147483647, %v4534_v27 }
 0x17b   :  { %v637_v15 = vsel %vm3908_vm10, 0, %v3907_v41  ;;  %v413_v13 = vmul.u32 %v406_v49, %v397_v55  ;;  %vm415_vm15 = vc.u32 %v5443_v54, %v5431_v6  ;;  %v622_v34 = vadd.s32 %v5316_v59, %v5310_v43  ;;  %v8117_v49 = vld [vmem:[#allocation14_spill] sm:$0xff]  ;;  %v8118_v59 = vld [vmem:[#allocation32_spill] sm:$0xff] }
 0x17c   :  { %vm5471_vm11 = vcmp.le.f32.partialorder %v8114_v21, 0.7853982  ;;  %v638_v31 = vsub.s32 32, %v637_v15  ;;  %v642_v44 = vsub.s32 4294967266, %v637_v15  ;;  %v417_v57 = vsel %vm415_vm15, %v416_v23, %v5432_v39 }
 0x17d   :  { %v5481_v9 = vand.u32 31, %v5462_v25  ;;  %v5483_v53 = vand.u32 3, %v243_v47  ;;  %v655_v60 = vsel %vm5471_vm11, 0, %v653_v40  ;;  %v418_v2 = vadd.s32 %v417_v57, %v413_v13 }
 0x17e   :  { %v639_v12 = vshll.u32 %v5396_v33, %v637_v15  ;;  %v640_v63 = vshrl.u32 %v622_v34, %v638_v31  ;;  %v643_v4 = vadd.s32 127, %v642_v44  ;;  %v8001_v32 = vand.u32 2147483647, %v8117_v49 }
 0x17f   :  { %4231 = vsinq.f32 %v238_v10  ;;  %v419_v43 = vadd.s32 536870912, %v418_v2  ;;  %v792_v8 = vshrl.u32 %v8088_v50, %v8118_v59  ;;  %v798_v19 = vshrl.u32 %v8084_v1, %v8118_v59 }
 0x180   :  { %v641_v28 = vor.u32 %v640_v63, %v639_v12  ;;  %v644_v20 = vshll.u32 %v643_v4, 23  ;;  %v795_v30 = vshrl.u32 %v8083_v36, %v8118_v59  ;;  %v801_v33 = vshrl.u32 %v8085_v56, %v8118_v59 }
 0x181   :  { %v5497_v39 = vshrl.u32 %v419_v43, 30  ;;  %v791_v10 = vshll.u32 %v8086_v7, %v8119_v14  ;;  %v797_v51 = vshll.u32 %v8083_v36, %v8119_v14  ;;  %v804_v5 = vshrl.u32 %v8081_v3, %v8118_v59 }
 0x182   :  { %v645_v16 = vor.u32 4788187, %v644_v20  ;;  %v781_v41 = vand.u32 8388607, %v8001_v32  ;;  %v794_v55 = vshll.u32 %v8088_v50, %v8119_v14  ;;  %v800_v47 = vshll.u32 %v8084_v1, %v8119_v14  ;;  %v4230_v23 = vpop.eup %4229 }
 0x183   :  { %v421_v40 = vshll.u32 %v5497_v39, 30  ;;  %v793_v21 = vor.u32 %v792_v8, %v791_v10  ;;  %v799_v15 = vor.u32 %v798_v19, %v797_v51  ;;  %v803_v13 = vshll.u32 %v8085_v56, %v8119_v14  ;;  %v8120_v19 = vld [vmem:[#allocation30_spill] sm:$0xff] }
 0x184   :  { %v646_v34 = vand.u32 2147483647, %v645_v16  ;;  %v648_v31 = vcvt.s32.f32 %v641_v28  ;;  %v796_v44 = vor.u32 %v795_v30, %v794_v55  ;;  %v802_v57 = vor.u32 %v801_v33, %v800_v47 }
 0x185   :  { %v659_v12 = vadd.s32 3, %v655_v60  ;;  %v5514_v63 = vsub.s32 %v418_v2, %v421_v40  ;;  %v790_v4 = vshrl.u32 %v8086_v7, %v8118_v59  ;;  %v805_v43 = vor.u32 %v804_v5, %v803_v13 }
 0x186   :  { %vm249_vm1 = vcmp.eq.s32.totalorder %v5483_v53, 2  ;;  %v250_v20 = vxor.u32 2147483648, %v4230_v23  ;;  %v649_v32 = vmul.f32 %v648_v31, %v646_v34  ;;  %v782_v8 = vor.u32 8388608, %v781_v41 }
 0x187   :  { %vm809_vm3 = vcmp.lt.s32.totalorder %v8120_v19, 4  ;;  %v424_v14 = vsub.s32 0, %v5514_v63  ;;  %vm806_vm5 = vcmp.lt.s32.totalorder %v8120_v19, 1  ;;  %vm807_vm6 = vcmp.lt.s32.totalorder %v8120_v19, 2 }
 0x188   :  { %v811_v60 = vsel %vm809_vm3, %v799_v15, 2102212464  ;;  %v650_v2 = vxor.u32 2147483648, %v649_v32  ;;  %vm808_vm14 = vcmp.lt.s32.totalorder %v8120_v19, 3  ;;  %v814_v28 = vsel %vm806_vm5, %v793_v21, %v796_v44 }
 0x189   :  { %v815_v59 = vsel %vm809_vm3, %v802_v57, 920167782  ;;  %v4232_v30 = vpop.eup %4231  ;;  %v3898_v33 = vmin.u32 %v424_v14, %v5514_v63  ;;  %v818_v51 = vsel %vm806_vm5, %v796_v44, %v799_v15  ;;  %v819_v5 = vsel %vm809_vm3, %v805_v43, 1326507024  ;;  %v8121_v43 = vld [vmem:[#allocation16_spill] sm:$0xff] }
 0x18a   :  { %v816_v10 = vsel %vm808_vm14, %v799_v15, %v815_v59  ;;  %v651_v16 = vsel %vm568_vm9, %v650_v2, %v649_v32  ;;  %v810_v41 = vsel %vm806_vm5, %v790_v4, %v793_v21  ;;  %v812_v55 = vsel %vm808_vm14, %v796_v44, %v811_v60  ;;  %v8122_v59 = vld [vmem:[#allocation31_spill] sm:$0xff] }
 0x18b   :  { %v820_v47 = vsel %vm808_vm14, %v802_v57, %v819_v5  ;;  %v654_v40 = vsel %vm5471_vm11, %v4534_v27, %v651_v16  ;;  %v426_v13 = vclz %v3898_v33  ;;  %v817_v34 = vsel %vm807_vm6, %v814_v28, %v816_v10  ;;  %v8123_v16 = vld [vmem:[#allocation28_spill] sm:$0xff] }
 0x18c   :  { %v822_v31 = vshll.u32 %v782_v8, 8  ;;  %v247_v35 = vxor.u32 2147483648, %v4232_v30  ;;  %4233 = vcosq.f32 %v654_v40  ;;  %v5532_v14 = vand.u32 3, %v659_v12 }
 0x18d   :  { %v821_v15 = vsel %vm807_vm6, %v818_v51, %v820_v47  ;;  %vm245_vm7 = vcmp.lt.s32.totalorder %v5483_v53, 2  ;;  %4235 = vsinq.f32 %v654_v40  ;;  %v3899_v32 = vadd.s32 4294967294, %v426_v13 }
 0x18e   :  { %v5537_v21 = vmul.u32.u64.low %v822_v31, %v821_v15  ;;  %v5538_v44 = vmul.u32.u64.high %v822_v31, %v821_v15, %v5537_v21  ;;  %v813_v38 = vsel %vm807_vm6, %v810_v41, %v812_v55  ;;  %v1086_v12 = vand.u32 2147483647, %v8121_v43 }
 0x18f   :  { %v5542_v57 = vmul.u32.u64.low %v822_v31, %v817_v34  ;;  %v5543_v4 = vmul.u32.u64.high %v822_v31, %v817_v34, %v5542_v57  ;;  %vm246_vm8 = vcmp.eq.s32.totalorder %v5483_v53, 0  ;;  %v251_v8 = vsel %vm249_vm1, %v250_v20, %v4232_v30  ;;  %v8126_v53 = vld [vmem:[#allocation43_spill] sm:$0xff] }
 0x190   :  { %v414_v60 = vadd.s32 %v5431_v6, %v5443_v54  ;;  %vm3900_vm9 = vcmp.lt.s32.totalorder %v3899_v32, 0  ;;  %v248_v2 = vsel %vm246_vm8, %v4230_v23, %v247_v35  ;;  %vm665_vm10 = vcmp.eq.s32.totalorder %v5532_v14, 2 }
 0x191   :  { %v429_v19 = vsel %vm3900_vm9, 0, %v3899_v32  ;;  %v444_v28 = vsub.s32 4, %v5497_v39  ;;  %v1104_v33 = vshrl.u32 %v8088_v50, %v8122_v59  ;;  %vm662_vm11 = vcmp.eq.s32.totalorder %v5532_v14, 0 }
 0x192   :  { %v430_v10 = vsub.s32 32, %v429_v19  ;;  %v434_v51 = vsub.s32 4294967266, %v429_v19  ;;  %v829_v5 = vmul.u32 %v822_v31, %v813_v38  ;;  %v1103_v20 = vshll.u32 %v8086_v7, %v8123_v16  ;;  %v8124_v38 = vld [vmem:[#allocation51_spill] sm:$0xff] }
 0x193   :  { %vm661_vm15 = vcmp.lt.s32.totalorder %v5532_v14, 2  ;;  %v431_v35 = vshll.u32 %v5514_v63, %v429_v19  ;;  %vm831_vm1 = vc.u32 %v5538_v44, %v5542_v57  ;;  %v832_v6 = vadd.s32 1, %v5543_v4 }
 0x194   :  { %v1093_v54 = vand.u32 8388607, %v1086_v12  ;;  %vm242_vm3 = vweird.f32 %v4525_v18  ;;  %vm658_vm5 = vweird.f32 %v4534_v27  ;;  %v432_v23 = vshrl.u32 %v414_v60, %v430_v10 }
 0x195   :  { %v435_v30 = vadd.s32 127, %v434_v51  ;;  %v1106_v41 = vshll.u32 %v8088_v50, %v8123_v16  ;;  %v1107_v63 = vshrl.u32 %v8083_v36, %v8122_v59  ;;  %v833_v55 = vsel %vm831_vm1, %v832_v6, %v5543_v4 }
 0x196   :  { %v1105_v47 = vor.u32 %v1104_v33, %v1103_v20  ;;  %v1109_v40 = vshll.u32 %v8083_v36, %v8123_v16  ;;  %v1110_v13 = vshrl.u32 %v8084_v1, %v8122_v59  ;;  %v433_v34 = vor.u32 %v432_v23, %v431_v35  ;;  %v4234_v21 = vpop.eup %4233  ;;  %v8125_v33 = vld [vmem:[#allocation34_spill] sm:$0xff] }
 0x197   :  { %v436_v31 = vshll.u32 %v435_v30, 23  ;;  %v834_v15 = vadd.s32 %v833_v55, %v829_v5  ;;  %v1108_v32 = vor.u32 %v1107_v63, %v1106_v41  ;;  %vm1537_vm6 = vcmp.lt.s32.totalorder %v8124_v38, 4  ;;  %v4236_v10 = vpop.eup %4235 }
 0x198   :  { %v252_v60 = vsel %vm245_vm7, %v248_v2, %v251_v8  ;;  %vm360_vm14 = vcmp.lt.s32.totalorder %v8106_v42, 0  ;;  %v1094_v4 = vor.u32 8388608, %v1093_v54  ;;  %v1111_v19 = vor.u32 %v1110_v13, %v1109_v40 }
 0x199   :  { %vm1118_vm8 = vcmp.lt.s32.totalorder %v8125_v33, 1  ;;  %v666_v51 = vxor.u32 2147483648, %v4234_v21  ;;  %v437_v16 = vor.u32 4788187, %v436_v31  ;;  %v835_v20 = vadd.s32 536870912, %v834_v15 }
 0x19a   :  { %vm1120_vm9 = vcmp.lt.s32.totalorder %v8125_v33, 3  ;;  %v663_v5 = vxor.u32 2147483648, %v4236_v10  ;;  %vm1119_vm1 = vcmp.lt.s32.totalorder %v8125_v33, 2  ;;  %v1126_v35 = vsel %vm1118_vm8, %v1105_v47, %v1108_v32 }
 0x19b   :  { %v1128_v8 = vsel %vm1120_vm9, %v1111_v19, %v8126_v53  ;;  %v667_v2 = vsel %vm665_vm10, %v666_v51, %v4236_v10  ;;  %v438_v6 = vand.u32 2147483647, %v437_v16  ;;  %v440_v54 = vcvt.s32.f32 %v433_v34  ;;  %v8127_v10 = vld [vmem:[#allocation44_spill] sm:$0xff]  ;;  %v8128_v51 = vld [vmem:[#allocation38_spill] sm:$0xff] }
 0x19c   :  { %v836_v23 = vshrl.u32 %v835_v20, 30  ;;  %v664_v30 = vsel %vm662_vm11, %v4234_v21, %v663_v5  ;;  %v1102_v41 = vshrl.u32 %v8086_v7, %v8122_v59  ;;  %v1123_v63 = vsel %vm1121_vm13, %v1111_v19, 2102212464 }
 0x19d   :  { %v1129_v55 = vsel %vm1119_vm1, %v1126_v35, %v1128_v8  ;;  %v668_v40 = vsel %vm661_vm15, %v664_v30, %v667_v2  ;;  %v441_v13 = vmul.f32 %v440_v54, %v438_v6  ;;  %v1130_v34 = vsel %vm1118_vm8, %v1108_v32, %v1111_v19 }
 0x19e   :  { %v837_v31 = vshll.u32 %v836_v23, 30  ;;  %v253_v21 = vsel %vm242_vm3, nan, %v252_v60  ;;  %v669_v59 = vsel %vm658_vm5, nan, %v668_v40  ;;  %v1132_v16 = vsel %vm1120_vm9, %v8128_v51, %v8127_v10 }
 0x19f   :  { %v1134_v20 = vshll.u32 %v1094_v4, 8  ;;  %v4029_v5 = vpack.c.bf16 %v669_v59, %v253_v21  ;;  %v442_v14 = vxor.u32 2147483648, %v441_v13  ;;  %v1122_v53 = vsel %vm1118_vm8, %v1102_v41, %v1105_v47 }
 0x1a0   :  { %v5611_v35 = vsub.s32 %v834_v15, %v837_v31  ;;  %v1124_v18 = vsel %vm1120_vm9, %v1108_v32, %v1123_v63  ;;  %v1133_v27 = vsel %vm1119_vm1, %v1130_v34, %v1132_v16  ;;  %v5626_v4 = vsel %vm1537_vm6, %v5331_v17, 920167782 }
 0x1a1   :  { %v5619_v60 = vmul.u32.u64.low %v1134_v20, %v1129_v55  ;;  %v5620_v19 = vmul.u32.u64.high %v1134_v20, %v1129_v55, %v5619_v60  ;;  %v5629_v15 = vand.u32 31, %v5465_v48  ;;  %4030 = vmatpush1.bf16.msra.mxu0 %v4029_v5  ;;  %v445_v47 = vsel %vm360_vm14, %v444_v28, %v5497_v39 }
 0x1a2   :  { %v840_v32 = vsub.s32 0, %v5611_v35  ;;  %v443_v8 = vsel %vm360_vm14, %v442_v14, %v441_v13  ;;  %v860_v2 = vsub.s32 4, %v836_v23  ;;  %v8129_v30 = vor.u32 %v5220_v22, %v5199_v29  ;;  %v8136_v14 = vld [vmem:[#allocation22_spill] sm:$0xff] }
 0x1a3   :  { %v5639_v6 = vmul.u32.u64.low %v1134_v20, %v1133_v27  ;;  %v5640_v54 = vmul.u32.u64.high %v1134_v20, %v1133_v27, %v5639_v6  ;;  %v8130_v63 = vand.u32 2147483647, %v8106_v42  ;;  %v1125_v55 = vsel %vm1119_vm1, %v1122_v53, %v1124_v18 }
 0x1a4   :  { %v5647_v41 = vsel %vm1537_vm6, %v8129_v30, 1326507024  ;;  %v3914_v28 = vmin.u32 %v840_v32, %v5611_v35  ;;  %v5659_v40 = vsub.s32 32, %v5481_v9  ;;  %v5662_v29 = vshrl.u32 %v5465_v48, 5 }
 0x1a5   :  { %vm5651_vm13 = vcmp.le.f32.partialorder %v8130_v63, 0.7853982  ;;  %v1144_v13 = vadd.s32 1, %v5620_v19  ;;  %v5668_v31 = vsub.s32 32, %v5629_v15  ;;  %vm776_vm7 = vcmp.lt.s32.totalorder %v8117_v49, 0 }
 0x1a6   :  { %v447_v22 = vsel %vm5651_vm13, 0, %v445_v47  ;;  %v446_v34 = vsel %vm5651_vm13, %v8106_v42, %v443_v8  ;;  %v842_v33 = vclz %v3914_v28  ;;  %v8133_v21 = vand.u32 2147483647, %v8117_v49 }
 0x1a7   :  { %v861_v59 = vsel %vm776_vm7, %v860_v2, %v836_v23  ;;  %v1141_v10 = vmul.u32 %v1134_v20, %v1125_v55  ;;  %vm1143_vm11 = vc.u32 %v5640_v54, %v5619_v60  ;;  %v451_v51 = vadd.s32 3, %v447_v22 }
 0x1a8   :  { %vm5676_vm10 = vcmp.le.f32.partialorder %v8133_v21, 0.7853982  ;;  %v3915_v16 = vadd.s32 4294967294, %v842_v33  ;;  %v1145_v5 = vsel %vm1143_vm11, %v1144_v13, %v5620_v19  ;;  %v1502_v53 = vand.u32 2147483647, %v8136_v14 }
 0x1a9   :  { %4237 = vcosq.f32 %v446_v34  ;;  %v1146_v18 = vadd.s32 %v1145_v5, %v1141_v10  ;;  %v1520_v27 = vshrl.u32 %v8088_v50, %v5081_v24  ;;  %v1523_v47 = vshrl.u32 %v8083_v36, %v5081_v24 }
 0x1aa   :  { %v830_v23 = vadd.s32 %v5542_v57, %v5538_v44  ;;  %vm3916_vm15 = vcmp.lt.s32.totalorder %v3915_v16, 0  ;;  %v863_v20 = vsel %vm5676_vm10, 0, %v861_v59  ;;  %v1526_v19 = vshrl.u32 %v8084_v1, %v5081_v24 }
 0x1ab   :  { %v845_v32 = vsel %vm3916_vm15, 0, %v3915_v16  ;;  %v1147_v8 = vadd.s32 536870912, %v1146_v18  ;;  %v1519_v2 = vshll.u32 %v8086_v7, %v4891_v46  ;;  %v1522_v6 = vshll.u32 %v8088_v50, %v4891_v46 }
 0x1ac   :  { %v846_v30 = vsub.s32 32, %v845_v32  ;;  %v850_v63 = vsub.s32 4294967266, %v845_v32  ;;  %v1509_v44 = vand.u32 8388607, %v1502_v53  ;;  %v1525_v57 = vshll.u32 %v8083_v36, %v4891_v46 }
 0x1ad   :  { %4239 = vsinq.f32 %v446_v34  ;;  %v5704_v39 = vshrl.u32 %v1147_v8, 30  ;;  %v1521_v28 = vor.u32 %v1520_v27, %v1519_v2  ;;  %v1524_v55 = vor.u32 %v1523_v47, %v1522_v6 }
 0x1ae   :  { %v847_v22 = vshll.u32 %v5611_v35, %v845_v32  ;;  %v848_v13 = vshrl.u32 %v830_v23, %v846_v30  ;;  %v851_v33 = vadd.s32 127, %v850_v63  ;;  %v1527_v21 = vor.u32 %v1526_v19, %v1525_v57 }
 0x1af   :  { %v1736_v59 = vshll.u32 %v8084_v1, %v5629_v15  ;;  %v1737_v10 = vshrl.u32 %v8085_v56, %v5668_v31  ;;  %v5711_v16 = vand.u32 3, %v451_v51  ;;  %v1149_v46 = vshll.u32 %v5704_v39, 30 }
 0x1b0   :  { %v849_v34 = vor.u32 %v848_v13, %v847_v22  ;;  %v852_v5 = vshll.u32 %v851_v33, 23  ;;  %v867_v8 = vadd.s32 3, %v863_v20  ;;  %v1510_v27 = vor.u32 8388608, %v1509_v44 }
 0x1b1   :  { %v5714_v47 = vsub.s32 %v1146_v18, %v1149_v46  ;;  %v1518_v35 = vshrl.u32 %v8086_v7, %v5081_v24  ;;  %vm1534_vm3 = vcmp.lt.s32.totalorder %v8124_v38, 1  ;;  %vm1536_vm5 = vcmp.lt.s32.totalorder %v8124_v38, 3 }
 0x1b2   :  { %v853_v23 = vor.u32 4788187, %v852_v5  ;;  %v1539_v51 = vsel %vm1537_vm6, %v1527_v21, 2102212464  ;;  %v1542_v19 = vsel %vm1534_vm3, %v1521_v28, %v1524_v55  ;;  %v1544_v32 = vsel %vm1536_vm5, %v1527_v21, %v5626_v4 }
 0x1b3   :  { %v4238_v2 = vpop.eup %4237  ;;  %v1152_v20 = vsub.s32 0, %v5714_v47  ;;  %vm1535_vm14 = vcmp.lt.s32.totalorder %v8124_v38, 2  ;;  %v1538_v18 = vsel %vm1534_vm3, %v1518_v35, %v1521_v28  ;;  %v1546_v6 = vsel %vm1534_vm3, %v1524_v55, %v1527_v21 }
 0x1b4   :  { %v854_v30 = vand.u32 2147483647, %v853_v23  ;;  %v856_v24 = vcvt.s32.f32 %v849_v34  ;;  %v1548_v63 = vsel %vm1536_vm5, %v5331_v17, %v5647_v41  ;;  %v1550_v44 = vshll.u32 %v1510_v27, 8 }
 0x1b5   :  { %v3926_v57 = vmin.u32 %v1152_v20, %v5714_v47  ;;  %v1540_v22 = vsel %vm1536_vm5, %v1524_v55, %v1539_v51  ;;  %v1545_v13 = vsel %vm1535_vm14, %v1542_v19, %v1544_v32  ;;  %v1549_v4 = vsel %vm1535_vm14, %v1546_v6, %v1548_v63 }
 0x1b6   :  { %v458_v33 = vxor.u32 2147483648, %v4238_v2  ;;  %v857_v46 = vmul.f32 %v856_v24, %v854_v30  ;;  %v5732_v5 = vmul.u32.u64.low %v1550_v44, %v1549_v4  ;;  %v5733_v28 = vmul.u32.u64.high %v1550_v44, %v1549_v4, %v5732_v5  ;;  %v8137_v30 = vld [vmem:[#allocation18_spill] sm:$0xff]  ;;  %v8138_v24 = vld [vmem:[#allocation45_spill] sm:$0xff] }
 0x1b7   :  { %v4240_v21 = vpop.eup %4239  ;;  %v5735_v34 = vor.u32 %v1737_v10, %v1736_v59  ;;  %v5739_v17 = vshll.u32 %v8085_v56, %v5629_v15  ;;  %v5743_v41 = vshrl.u32 %v8081_v3, %v5668_v31  ;;  %v1154_v55 = vclz %v3926_v57 }
 0x1b8   :  { %vm454_vm6 = vcmp.eq.s32.totalorder %v5711_v16, 0  ;;  %v858_v27 = vxor.u32 2147483648, %v857_v46  ;;  %v1541_v35 = vsel %vm1535_vm14, %v1538_v18, %v1540_v22  ;;  %vm457_vm8 = vcmp.eq.s32.totalorder %v5711_v16, 2 }
 0x1b9   :  { %v5748_v23 = vmul.u32.u64.low %v1550_v44, %v1545_v13  ;;  %v5749_v51 = vmul.u32.u64.high %v1550_v44, %v1545_v13, %v5748_v23  ;;  %v5753_v59 = vand.u32 3, %v867_v8  ;;  %v1142_v10 = vadd.s32 %v5619_v60, %v5640_v54  ;;  %v8139_v13 = vld [vmem:[#allocation39_spill] sm:$0xff] }
 0x1ba   :  { %v3927_v19 = vadd.s32 4294967294, %v1154_v55  ;;  %v455_v32 = vxor.u32 2147483648, %v4240_v21  ;;  %v459_v20 = vsel %vm457_vm8, %v458_v33, %v4240_v21  ;;  %v859_v6 = vsel %vm776_vm7, %v858_v27, %v857_v46 }
 0x1bb   :  { %v1294_v38 = vand.u32 2147483647, %v8137_v30  ;;  %vm453_vm9 = vcmp.lt.s32.totalorder %v5711_v16, 2  ;;  %v862_v18 = vsel %vm5676_vm10, %v8117_v49, %v859_v6  ;;  %v1557_v8 = vmul.u32 %v1550_v44, %v1541_v35 }
 0x1bc   :  { %vm3928_vm1 = vcmp.lt.s32.totalorder %v3927_v19, 0  ;;  %vm1559_vm13 = vc.u32 %v5733_v28, %v5748_v23  ;;  %4241 = vcosq.f32 %v862_v18  ;;  %v1560_v54 = vadd.s32 1, %v5749_v51 }
 0x1bd   :  { %v1157_v60 = vsel %vm3928_vm1, 0, %v3927_v19  ;;  %v1312_v63 = vshrl.u32 %v8088_v50, %v8138_v24  ;;  %4243 = vsinq.f32 %v862_v18  ;;  %v1311_v4 = vshll.u32 %v8086_v7, %v8139_v13 }
 0x1be   :  { %v1158_v57 = vsub.s32 32, %v1157_v60  ;;  %v1162_v22 = vsub.s32 4294967266, %v1157_v60  ;;  %v1561_v48 = vsel %vm1559_vm13, %v1560_v54, %v5749_v51  ;;  %v1301_v44 = vand.u32 8388607, %v1294_v38 }
 0x1bf   :  { %v1314_v33 = vshll.u32 %v8088_v50, %v8139_v13  ;;  %v1315_v46 = vshrl.u32 %v8083_v36, %v8138_v24  ;;  %v1159_v5 = vshll.u32 %v5714_v47, %v1157_v60  ;;  %v1562_v27 = vadd.s32 %v1561_v48, %v1557_v8 }
 0x1c0   :  { %v1160_v21 = vshrl.u32 %v1142_v10, %v1158_v57  ;;  %v1163_v55 = vadd.s32 127, %v1162_v22  ;;  %vm873_vm7 = vcmp.eq.s32.totalorder %v5753_v59, 2  ;;  %v1313_v35 = vor.u32 %v1312_v63, %v1311_v4 }
 0x1c1   :  { %v1316_v19 = vor.u32 %v1315_v46, %v1314_v33  ;;  %v1317_v51 = vshll.u32 %v8083_v36, %v8139_v13  ;;  %v1318_v6 = vshrl.u32 %v8084_v1, %v8138_v24  ;;  %v456_v18 = vsel %vm454_vm6, %v4238_v2, %v455_v32 }
 0x1c2   :  { %vm870_vm10 = vcmp.eq.s32.totalorder %v5753_v59, 0  ;;  %v1161_v54 = vor.u32 %v1160_v21, %v1159_v5  ;;  %v1164_v47 = vshll.u32 %v1163_v55, 23  ;;  %v1563_v10 = vadd.s32 536870912, %v1562_v27 }
 0x1c3   :  { %vm1088_vm11 = vcmp.lt.s32.totalorder %v8121_v43, 0  ;;  %v1172_v8 = vsub.s32 4, %v5704_v39  ;;  %v1302_v60 = vor.u32 8388608, %v1301_v44  ;;  %v1319_v63 = vor.u32 %v1318_v6, %v1317_v51 }
 0x1c4   :  { %vm1328_vm15 = vcmp.lt.s32.totalorder %v4714_v26, 3  ;;  %vm450_vm3 = vweird.f32 %v8106_v42  ;;  %vm866_vm5 = vweird.f32 %v8117_v49  ;;  %v1165_v57 = vor.u32 4788187, %v1164_v47 }
 0x1c5   :  { %v1564_v22 = vshrl.u32 %v1563_v10, 30  ;;  %vm1326_vm14 = vcmp.lt.s32.totalorder %v4714_v26, 1  ;;  %v1340_v2 = vsel %vm1328_vm15, %v4869_v62, %v4997_v61  ;;  %v460_v32 = vsel %vm453_vm9, %v456_v18, %v459_v20 }
 0x1c6   :  { %vm5801_vm6 = vcmp.le.f32.partialorder %v1086_v12, 0.7853982  ;;  %v1334_v4 = vsel %vm1326_vm14, %v1313_v35, %v1316_v19  ;;  %v1336_v48 = vsel %vm1328_vm15, %v1319_v63, %v4987_v11  ;;  %v1338_v44 = vsel %vm1326_vm14, %v1316_v19, %v1319_v63  ;;  %v4242_v20 = vpop.eup %4241 }
 0x1c7   :  { %v1166_v62 = vand.u32 2147483647, %v1165_v57  ;;  %v1168_v61 = vcvt.s32.f32 %v1161_v54  ;;  %v1565_v16 = vshll.u32 %v1564_v22, 30  ;;  %vm1327_vm8 = vcmp.lt.s32.totalorder %v4714_v26, 2  ;;  %v4244_v11 = vpop.eup %4243 }
 0x1c8   :  { %v1310_v12 = vshrl.u32 %v8086_v7, %v8138_v24  ;;  %v1331_v33 = vsel %vm1329_vm2, %v1319_v63, 2102212464  ;;  %v1341_v46 = vsel %vm1327_vm8, %v1338_v44, %v1340_v2  ;;  %v1342_v5 = vshll.u32 %v1302_v60, 8 }
 0x1c9   :  { %v874_v21 = vxor.u32 2147483648, %v4242_v20  ;;  %v1169_v55 = vmul.f32 %v1168_v61, %v1166_v62  ;;  %v5819_v51 = vsub.s32 %v1562_v27, %v1565_v16  ;;  %v1337_v6 = vsel %vm1327_vm8, %v1334_v4, %v1336_v48 }
 0x1ca   :  { %v871_v18 = vxor.u32 2147483648, %v4244_v11  ;;  %v1330_v54 = vsel %vm1326_vm14, %v1310_v12, %v1313_v35  ;;  %v5825_v24 = vmul.u32.u64.low %v1342_v5, %v1341_v46  ;;  %v5826_v47 = vmul.u32.u64.high %v1342_v5, %v1341_v46, %v5825_v24 }
 0x1cb   :  { %v875_v10 = vsel %vm873_vm7, %v874_v21, %v4244_v11  ;;  %v1170_v63 = vxor.u32 2147483648, %v1169_v55  ;;  %v1568_v60 = vsub.s32 0, %v5819_v51  ;;  %v1332_v27 = vsel %vm1328_vm15, %v1316_v19, %v1331_v33 }
 0x1cc   :  { %vm869_vm2 = vcmp.lt.s32.totalorder %v5753_v59, 2  ;;  %v872_v57 = vsel %vm870_vm10, %v4242_v20, %v871_v18  ;;  %v5836_v2 = vmul.u32.u64.low %v1342_v5, %v1337_v6  ;;  %v5837_v4 = vmul.u32.u64.high %v1342_v5, %v1337_v6, %v5836_v2 }
 0x1cd   :  { %v876_v35 = vsel %vm869_vm2, %v872_v57, %v875_v10  ;;  %v1171_v48 = vsel %vm1088_vm11, %v1170_v63, %v1169_v55  ;;  %v1173_v44 = vsel %vm1088_vm11, %v1172_v8, %v5704_v39  ;;  %v3942_v62 = vmin.u32 %v1568_v60, %v5819_v51  ;;  %v8142_v39 = vld [vmem:[#allocation24_spill] sm:$0xff] }
 0x1ce   :  { %v461_v19 = vsel %vm450_vm3, nan, %v460_v32  ;;  %v877_v59 = vsel %vm866_vm5, nan, %v876_v35  ;;  %v1588_v61 = vsub.s32 4, %v1564_v22  ;;  %v1333_v16 = vsel %vm1327_vm8, %v1330_v54, %v1332_v27 }
 0x1cf   :  { %v4037_v20 = vpack.c.bf16 %v877_v59, %v461_v19  ;;  %v1174_v12 = vsel %vm5801_vm6, %v8121_v43, %v1171_v48  ;;  %v1570_v33 = vclz %v3942_v62  ;;  %vm1351_vm9 = vc.u32 %v5826_v47, %v5836_v2 }
 0x1d0   :  { %v1741_v42 = vor.u32 %v5743_v41, %v5739_v17  ;;  %vm1745_vm1 = vcmp.lt.s32.totalorder %v5662_v29, 4  ;;  %v1352_v49 = vadd.s32 1, %v5837_v4  ;;  %v1710_v8 = vand.u32 2147483647, %v8142_v39 }
 0x1d1   :  { %v1751_v26 = vsel %vm1745_vm1, %v5735_v34, 920167782  ;;  %4038 = vmatpush1.bf16.msra.mxu1 %v4037_v20  ;;  %vm1504_vm13 = vcmp.lt.s32.totalorder %v8136_v14, 0  ;;  %v3943_v32 = vadd.s32 4294967294, %v1570_v33  ;;  %v1349_v46 = vmul.u32 %v1342_v5, %v1333_v16 }
 0x1d2   :  { %v1175_v11 = vsel %vm5801_vm6, 0, %v1173_v44  ;;  %4245 = vcosq.f32 %v1174_v12  ;;  %v1558_v17 = vadd.s32 %v5748_v23, %v5733_v28  ;;  %v1353_v41 = vsel %vm1351_vm9, %v1352_v49, %v5837_v4 }
 0x1d3   :  { %4247 = vsinq.f32 %v1174_v12  ;;  %vm3944_vm7 = vcmp.lt.s32.totalorder %v3943_v32, 0  ;;  %v1589_v21 = vsel %vm1504_vm13, %v1588_v61, %v1564_v22  ;;  %v1354_v55 = vadd.s32 %v1353_v41, %v1349_v46 }
 0x1d4   :  { %v1573_v6 = vsel %vm3944_vm7, 0, %v3943_v32  ;;  %v1717_v18 = vand.u32 8388607, %v1710_v8  ;;  %v1728_v13 = vshrl.u32 %v8088_v50, %v5668_v31  ;;  %v1731_v5 = vshrl.u32 %v8083_v36, %v5668_v31 }
 0x1d5   :  { %v1574_v54 = vsub.s32 32, %v1573_v6  ;;  %v1578_v28 = vsub.s32 4294967266, %v1573_v6  ;;  %v1355_v23 = vadd.s32 536870912, %v1354_v55  ;;  %v1730_v24 = vshll.u32 %v8088_v50, %v5629_v15 }
 0x1d6   :  { %v1575_v10 = vshll.u32 %v5819_v51, %v1573_v6  ;;  %v1727_v22 = vshll.u32 %v8086_v7, %v5629_v15  ;;  %v1733_v63 = vshll.u32 %v8083_v36, %v5629_v15  ;;  %v1734_v60 = vshrl.u32 %v8084_v1, %v5668_v31 }
 0x1d7   :  { %v1576_v27 = vshrl.u32 %v1558_v17, %v1574_v54  ;;  %v1579_v57 = vadd.s32 127, %v1578_v28  ;;  %v5888_v4 = vshrl.u32 %v1355_v23, 30  ;;  %v1732_v35 = vor.u32 %v1731_v5, %v1730_v24 }
 0x1d8   :  { %v1755_v48 = vsel %vm1745_vm1, %v1741_v42, 1326507024  ;;  %vm5894_vm10 = vcmp.le.f32.partialorder %v1502_v53, 0.7853982  ;;  %v1729_v44 = vor.u32 %v1728_v13, %v1727_v22  ;;  %v1735_v62 = vor.u32 %v1734_v60, %v1733_v63  ;;  %v8145_v22 = vld [vmem:[#allocation15_spill] sm:$0xff] }
 0x1d9   :  { %v1179_v15 = vadd.s32 3, %v1175_v11  ;;  %v1577_v19 = vor.u32 %v1576_v27, %v1575_v10  ;;  %v1580_v59 = vshll.u32 %v1579_v57, 23  ;;  %v1357_v61 = vshll.u32 %v5888_v4, 30 }
 0x1da   :  { %v1591_v16 = vsel %vm5894_vm10, 0, %v1589_v21  ;;  %v1718_v20 = vor.u32 8388608, %v1717_v18  ;;  %vm1742_vm11 = vcmp.lt.s32.totalorder %v5662_v29, 1  ;;  %vm1744_vm15 = vcmp.lt.s32.totalorder %v5662_v29, 3 }
 0x1db   :  { %v1581_v12 = vor.u32 4788187, %v1580_v59  ;;  %v5903_v53 = vsub.s32 %v1354_v55, %v1357_v61  ;;  %v1754_v33 = vsel %vm1742_vm11, %v1732_v35, %v1735_v62  ;;  %v1756_v42 = vsel %vm1744_vm15, %v5735_v34, %v1755_v48 }
 0x1dc   :  { %v4246_v49 = vpop.eup %4245  ;;  %v1726_v32 = vshrl.u32 %v8086_v7, %v5668_v31  ;;  %vm1743_vm3 = vcmp.lt.s32.totalorder %v5662_v29, 2  ;;  %v1747_v46 = vsel %vm1745_vm1, %v1735_v62, 2102212464  ;;  %v1750_v11 = vsel %vm1742_vm11, %v1729_v44, %v1732_v35 }
 0x1dd   :  { %v4248_v17 = vpop.eup %4247  ;;  %v1582_v41 = vand.u32 2147483647, %v1581_v12  ;;  %v1584_v21 = vcvt.s32.f32 %v1577_v19  ;;  %v1360_v55 = vsub.s32 0, %v5903_v53  ;;  %v1752_v34 = vsel %vm1744_vm15, %v1735_v62, %v1751_v26 }
 0x1de   :  { %v1180_v6 = vand.u32 3, %v1179_v15  ;;  %v1595_v18 = vadd.s32 3, %v1591_v16  ;;  %v1746_v31 = vsel %vm1742_vm11, %v1726_v32, %v1729_v44  ;;  %v1757_v13 = vsel %vm1743_vm3, %v1754_v33, %v1756_v42 }
 0x1df   :  { %v1585_v5 = vmul.f32 %v1584_v21, %v1582_v41  ;;  %v3934_v54 = vmin.u32 %v1360_v55, %v5903_v53  ;;  %v1748_v28 = vsel %vm1744_vm15, %v1732_v35, %v1747_v46  ;;  %v1758_v23 = vshll.u32 %v1718_v20, 8 }
 0x1e0   :  { %v1183_v24 = vxor.u32 2147483648, %v4248_v17  ;;  %v1186_v10 = vxor.u32 2147483648, %v4246_v49  ;;  %v1753_v26 = vsel %vm1743_vm3, %v1750_v11, %v1752_v34  ;;  %v982_v63 = vand.u32 2147483647, %v8145_v22 }
 0x1e1   :  { %v1586_v60 = vxor.u32 2147483648, %v1585_v5  ;;  %v1362_v27 = vclz %v3934_v54  ;;  %v5930_v57 = vmul.u32.u64.low %v1758_v23, %v1757_v13  ;;  %v5931_v48 = vmul.u32.u64.high %v1758_v23, %v1757_v13, %v5930_v57 }
 0x1e2   :  { %vm1182_vm5 = vcmp.eq.s32.totalorder %v1180_v6, 0  ;;  %vm1185_vm14 = vcmp.eq.s32.totalorder %v1180_v6, 2  ;;  %v5933_v44 = vand.u32 3, %v1595_v18  ;;  %v1749_v35 = vsel %vm1743_vm3, %v1746_v31, %v1748_v28 }
 0x1e3   :  { %vm1181_vm6 = vcmp.lt.s32.totalorder %v1180_v6, 2  ;;  %v1587_v62 = vsel %vm1504_vm13, %v1586_v60, %v1585_v5  ;;  %v3935_v15 = vadd.s32 4294967294, %v1362_v27  ;;  %v1184_v61 = vsel %vm1182_vm5, %v4246_v49, %v1183_v24  ;;  %v8146_v49 = vld [vmem:[#allocation25_spill] sm:$0xff] }
 0x1e4   :  { %v5939_v19 = vmul.u32.u64.low %v1758_v23, %v1753_v26  ;;  %v5940_v59 = vmul.u32.u64.high %v1758_v23, %v1753_v26, %v5939_v19  ;;  %v1187_v16 = vsel %vm1185_vm14, %v1186_v10, %v4248_v17  ;;  %v1590_v20 = vsel %vm5894_vm10, %v8136_v14, %v1587_v62 }
 0x1e5   :  { %v1350_v12 = vadd.s32 %v5836_v2, %v5826_v47  ;;  %4249 = vcosq.f32 %v1590_v20  ;;  %vm3936_vm8 = vcmp.lt.s32.totalorder %v3935_v15, 0  ;;  %v1765_v29 = vmul.u32 %v1758_v23, %v1749_v35  ;;  %v8147_v2 = vld [vmem:[#allocation29_spill] sm:$0xff] }
 0x1e6   :  { %v989_v33 = vand.u32 8388607, %v982_v63  ;;  %4251 = vsinq.f32 %v1590_v20  ;;  %v1365_v42 = vsel %vm3936_vm8, 0, %v3935_v15  ;;  %vm1767_vm2 = vc.u32 %v5931_v48, %v5939_v19  ;;  %v8148_v35 = vld [vmem:[#allocation33_spill] sm:$0xff] }
 0x1e7   :  { %v999_v32 = vshll.u32 %v8086_v7, %v8146_v49  ;;  %v1366_v46 = vsub.s32 32, %v1365_v42  ;;  %v1367_v51 = vshll.u32 %v5903_v53, %v1365_v42  ;;  %v1370_v11 = vsub.s32 4294967266, %v1365_v42  ;;  %v8149_v20 = vld [vmem:[#allocation41_spill] sm:$0xff] }
 0x1e8   :  { %v1768_v47 = vadd.s32 1, %v5940_v59  ;;  %v1000_v17 = vshrl.u32 %v8088_v50, %v8147_v2  ;;  %v1002_v41 = vshll.u32 %v8088_v50, %v8146_v49  ;;  %v1003_v21 = vshrl.u32 %v8083_v36, %v8147_v2 }
 0x1e9   :  { %v1005_v55 = vshll.u32 %v8083_v36, %v8146_v49  ;;  %v1368_v34 = vshrl.u32 %v1350_v12, %v1366_v46  ;;  %v1371_v18 = vadd.s32 127, %v1370_v11  ;;  %v1006_v53 = vshrl.u32 %v8084_v1, %v8147_v2 }
 0x1ea   :  { %v1769_v31 = vsel %vm1767_vm2, %v1768_v47, %v5940_v59  ;;  %vm1178_vm9 = vweird.f32 %v8121_v43  ;;  %vm1598_vm1 = vcmp.eq.s32.totalorder %v5933_v44, 0  ;;  %v1001_v5 = vor.u32 %v1000_v17, %v999_v32 }
 0x1eb   :  { %v1770_v13 = vadd.s32 %v1769_v31, %v1765_v29  ;;  %v1004_v54 = vor.u32 %v1003_v21, %v1002_v41  ;;  %v1369_v28 = vor.u32 %v1368_v34, %v1367_v51  ;;  %v1372_v23 = vshll.u32 %v1371_v18, 23  ;;  %v8150_v29 = vld [vmem:[#allocation42_spill] sm:$0xff] }
 0x1ec   :  { %v990_v24 = vor.u32 8388608, %v989_v33  ;;  %v1007_v10 = vor.u32 %v1006_v53, %v1005_v55  ;;  %v1188_v26 = vsel %vm1181_vm6, %v1184_v61, %v1187_v16  ;;  %vm1594_vm13 = vweird.f32 %v8136_v14  ;;  %v8151_v33 = vld [vmem:[#allocation36_spill] sm:$0xff] }
 0x1ed   :  { %vm1601_vm7 = vcmp.eq.s32.totalorder %v5933_v44, 2  ;;  %vm1296_vm10 = vcmp.lt.s32.totalorder %v8137_v30, 0  ;;  %v1380_v60 = vsub.s32 4, %v5888_v4  ;;  %v1771_v27 = vadd.s32 536870912, %v1770_v13 }
 0x1ee   :  { %v1373_v57 = vor.u32 4788187, %v1372_v23  ;;  %vm1014_vm11 = vcmp.lt.s32.totalorder %v8148_v35, 1  ;;  %vm1015_vm15 = vcmp.lt.s32.totalorder %v8148_v35, 2  ;;  %vm1016_vm3 = vcmp.lt.s32.totalorder %v8148_v35, 3 }
 0x1ef   :  { %v1376_v62 = vcvt.s32.f32 %v1369_v28  ;;  %v5977_v15 = vshrl.u32 %v1771_v27, 30  ;;  %v1022_v6 = vsel %vm1014_vm11, %v1001_v5, %v1004_v54  ;;  %v1026_v59 = vsel %vm1014_vm11, %v1004_v54, %v1007_v10  ;;  %v4250_v61 = vpop.eup %4249 }
 0x1f0   :  { %v1374_v16 = vand.u32 2147483647, %v1373_v57  ;;  %v1024_v12 = vsel %vm1016_vm3, %v1007_v10, %v8149_v20  ;;  %v1028_v42 = vsel %vm1016_vm3, %v8151_v33, %v8150_v29  ;;  %v1030_v49 = vshll.u32 %v990_v24, 8  ;;  %v4252_v32 = vpop.eup %4251 }
 0x1f1   :  { %v1602_v46 = vxor.u32 2147483648, %v4250_v61  ;;  %v1773_v51 = vshll.u32 %v5977_v15, 30  ;;  %v1019_v11 = vsel %vm1017_vm12, %v1007_v10, 2102212464  ;;  %v1029_v47 = vsel %vm1015_vm15, %v1026_v59, %v1028_v42  ;;  %v8154_v42 = vld [vmem:[#allocation21_spill] sm:$0xff] }
 0x1f2   :  { %v1599_v17 = vxor.u32 2147483648, %v4252_v32  ;;  %v1377_v41 = vmul.f32 %v1376_v62, %v1374_v16  ;;  %v5995_v21 = vmul.u32.u64.low %v1030_v49, %v1029_v47  ;;  %v5996_v55 = vmul.u32.u64.high %v1030_v49, %v1029_v47, %v5995_v21 }
 0x1f3   :  { %v1603_v34 = vsel %vm1601_vm7, %v1602_v46, %v4252_v32  ;;  %v6000_v18 = vsub.s32 %v1770_v13, %v1773_v51  ;;  %v998_v31 = vshrl.u32 %v8086_v7, %v8147_v2  ;;  %v1025_v53 = vsel %vm1015_vm15, %v1022_v6, %v1024_v12 }
 0x1f4   :  { %v1189_v28 = vsel %vm1178_vm9, nan, %v1188_v26  ;;  %vm1597_vm12 = vcmp.lt.s32.totalorder %v5933_v44, 2  ;;  %v1600_v23 = vsel %vm1598_vm1, %v4250_v61, %v1599_v17  ;;  %v1378_v24 = vxor.u32 2147483648, %v1377_v41 }
 0x1f5   :  { %v1604_v10 = vsel %vm1597_vm12, %v1600_v23, %v1603_v34  ;;  %v1776_v27 = vsub.s32 0, %v6000_v18  ;;  %v1018_v13 = vsel %vm1014_vm11, %v998_v31, %v1001_v5  ;;  %v1020_v2 = vsel %vm1016_vm3, %v1004_v54, %v1019_v11 }
 0x1f6   :  { %v1605_v57 = vsel %vm1594_vm13, nan, %v1604_v10  ;;  %v1379_v43 = vsel %vm1296_vm10, %v1378_v24, %v1377_v41  ;;  %v6020_v26 = vmul.u32.u64.low %v1030_v49, %v1025_v53  ;;  %v6021_v62 = vmul.u32.u64.high %v1030_v49, %v1025_v53, %v6020_v26 }
 0x1f7   :  { %v6025_v44 = vshrl.u32 %v5462_v25, 5  ;;  %v4031_v6 = vpack.c.bf16 %v1605_v57, %v1189_v28  ;;  %v1381_v5 = vsel %vm1296_vm10, %v1380_v60, %v5888_v4  ;;  %v3950_v54 = vmin.u32 %v1776_v27, %v6000_v18 }
 0x1f8   :  { %v1632_v14 = vshll.u32 %v8084_v1, %v5481_v9  ;;  %v6035_v59 = vshll.u32 %v8085_v56, %v5481_v9  ;;  %vm6039_vm5 = vcmp.le.f32.partialorder %v1294_v38, 0.7853982  ;;  %v1021_v25 = vsel %vm1015_vm15, %v1018_v13, %v1020_v2 }
 0x1f9   :  { %v1633_v4 = vshrl.u32 %v8085_v56, %v5659_v40  ;;  %4032 = vmatprep.subr.bf16.mxu0 %v4031_v6  ;;  %v1382_v60 = vsel %vm6039_vm5, %v8137_v30, %v1379_v43  ;;  %v1778_v16 = vclz %v3950_v54  ;;  %vm1039_vm14 = vc.u32 %v5996_v55, %v6020_v26 }
 0x1fa   :  { %v1383_v38 = vsel %vm6039_vm5, 0, %v1381_v5  ;;  %vm1712_vm6 = vcmp.lt.s32.totalorder %v8142_v39, 0  ;;  %v1766_v35 = vadd.s32 %v5939_v19, %v5931_v48  ;;  %v1040_v20 = vadd.s32 1, %v6021_v62  ;;  %v8155_v19 = vld [vmem:[#allocation48_spill] sm:$0xff] }
 0x1fb   :  { %v3951_v12 = vadd.s32 4294967294, %v1778_v16  ;;  %v1796_v29 = vsub.s32 4, %v5977_v15  ;;  %v1037_v33 = vmul.u32 %v1030_v49, %v1021_v25  ;;  %v1398_v32 = vand.u32 2147483647, %v8154_v42 }
 0x1fc   :  { %4253 = vcosq.f32 %v1382_v60  ;;  %v1041_v46 = vsel %vm1039_vm14, %v1040_v20, %v6021_v62  ;;  %v1416_v51 = vshrl.u32 %v8088_v50, %v4885_v52  ;;  %v1419_v11 = vshrl.u32 %v8083_v36, %v4885_v52 }
 0x1fd   :  { %4255 = vsinq.f32 %v1382_v60  ;;  %vm3952_vm8 = vcmp.lt.s32.totalorder %v3951_v12, 0  ;;  %v1042_v48 = vadd.s32 %v1041_v46, %v1037_v33  ;;  %v1415_v47 = vshll.u32 %v8086_v7, %v8155_v19 }
 0x1fe   :  { %v1781_v17 = vsel %vm3952_vm8, 0, %v3951_v12  ;;  %v1418_v49 = vshll.u32 %v8088_v50, %v8155_v19  ;;  %v1421_v41 = vshll.u32 %v8083_v36, %v8155_v19  ;;  %v1422_v21 = vshrl.u32 %v8084_v1, %v4885_v52 }
 0x1ff   :  { %v1782_v34 = vsub.s32 32, %v1781_v17  ;;  %v1786_v31 = vsub.s32 4294967266, %v1781_v17  ;;  %v1797_v53 = vsel %vm1712_vm6, %v1796_v29, %v5977_v15  ;;  %v1043_v28 = vadd.s32 536870912, %v1042_v48 }
 0x200   :  { %v1405_v23 = vand.u32 8388607, %v1398_v32  ;;  %v1417_v24 = vor.u32 %v1416_v51, %v1415_v47  ;;  %v1420_v10 = vor.u32 %v1419_v11, %v1418_v49  ;;  %v1423_v27 = vor.u32 %v1422_v21, %v1421_v41 }
 0x201   :  { %v1783_v13 = vshll.u32 %v6000_v18, %v1781_v17  ;;  %v1784_v2 = vshrl.u32 %v1766_v35, %v1782_v34  ;;  %v1787_v57 = vadd.s32 127, %v1786_v31  ;;  %v6079_v43 = vshrl.u32 %v1043_v28, 30 }
 0x202   :  { %v6083_v62 = vshrl.u32 %v8081_v3, %v5659_v40  ;;  %v1387_v6 = vadd.s32 3, %v1383_v38  ;;  %vm6087_vm2 = vcmp.le.f32.partialorder %v1710_v8, 0.7853982  ;;  %vm1430_vm9 = vcmp.lt.s32.totalorder %v8113_v0, 1 }
 0x203   :  { %v1785_v5 = vor.u32 %v1784_v2, %v1783_v13  ;;  %v1788_v54 = vshll.u32 %v1787_v57, 23  ;;  %v1045_v18 = vshll.u32 %v6079_v43, 30  ;;  %vm1432_vm1 = vcmp.lt.s32.totalorder %v8113_v0, 3 }
 0x204   :  { %v1799_v61 = vsel %vm6087_vm2, 0, %v1797_v53  ;;  %v1406_v25 = vor.u32 8388608, %v1405_v23  ;;  %v1442_v60 = vsel %vm1430_vm9, %v1420_v10, %v1423_v27  ;;  %v1444_v8 = vsel %vm1432_vm1, %v5323_v45, %v5455_v58 }
 0x205   :  { %v1789_v16 = vor.u32 4788187, %v1788_v54  ;;  %v6102_v38 = vsub.s32 %v1042_v48, %v1045_v18  ;;  %v1438_v35 = vsel %vm1430_vm9, %v1417_v24, %v1420_v10  ;;  %v1440_v20 = vsel %vm1432_vm1, %v1423_v27, %v5448_v37 }
 0x206   :  { %v4254_v12 = vpop.eup %4253  ;;  %v6109_v29 = vor.u32 %v1633_v4, %v1632_v14  ;;  %v1414_v33 = vshrl.u32 %v8086_v7, %v4885_v52  ;;  %vm1431_vm13 = vcmp.lt.s32.totalorder %v8113_v0, 2  ;;  %v1435_v45 = vsel %vm1433_vm0, %v1423_v27, 2102212464 }
 0x207   :  { %v4256_v58 = vpop.eup %4255  ;;  %v1790_v46 = vand.u32 2147483647, %v1789_v16  ;;  %v1792_v51 = vcvt.s32.f32 %v1785_v5  ;;  %v1048_v11 = vsub.s32 0, %v6102_v38  ;;  %v1445_v48 = vsel %vm1431_vm13, %v1442_v60, %v1444_v8 }
 0x208   :  { %v1388_v37 = vand.u32 3, %v1387_v6  ;;  %v1803_v19 = vadd.s32 3, %v1799_v61  ;;  %v1441_v14 = vsel %vm1431_vm13, %v1438_v35, %v1440_v20  ;;  %v1446_v4 = vshll.u32 %v1406_v25, 8  ;;  %v8160_v20 = vld [vmem:[#allocation35_spill] sm:$0xff] }
 0x209   :  { %v1793_v52 = vmul.f32 %v1792_v51, %v1790_v46  ;;  %v3922_v47 = vmin.u32 %v1048_v11, %v6102_v38  ;;  %v1434_v17 = vsel %vm1430_vm9, %v1414_v33, %v1417_v24  ;;  %v1436_v49 = vsel %vm1432_vm1, %v1420_v10, %v1435_v45  ;;  %v8158_v24 = vld [vmem:[#allocation17_spill] sm:$0xff] }
 0x20a   :  { %v1391_v41 = vxor.u32 2147483648, %v4256_v58  ;;  %v1394_v21 = vxor.u32 2147483648, %v4254_v12  ;;  %v6126_v34 = vmul.u32.u64.low %v1446_v4, %v1445_v48  ;;  %v6127_v31 = vmul.u32.u64.high %v1446_v4, %v1445_v48, %v6126_v34 }
 0x20b   :  { %v1794_v53 = vxor.u32 2147483648, %v1793_v52  ;;  %v1050_v28 = vclz %v3922_v47  ;;  %v6129_v23 = vmul.u32.u64.low %v1446_v4, %v1441_v14  ;;  %v6130_v27 = vmul.u32.u64.high %v1446_v4, %v1441_v14, %v6129_v23  ;;  %v8161_v34 = vld [vmem:[#allocation40_spill] sm:$0xff] }
 0x20c   :  { %vm1390_vm0 = vcmp.eq.s32.totalorder %v1388_v37, 0  ;;  %vm1393_vm7 = vcmp.eq.s32.totalorder %v1388_v37, 2  ;;  %v1437_v13 = vsel %vm1431_vm13, %v1434_v17, %v1436_v49  ;;  %v1190_v2 = vand.u32 2147483647, %v8158_v24 }
 0x20d   :  { %vm1389_vm10 = vcmp.lt.s32.totalorder %v1388_v37, 2  ;;  %v1795_v10 = vsel %vm1712_vm6, %v1794_v53, %v1793_v52  ;;  %v6138_v57 = vand.u32 3, %v1803_v19  ;;  %v1038_v6 = vadd.s32 %v6020_v26, %v5996_v55  ;;  %v8159_v26 = vld [vmem:[#allocation37_spill] sm:$0xff] }
 0x20e   :  { %v3923_v5 = vadd.s32 4294967294, %v1050_v28  ;;  %v1392_v54 = vsel %vm1390_vm0, %v4254_v12, %v1391_v41  ;;  %v1395_v18 = vsel %vm1393_vm7, %v1394_v21, %v4256_v58  ;;  %v1798_v61 = vsel %vm6087_vm2, %v8142_v39, %v1795_v10 }
 0x20f   :  { %vm1455_vm11 = vc.u32 %v6127_v31, %v6129_v23  ;;  %4257 = vcosq.f32 %v1798_v61  ;;  %v1453_v0 = vmul.u32 %v1446_v4, %v1437_v13  ;;  %v1456_v25 = vadd.s32 1, %v6130_v27  ;;  %v8163_v13 = vld [vmem:[#allocation46_spill] sm:$0xff] }
 0x210   :  { %vm3924_vm15 = vcmp.lt.s32.totalorder %v3923_v5, 0  ;;  %4259 = vsinq.f32 %v1798_v61  ;;  %v1197_v55 = vand.u32 8388607, %v1190_v2  ;;  %v1208_v8 = vshrl.u32 %v8088_v50, %v8159_v26 }
 0x211   :  { %v1053_v60 = vsel %vm3924_vm15, 0, %v3923_v5  ;;  %vm1386_vm3 = vweird.f32 %v8137_v30  ;;  %v1457_v35 = vsel %vm1455_vm11, %v1456_v25, %v6130_v27  ;;  %v1207_v12 = vshll.u32 %v8086_v7, %v8160_v20  ;;  %v8162_v27 = vld [vmem:[#allocation49_spill] sm:$0xff] }
 0x212   :  { %v1054_v15 = vsub.s32 32, %v1053_v60  ;;  %v1058_v16 = vsub.s32 4294967266, %v1053_v60  ;;  %v1055_v33 = vshll.u32 %v6102_v38, %v1053_v60  ;;  %v1458_v45 = vadd.s32 %v1457_v35, %v1453_v0  ;;  %v8164_v0 = vld [vmem:[#allocation47_spill] sm:$0xff] }
 0x213   :  { %v1210_v58 = vshll.u32 %v8088_v50, %v8160_v20  ;;  %v1211_v46 = vshrl.u32 %v8083_v36, %v8159_v26  ;;  %v1213_v48 = vshll.u32 %v8083_v36, %v8160_v20  ;;  %v1214_v19 = vshrl.u32 %v8084_v1, %v8159_v26 }
 0x214   :  { %v1056_v51 = vshrl.u32 %v1038_v6, %v1054_v15  ;;  %v1059_v11 = vadd.s32 127, %v1058_v16  ;;  %vm1806_vm12 = vcmp.eq.s32.totalorder %v6138_v57, 0  ;;  %v1459_v14 = vadd.s32 536870912, %v1458_v45 }
 0x215   :  { %v1209_v4 = vor.u32 %v1208_v8, %v1207_v12  ;;  %v1212_v38 = vor.u32 %v1211_v46, %v1210_v58  ;;  %vm1805_vm5 = vcmp.lt.s32.totalorder %v6138_v57, 2  ;;  %vm1809_vm14 = vcmp.eq.s32.totalorder %v6138_v57, 2 }
 0x216   :  { %v1057_v52 = vor.u32 %v1056_v51, %v1055_v33  ;;  %v1060_v47 = vshll.u32 %v1059_v11, 23  ;;  %v1215_v17 = vor.u32 %v1214_v19, %v1213_v48  ;;  %v1396_v49 = vsel %vm1389_vm10, %v1392_v54, %v1395_v18 }
 0x217   :  { %v6169_v41 = vshrl.u32 %v1459_v14, 30  ;;  %v1206_v21 = vshrl.u32 %v8086_v7, %v8159_v26  ;;  %vm1224_vm6 = vcmp.lt.s32.totalorder %v8161_v34, 3  ;;  %v1198_v28 = vor.u32 8388608, %v1197_v55 }
 0x218   :  { %v1061_v53 = vor.u32 4788187, %v1060_v47  ;;  %vm1222_vm8 = vcmp.lt.s32.totalorder %v8161_v34, 1  ;;  %v1236_v10 = vsel %vm1224_vm6, %v8163_v13, %v8162_v27  ;;  %v1064_v6 = vcvt.s32.f32 %v1057_v52 }
 0x219   :  { %v1461_v37 = vshll.u32 %v6169_v41, 30  ;;  %vm1223_vm2 = vcmp.lt.s32.totalorder %v8161_v34, 2  ;;  %v1230_v5 = vsel %vm1222_vm8, %v1209_v4, %v1212_v38  ;;  %v4258_v54 = vpop.eup %4257  ;;  %v1227_v61 = vsel %vm1225_vm4, %v1215_v17, 2102212464 }
 0x21a   :  { %v1062_v18 = vand.u32 2147483647, %v1061_v53  ;;  %v1232_v25 = vsel %vm1224_vm6, %v1215_v17, %v8164_v0  ;;  %v1234_v60 = vsel %vm1222_vm8, %v1212_v38, %v1215_v17  ;;  %v4260_v55 = vpop.eup %4259  ;;  %v1397_v26 = vsel %vm1386_vm3, nan, %v1396_v49 }
 0x21b   :  { %v1810_v8 = vxor.u32 2147483648, %v4258_v54  ;;  %v1462_v15 = vsub.s32 %v1458_v45, %v1461_v37  ;;  %v1237_v16 = vsel %vm1223_vm2, %v1234_v60, %v1236_v10  ;;  %v1807_v35 = vxor.u32 2147483648, %v4260_v55 }
 0x21c   :  { %v1065_v20 = vmul.f32 %v1064_v6, %v1062_v18  ;;  %v1226_v12 = vsel %vm1222_vm8, %v1206_v21, %v1209_v4  ;;  %v1238_v33 = vshll.u32 %v1198_v28, 8  ;;  %v1228_v51 = vsel %vm1224_vm6, %v1212_v38, %v1227_v61  ;;  %v8165_v28 = vld [vmem:[#allocation23_spill] sm:$0xff] }
 0x21d   :  { %v1811_v58 = vsel %vm1809_vm14, %v1810_v8, %v4260_v55  ;;  %v1464_v46 = vsub.s32 0, %v1462_v15  ;;  %v1233_v30 = vsel %vm1223_vm2, %v1230_v5, %v1232_v25  ;;  %v1808_v45 = vsel %vm1806_vm12, %v4258_v54, %v1807_v35 }
 0x21e   :  { %v1066_v11 = vxor.u32 2147483648, %v1065_v20  ;;  %v6204_v48 = vmul.u32.u64.low %v1238_v33, %v1237_v16  ;;  %v6205_v19 = vmul.u32.u64.high %v1238_v33, %v1237_v16, %v6204_v48  ;;  %v1637_v14 = vor.u32 %v6083_v62, %v6035_v59 }
 0x21f   :  { %vm1802_vm4 = vweird.f32 %v8142_v39  ;;  %v1812_v4 = vsel %vm1805_vm5, %v1808_v45, %v1811_v58  ;;  %v3938_v52 = vmin.u32 %v1464_v46, %v1462_v15  ;;  %vm1641_vm9 = vcmp.lt.s32.totalorder %v6025_v44, 4 }
 0x220   :  { %v1813_v38 = vsel %vm1802_vm4, nan, %v1812_v4  ;;  %v6213_v47 = vmul.u32.u64.low %v1238_v33, %v1233_v30  ;;  %v6214_v17 = vmul.u32.u64.high %v1238_v33, %v1233_v30, %v6213_v47  ;;  %vm984_vm1 = vcmp.lt.s32.totalorder %v8145_v22, 0 }
 0x221   :  { %v4039_v49 = vpack.c.bf16 %v1813_v38, %v1397_v26  ;;  %v1466_v21 = vclz %v3938_v52  ;;  %v1229_v59 = vsel %vm1223_vm2, %v1226_v12, %v1228_v51  ;;  %v1647_v39 = vsel %vm1641_vm9, %v6109_v29, 920167782 }
 0x222   :  { %v1067_v62 = vsel %vm984_vm1, %v1066_v11, %v1065_v20  ;;  %v1651_v57 = vsel %vm1641_vm9, %v1637_v14, 1326507024  ;;  %vm1247_vm13 = vc.u32 %v6205_v19, %v6213_v47  ;;  %v1606_v27 = vand.u32 2147483647, %v8165_v28 }
 0x223   :  { %4040 = vmatprep.subr.bf16.mxu1 %v4039_v49  ;;  %v3939_v53 = vadd.s32 4294967294, %v1466_v21  ;;  %vm6232_vm0 = vcmp.le.f32.partialorder %v982_v63, 0.7853982  ;;  %v1454_v13 = vadd.s32 %v6129_v23, %v6127_v31  ;;  %v1245_v10 = vmul.u32 %v1238_v33, %v1229_v59 }
 0x224   :  { %v1248_v6 = vadd.s32 1, %v6214_v17  ;;  %v1070_v37 = vsel %vm6232_vm0, %v8145_v22, %v1067_v62  ;;  %v1624_v5 = vshrl.u32 %v8088_v50, %v5659_v40  ;;  %v1627_v63 = vshrl.u32 %v8083_v36, %v5659_v40 }
 0x225   :  { %vm3940_vm7 = vcmp.lt.s32.totalorder %v3939_v53, 0  ;;  %v1623_v31 = vshll.u32 %v8086_v7, %v5481_v9  ;;  %v1626_v23 = vshll.u32 %v8088_v50, %v5481_v9  ;;  %v1613_v60 = vand.u32 8388607, %v1606_v27 }
 0x226   :  { %v1469_v54 = vsel %vm3940_vm7, 0, %v3939_v53  ;;  %v1249_v18 = vsel %vm1247_vm13, %v1248_v6, %v6214_v17  ;;  %v1629_v8 = vshll.u32 %v8083_v36, %v5481_v9  ;;  %v1630_v16 = vshrl.u32 %v8084_v1, %v5659_v40 }
 0x227   :  { %v1470_v61 = vsub.s32 32, %v1469_v54  ;;  %v1474_v0 = vsub.s32 4294967266, %v1469_v54  ;;  %v1250_v25 = vadd.s32 %v1249_v18, %v1245_v10  ;;  %v1625_v55 = vor.u32 %v1624_v5, %v1623_v31 }
 0x228   :  { %v1628_v26 = vor.u32 %v1627_v63, %v1626_v23  ;;  %v1471_v35 = vshll.u32 %v1462_v15, %v1469_v54  ;;  %v1068_v58 = vsub.s32 4, %v6079_v43  ;;  %v1484_v46 = vsub.s32 4, %v6169_v41 }
 0x229   :  { %v1472_v20 = vshrl.u32 %v1454_v13, %v1470_v61  ;;  %v1475_v12 = vadd.s32 127, %v1474_v0  ;;  %v1251_v33 = vadd.s32 536870912, %v1250_v25  ;;  %v1631_v51 = vor.u32 %v1630_v16, %v1629_v8 }
 0x22a   :  { %vm1638_vm10 = vcmp.lt.s32.totalorder %v6025_v44, 1  ;;  %vm1640_vm11 = vcmp.lt.s32.totalorder %v6025_v44, 3  ;;  %4261 = vcosq.f32 %v1070_v37  ;;  %v1614_v9 = vor.u32 8388608, %v1613_v60 }
 0x22b   :  { %v1473_v30 = vor.u32 %v1472_v20, %v1471_v35  ;;  %v1476_v45 = vshll.u32 %v1475_v12, 23  ;;  %v6260_v11 = vshrl.u32 %v1251_v33, 30  ;;  %v1646_v15 = vsel %vm1638_vm10, %v1625_v55, %v1628_v26  ;;  %v4341_v35 = vld [vmem:[#allocation5] sm:$0xff]  ;;  %v4342_v20 = vld [vmem:[#allocation5 + $0x8] sm:$0xff] }
 0x22c   :  { %v1652_v48 = vsel %vm1640_vm11, %v6109_v29, %v1651_v57  ;;  %v1648_v52 = vsel %vm1640_vm11, %v1631_v51, %v1647_v39  ;;  %v1650_v38 = vsel %vm1638_vm10, %v1628_v26, %v1631_v51  ;;  %v1069_v17 = vsel %vm984_vm1, %v1068_v58, %v6079_v43 }
 0x22d   :  { %v1477_v14 = vor.u32 4788187, %v1476_v45  ;;  %v1253_v4 = vshll.u32 %v6260_v11, 30  ;;  %4263 = vsinq.f32 %v1070_v37  ;;  %vm1400_vm15 = vcmp.lt.s32.totalorder %v8154_v42, 0 }
 0x22e   :  { %vm1639_vm3 = vcmp.lt.s32.totalorder %v6025_v44, 2  ;;  %v1480_v29 = vcvt.s32.f32 %v1473_v30  ;;  %v1643_v59 = vsel %vm1641_vm9, %v1631_v51, 2102212464  ;;  %v1622_v39 = vshrl.u32 %v8086_v7, %v5659_v40 }
 0x22f   :  { %v1478_v49 = vand.u32 2147483647, %v1477_v14  ;;  %v6278_v21 = vsub.s32 %v1250_v25, %v1253_v4  ;;  %v1649_v62 = vsel %vm1639_vm3, %v1646_v15, %v1648_v52  ;;  %v1653_v43 = vsel %vm1639_vm3, %v1650_v38, %v1652_v48  ;;  %v4343_v52 = vld [vmem:[#allocation5 + $0x10] sm:$0xff] }
 0x230   :  { %v1654_v57 = vshll.u32 %v1614_v9, 8  ;;  %v1071_v53 = vsel %vm6232_vm0, 0, %v1069_v17  ;;  %v1485_v10 = vsel %vm1400_vm15, %v1484_v46, %v6169_v41  ;;  %v1642_v40 = vsel %vm1638_vm10, %v1622_v39, %v1625_v55 }
 0x231   :  { %v1481_v13 = vmul.f32 %v1480_v29, %v1478_v49  ;;  %v1256_v6 = vsub.s32 0, %v6278_v21  ;;  %v1644_v37 = vsel %vm1640_vm11, %v1628_v26, %v1643_v59  ;;  %vm6308_vm12 = vcmp.le.f32.partialorder %v1398_v32, 0.7853982 }
 0x232   :  { %v6298_v5 = vmul.u32.u64.low %v1654_v57, %v1653_v43  ;;  %v6299_v63 = vmul.u32.u64.high %v1654_v57, %v1653_v43, %v6298_v5  ;;  %v6302_v18 = vmul.u32.u64.low %v1654_v57, %v1649_v62  ;;  %v6303_v31 = vmul.u32.u64.high %v1654_v57, %v1649_v62, %v6302_v18  ;;  %v4344_v43 = vld [vmem:[#allocation5 + $0x18] sm:$0xff] }
 0x233   :  { %v1482_v54 = vxor.u32 2147483648, %v1481_v13  ;;  %v3930_v34 = vmin.u32 %v1256_v6, %v6278_v21  ;;  %v1075_v23 = vadd.s32 3, %v1071_v53  ;;  %v4452_v25 = vmov 0.0  }
 0x234   :  { %1911 = vmatprep.mubr.f32.mxu0 %v4452_v25  ;;  %2000 = vmatprep.mubr.f32.mxu1 %v4452_v25  ;;  %v4262_v60 = vpop.eup %4261  ;;  %v1487_v32 = vsel %vm6308_vm12, 0, %v1485_v10  ;;  %v1645_v26 = vsel %vm1639_vm3, %v1642_v40, %v1644_v37  ;;  %v4453_v8 = vmov 2   ;;  %vm1663_vm5 = vc.u32 %v6299_v63, %v6302_v18 }
 0x235   :  { %v1483_v61 = vsel %vm1400_vm15, %v1482_v54, %v1481_v13  ;;  %v1258_v0 = vclz %v3930_v34  ;;  %4210 = vset.pattern.permute.xlu1 %v4453_v8  ;;  %4211 = vset.pattern.permute.xlu0 %v4453_v8  ;;  %v1664_v33 = vadd.s32 1, %v6303_v31  ;;  %v1076_v58 = vand.u32 3, %v1075_v23 }
 0x236   :  { %v1486_v55 = vsel %vm6308_vm12, %v8154_v42, %v1483_v61  ;;  %1819 = vperm.xlu1 %4210, %v4341_v35   ;;  %1823 = vperm.xlu0 %4211, %v4342_v20   ;;  %v1491_v46 = vadd.s32 3, %v1487_v32  ;;  %v1661_v44 = vmul.u32 %v1654_v57, %v1645_v26  ;;  %v1082_v51 = vxor.u32 2147483648, %v4262_v60 }
 0x237   :  { %4265 = vcosq.f32 %v1486_v55  ;;  %v3931_v16 = vadd.s32 4294967294, %v1258_v0  ;;  %v4264_v12 = vpop.eup %4263  ;;  %v1246_v30 = vadd.s32 %v6213_v47, %v6205_v19  ;;  %v1665_v9 = vsel %vm1663_vm5, %v1664_v33, %v6303_v31 }
 0x238   :  { %4267 = vsinq.f32 %v1486_v55  ;;  %v1079_v15 = vxor.u32 2147483648, %v4264_v12  ;;  %v1666_v4 = vadd.s32 %v1665_v9, %v1661_v44  ;;  %vm1081_vm6 = vcmp.eq.s32.totalorder %v1076_v58, 2 }
 0x239   :  { %vm3932_vm14 = vcmp.lt.s32.totalorder %v3931_v16, 0  ;;  %vm1078_vm8 = vcmp.eq.s32.totalorder %v1076_v58, 0  ;;  %v1083_v29 = vsel %vm1081_vm6, %v1082_v51, %v4264_v12  ;;  %v1492_v59 = vand.u32 3, %v1491_v46 }
 0x23a   :  { %v1261_v45 = vsel %vm3932_vm14, 0, %v3931_v16  ;;  %1827 = vperm.xlu1 %4210, %v4343_v52   ;;  %v1667_v49 = vadd.s32 536870912, %v1666_v4  ;;  %v1080_v39 = vsel %vm1078_vm8, %v4262_v60, %v1079_v15  ;;  %vm1077_vm2 = vcmp.lt.s32.totalorder %v1076_v58, 2  ;;  %v6335_v16 = vld [vmem:[#allocation7] sm:$0xff] }
 0x23b   :  { %v1262_v48 = vsub.s32 32, %v1261_v45  ;;  %v1266_v14 = vsub.s32 4294967266, %v1261_v45  ;;  %v1263_v62 = vshll.u32 %v6278_v21, %v1261_v45  ;;  %v1084_v40 = vsel %vm1077_vm2, %v1080_v39, %v1083_v29 }
 0x23c   :  { %v6330_v47 = vshrl.u32 %v1667_v49, 30  ;;  %vm1497_vm4 = vcmp.eq.s32.totalorder %v1492_v59, 2  ;;  %vm1074_vm9 = vweird.f32 %v8145_v22  ;;  %vm1493_vm1 = vcmp.lt.s32.totalorder %v1492_v59, 2 }
 0x23d   :  { %v1264_v38 = vshrl.u32 %v1246_v30, %v1262_v48  ;;  %v1267_v17 = vadd.s32 127, %v1266_v14  ;;  %vm1494_vm13 = vcmp.eq.s32.totalorder %v1492_v59, 0  ;;  %v1085_v31 = vsel %vm1074_vm9, nan, %v1084_v40  ;;  %v1817_v14 = vld [vmem:[#allocation7 + $0x18] sm:$0xff] }
 0x23e   :  { %1831 = vperm.xlu1 %4210, %v4344_v43   ;;  %v1669_v10 = vshll.u32 %v6330_v47, 30  ;;  %vm1490_vm0 = vweird.f32 %v8154_v42  ;;  %vm8025_vm7 = vcmask 261120   ;;  %vm1192_vm11 = vcmp.lt.s32.totalorder %v8158_v24, 0  ;;  %v6341_v42 = vld [vmem:[#allocation7 + $0x8] sm:$0xff] }
 0x23f   :  { %v1268_v19 = vshll.u32 %v1267_v17, 23  ;;  %v1265_v53 = vor.u32 %v1264_v38, %v1263_v62  ;;  %v1662_v33 = vadd.s32 %v6302_v18, %v6299_v63  ;;  %vm6349_vm15 = vcmp.le.f32.partialorder %v1190_v2, 0.7853982  ;;  %v1816_v63 = vld [vmem:[#allocation7 + $0x10] sm:$0xff] }
 0x240   :  { %v1670_v34 = vsub.s32 %v1666_v4, %v1669_v10  ;;  %v1276_v2 = vsub.s32 4, %v6260_v11  ;;  %v1692_v49 = vsub.s32 4, %v6330_v47  ;;  %vm1608_vm3 = vcmp.lt.s32.totalorder %v8165_v28, 0 }
 0x241   :  { %v4266_v57 = vpop.eup %4265  ;;  %v1269_v13 = vor.u32 4788187, %v1268_v19  ;;  %v1272_v23 = vcvt.s32.f32 %v1265_v53  ;;  %vm1607_vm12 = vcmp.le.f32.partialorder %v1606_v27, 0.7853982  ;;  %vm1282_vm2 = vweird.f32 %v8158_v24 }
 0x242   :  { %v4268_v6 = vpop.eup %4267  ;;  %v1498_v37 = vxor.u32 2147483648, %v4266_v57  ;;  %v1672_v61 = vsub.s32 0, %v1670_v34  ;;  %v1277_v38 = vsel %vm1192_vm11, %v1276_v2, %v6260_v11  ;;  %v1693_v62 = vsel %vm1608_vm3, %v1692_v49, %v6330_v47 }
 0x243   :  { %v1495_v5 = vxor.u32 2147483648, %v4268_v6  ;;  %v1270_v54 = vand.u32 2147483647, %v1269_v13  ;;  %v1279_v29 = vsel %vm6349_vm15, 0, %v1277_v38  ;;  %v1695_v53 = vsel %vm1607_vm12, 0, %v1693_v62 }
 0x244   :  { %v1499_v21 = vsel %vm1497_vm4, %v1498_v37, %v4268_v6  ;;  %v3946_v32 = vmin.u32 %v1672_v61, %v1670_v34  ;;  %v1283_v11 = vadd.s32 3, %v1279_v29  ;;  %v1699_v40 = vadd.s32 3, %v1695_v53 }
 0x245   :  { %v1496_v41 = vsel %vm1494_vm13, %v4266_v57, %v1495_v5  ;;  %v1273_v55 = vmul.f32 %v1272_v23, %v1270_v54 }
 0x246   :  { %v1500_v0 = vsel %vm1493_vm1, %v1496_v41, %v1499_v21  ;;  %v1674_v8 = vclz %v3946_v32  ;;  %v1284_v13 = vand.u32 3, %v1283_v11  ;;  %v1700_v27 = vand.u32 3, %v1699_v40 }
 0x247   :  { %v1501_v60 = vsel %vm1490_vm0, nan, %v1500_v0  ;;  %v1274_v22 = vxor.u32 2147483648, %v1273_v55  ;;  %vm1698_vm1 = vweird.f32 %v8165_v28 }
 0x248   :  { %v4033_v26 = vpack.c.bf16 %v1501_v60, %v1085_v31  ;;  %v3947_v35 = vadd.s32 4294967294, %v1674_v8  ;;  %vm1286_vm5 = vcmp.eq.s32.totalorder %v1284_v13, 0  ;;  %vm1289_vm14 = vcmp.eq.s32.totalorder %v1284_v13, 2 }
 0x249   :  { %v1275_v12 = vsel %vm1192_vm11, %v1274_v22, %v1273_v55  ;;  %vm1285_vm6 = vcmp.lt.s32.totalorder %v1284_v13, 2  ;;  %vm1705_vm8 = vcmp.eq.s32.totalorder %v1700_v27, 2  ;;  %vm1702_vm4 = vcmp.eq.s32.totalorder %v1700_v27, 0 }
 0x24a   :  { %4034 = vmatpush1.bf16.msra.mxu0 %v4033_v26  ;;  %vm3948_vm10 = vcmp.lt.s32.totalorder %v3947_v35, 0  ;;  %v1278_v9 = vsel %vm6349_vm15, %v8158_v24, %v1275_v12  ;;  %vm1701_vm9 = vcmp.lt.s32.totalorder %v1700_v27, 2 }
 0x24b   :  { %v1677_v20 = vsel %vm3948_vm10, 0, %v3947_v35  ;;  %4269 = vcosq.f32 %v1278_v9 }
 0x24c   :  { %v1678_v58 = vsub.s32 32, %v1677_v20  ;;  %v1682_v46 = vsub.s32 4294967266, %v1677_v20  ;;  %v1679_v51 = vshll.u32 %v1670_v34, %v1677_v20  ;;  %4271 = vsinq.f32 %v1278_v9 }
 0x24d   :  { %3953 = vmatmul.mubr.msk.f32.vlgmr.msra.gmra.mrb[0].mxu0 %vm8025_vm7, %v6335_v16 }
 0x24e   :  { %1917 = vmatprep.mubr.f32.mxu0 %v4452_v25  ;;  %v1680_v30 = vshrl.u32 %v1662_v33, %v1678_v58  ;;  %v1683_v45 = vadd.s32 127, %v1682_v46 }
 0x250   :  { %v1681_v18 = vor.u32 %v1680_v30, %v1679_v51  ;;  %v1684_v15 = vshll.u32 %v1683_v45, 23 }
 0x251   :  { %3954 = vmatmul.mubr.msk.f32.gmra.mrb[2].mxu0 %vm8025_vm7, %v6341_v42 }
 0x252   :  { %1923 = vmatprep.mubr.f32.mxu0 %v4452_v25  ;;  %v1685_v48 = vor.u32 4788187, %v1684_v15  ;;  %v1688_v52 = vcvt.s32.f32 %v1681_v18 }
 0x254   :  { %v1686_v4 = vand.u32 2147483647, %v1685_v48 }
 0x255   :  { %3955 = vmatmul.mubr.msk.f32.gmra.mrb[4].mxu0 %vm8025_vm7, %v1816_v63  ;;  %v4270_v43 = vpop.eup %4269 }
 0x256   :  { %1929 = vmatprep.mubr.f32.mxu0 %v4452_v25  ;;  %v1689_v17 = vmul.f32 %v1688_v52, %v1686_v4  ;;  %v4272_v57 = vpop.eup %4271  ;;  %v1290_v6 = vxor.u32 2147483648, %v4270_v43 }
 0x257   :  { %v1287_v10 = vxor.u32 2147483648, %v4272_v57 }
 0x258   :  { %v1690_v59 = vxor.u32 2147483648, %v1689_v17  ;;  %v1291_v5 = vsel %vm1289_vm14, %v1290_v6, %v4272_v57 }
 0x259   :  { %3956 = vmatmul.mubr.msk.f32.gmra.mrb[6].mxu0 %vm8025_vm7, %v1817_v14  ;;  %v1288_v37 = vsel %vm1286_vm5, %v4270_v43, %v1287_v10 }
 0x25a   :  { %3761 = vmatprep.mubr.f32.mxu0 %v4452_v25  ;;  %v1691_v39 = vsel %vm1608_vm3, %v1690_v59, %v1689_v17  ;;  %v1292_v34 = vsel %vm1285_vm6, %v1288_v37, %v1291_v5 }
 0x25b   :  { %v1694_v19 = vsel %vm1607_vm12, %v8165_v28, %v1691_v39  ;;  %v1293_v23 = vsel %vm1282_vm2, nan, %v1292_v34 }
 0x25c   :  { %4273 = vcosq.f32 %v1694_v19 }
 0x25d   :  { %4275 = vsinq.f32 %v1694_v19 }
 0x266   :  { %v4274_v54 = vpop.eup %4273 }
 0x267   :  { %v4276_v47 = vpop.eup %4275  ;;  %v1706_v21 = vxor.u32 2147483648, %v4274_v54 }
 0x268   :  { %v1703_v31 = vxor.u32 2147483648, %v4276_v47 }
 0x269   :  { %v1707_v41 = vsel %vm1705_vm8, %v1706_v21, %v4276_v47 }
 0x26a   :  { %v1704_v61 = vsel %vm1702_vm4, %v4274_v54, %v1703_v31 }
 0x26b   :  { %v1708_v0 = vsel %vm1701_vm9, %v1704_v61, %v1707_v41 }
 0x26c   :  { %v1709_v60 = vsel %vm1698_vm1, nan, %v1708_v0 }
 0x26d   :  { %v4041_v55 = vpack.c.bf16 %v1709_v60, %v1293_v23 }
 0x26f   :  { %4042 = vmatpush1.bf16.msra.mxu1 %v4041_v55 }
 0x272   :  { %3957 = vmatmul.mubr.msk.f32.vlgmr.msra.gmra.mrb[0].mxu1 %vm8025_vm7, %v6335_v16 }
 0x273   :  { %2006 = vmatprep.mubr.f32.mxu1 %v4452_v25 }
 0x276   :  { %3958 = vmatmul.mubr.msk.f32.gmra.mrb[2].mxu1 %vm8025_vm7, %v6341_v42 }
 0x277   :  { %2012 = vmatprep.mubr.f32.mxu1 %v4452_v25 }
 0x27a   :  { %3959 = vmatmul.mubr.msk.f32.gmra.mrb[4].mxu1 %vm8025_vm7, %v1816_v63 }
 0x27b   :  { %2018 = vmatprep.mubr.f32.mxu1 %v4452_v25 }
 0x27e   :  { %3960 = vmatmul.mubr.msk.f32.gmra.mrb[6].mxu1 %vm8025_vm7, %v1817_v14 }
 0x27f   :  { %3832 = vmatprep.mubr.f32.mxu1 %v4452_v25 }
 0x2b5   :  { %v6387_v24 = vpop.permute.xlu1 %1819  ;;  %v6405_v51 = vpop.permute.xlu0 %1823 }
 0x320   :  { %v1913_v28 = vpop.f32.mrb[0].mxu0 }
 0x321   :  { %v6390_v32 = vadd.f32 %v1913_v28, %v6387_v24  ;;  %v1915_v26 = vpop.f32.mrb[1].mxu0 }
 0x322   :  { %v6393_v8 = vadd.f32 %v1915_v26, %v6387_v24 }
 0x323   :  { %8172 = vst [vmem:[#allocation13_spill] sm:$0xff] %v6390_v32  ;;  %v2025_v16 = vand.u32 2147483647, %v6390_v32  ;;  %v2028_v22 = vand.u32 2139095040, %v6390_v32  ;;  %vm2027_vm9 = vcmp.lt.s32.totalorder %v6390_v32, 0 }
 0x324   :  { %v8004_v35 = vand.u32 2147483647, %v6393_v8  ;;  %v2132_v20 = vand.u32 2139095040, %v6393_v8  ;;  %v1919_v42 = vpop.f32.mrb[2].mxu0 }
 0x325   :  { %v2029_v25 = vshrl.u32 %v2028_v22, 23  ;;  %v6399_v12 = vpop.f32.mrb[3].mxu0  ;;  %v2032_v33 = vand.u32 8388607, %v2025_v16  ;;  %v6408_v15 = vadd.f32 %v1919_v42, %v6405_v51 }
 0x326   :  { %v2133_v58 = vshrl.u32 %v2132_v20, 23  ;;  %v2136_v46 = vand.u32 8388607, %v8004_v35 }
 0x327   :  { %v3961_v44 = vadd.s32 4294967169, %v2029_v25  ;;  %v2033_v9 = vor.u32 8388608, %v2032_v33  ;;  %8173 = vst [vmem:[#allocation20_spill] sm:$0xff] %v6408_v15  ;;  %v2444_v17 = vand.u32 2139095040, %v6408_v15 }
 0x328   :  { %v3965_v30 = vadd.s32 4294967169, %v2133_v58  ;;  %v2137_v63 = vor.u32 8388608, %v2136_v46  ;;  %v6431_v61 = vpop.f32.mrb[4].mxu0 }
 0x329   :  { %v2035_v45 = vadd.s32 1, %v3961_v44  ;;  %v6410_v52 = vshll.u32 %v2033_v9, 8 }
 0x32a   :  { %v2139_v18 = vadd.s32 1, %v3965_v30  ;;  %v6412_v38 = vshll.u32 %v2137_v63, 8 }
 0x32b   :  { %vm2036_vm13 = vcmp.gt.s32.totalorder %v2035_v45, 0 }
 0x32c   :  { %v2037_v2 = vsel %vm2036_vm13, %v2035_v45, 0  ;;  %vm2140_vm0 = vcmp.gt.s32.totalorder %v2139_v18, 0 }
 0x32d   :  { %v2038_v48 = vshrl.u32 %v2037_v2, 5  ;;  %v2039_v14 = vand.u32 31, %v2037_v2  ;;  %v2141_v4 = vsel %vm2140_vm0, %v2139_v18, 0 }
 0x32e   :  { %v6416_v59 = vshrl.u32 %v2141_v4, 5  ;;  %v2143_v39 = vand.u32 31, %v2141_v4 }
 0x32f   :  { %v2040_v49 = vsub.s32 32, %v2039_v14  ;;  %v2042_v29 = vshll.u32 %v8086_v7, %v2039_v14  ;;  %v2045_v62 = vshll.u32 %v8088_v50, %v2039_v14  ;;  %v2048_v11 = vshll.u32 %v8083_v36, %v2039_v14 }
 0x330   :  { %v2051_v19 = vshll.u32 %v8084_v1, %v2039_v14  ;;  %v2054_v43 = vshll.u32 %v8085_v56, %v2039_v14  ;;  %vm2057_vm10 = vcmp.lt.s32.totalorder %v2038_v48, 1  ;;  %vm2058_vm11 = vcmp.lt.s32.totalorder %v2038_v48, 2 }
 0x331   :  { %v2043_v57 = vshrl.u32 %v8088_v50, %v2040_v49  ;;  %v2046_v53 = vshrl.u32 %v8083_v36, %v2040_v49  ;;  %v2049_v13 = vshrl.u32 %v8084_v1, %v2040_v49  ;;  %v2041_v10 = vshrl.u32 %v8086_v7, %v2040_v49 }
 0x332   :  { %v2052_v6 = vshrl.u32 %v8085_v56, %v2040_v49  ;;  %v2055_v40 = vshrl.u32 %v8081_v3, %v2040_v49  ;;  %v2144_v54 = vsub.s32 32, %v2143_v39  ;;  %vm2059_vm15 = vcmp.lt.s32.totalorder %v2038_v48, 3 }
 0x333   :  { %v2044_v37 = vor.u32 %v2043_v57, %v2042_v29  ;;  %v2047_v5 = vor.u32 %v2046_v53, %v2045_v62  ;;  %v2050_v27 = vor.u32 %v2049_v13, %v2048_v11  ;;  %vm2060_vm3 = vcmp.lt.s32.totalorder %v2038_v48, 4 }
 0x334   :  { %v2053_v47 = vor.u32 %v2052_v6, %v2051_v19  ;;  %v2056_v34 = vor.u32 %v2055_v40, %v2054_v43  ;;  %v2146_v28 = vshll.u32 %v8086_v7, %v2143_v39  ;;  %v2147_v20 = vshrl.u32 %v8088_v50, %v2144_v54 }
 0x335   :  { %v2061_v21 = vsel %vm2057_vm10, %v2041_v10, %v2044_v37  ;;  %v2062_v31 = vsel %vm2060_vm3, %v2050_v27, 2102212464  ;;  %v2065_v41 = vsel %vm2057_vm10, %v2044_v37, %v2047_v5  ;;  %v2069_v23 = vsel %vm2057_vm10, %v2047_v5, %v2050_v27 }
 0x336   :  { %v2063_v0 = vsel %vm2059_vm15, %v2047_v5, %v2062_v31  ;;  %v2066_v60 = vsel %vm2060_vm3, %v2053_v47, 920167782  ;;  %v2070_v55 = vsel %vm2060_vm3, %v2056_v34, 1326507024  ;;  %v2149_v42 = vshll.u32 %v8088_v50, %v2143_v39 }
 0x337   :  { %v2067_v26 = vsel %vm2059_vm15, %v2050_v27, %v2066_v60  ;;  %v2071_v22 = vsel %vm2059_vm15, %v2053_v47, %v2070_v55  ;;  %v2064_v25 = vsel %vm2058_vm11, %v2061_v21, %v2063_v0  ;;  %v2150_v46 = vshrl.u32 %v8083_v36, %v2144_v54 }
 0x338   :  { %v2068_v33 = vsel %vm2058_vm11, %v2065_v41, %v2067_v26  ;;  %v2072_v58 = vsel %vm2058_vm11, %v2069_v23, %v2071_v22  ;;  %v2148_v63 = vor.u32 %v2147_v20, %v2146_v28  ;;  %v2152_v2 = vshll.u32 %v8083_v36, %v2143_v39 }
 0x339   :  { %v6441_v44 = vmul.u32.u64.low %v6410_v52, %v2072_v58  ;;  %v6442_v30 = vmul.u32.u64.high %v6410_v52, %v2072_v58, %v6441_v44  ;;  %v6445_v45 = vmul.u32.u64.low %v6410_v52, %v2068_v33  ;;  %v6446_v9 = vmul.u32.u64.high %v6410_v52, %v2068_v33, %v6445_v45 }
 0x33a   :  { %v2151_v18 = vor.u32 %v2150_v46, %v2149_v42  ;;  %v2153_v14 = vshrl.u32 %v8084_v1, %v2144_v54  ;;  %v2155_v48 = vshll.u32 %v8084_v1, %v2143_v39  ;;  %v2156_v4 = vshrl.u32 %v8085_v56, %v2144_v54 }
 0x33b   :  { %v2159_v49 = vshrl.u32 %v8081_v3, %v2144_v54  ;;  %v2445_v29 = vshrl.u32 %v2444_v17, 23  ;;  %v2080_v62 = vmul.u32 %v6410_v52, %v2064_v25  ;;  %v2145_v11 = vshrl.u32 %v8086_v7, %v2144_v54 }
 0x33c   :  { %v2154_v19 = vor.u32 %v2153_v14, %v2152_v2  ;;  %v2158_v43 = vshll.u32 %v8085_v56, %v2143_v39  ;;  %vm2082_vm12 = vc.u32 %v6442_v30, %v6445_v45  ;;  %v2083_v57 = vadd.s32 1, %v6446_v9 }
 0x33d   :  { %v2157_v53 = vor.u32 %v2156_v4, %v2155_v48  ;;  %vm2161_vm5 = vcmp.lt.s32.totalorder %v6416_v59, 1  ;;  %vm2163_vm14 = vcmp.lt.s32.totalorder %v6416_v59, 3  ;;  %vm2164_vm6 = vcmp.lt.s32.totalorder %v6416_v59, 4 }
 0x33e   :  { %v2160_v13 = vor.u32 %v2159_v49, %v2158_v43  ;;  %v2169_v17 = vsel %vm2161_vm5, %v2148_v63, %v2151_v18  ;;  %v2084_v52 = vsel %vm2082_vm12, %v2083_v57, %v6446_v9  ;;  %v2166_v10 = vsel %vm2164_vm6, %v2154_v19, 2102212464 }
 0x33f   :  { %v2170_v6 = vsel %vm2164_vm6, %v2157_v53, 920167782  ;;  %v2173_v40 = vsel %vm2161_vm5, %v2151_v18, %v2154_v19  ;;  %v2085_v39 = vadd.s32 %v2084_v52, %v2080_v62  ;;  %vm2162_vm8 = vcmp.lt.s32.totalorder %v6416_v59, 2 }
 0x340   :  { %v2171_v37 = vsel %vm2163_vm14, %v2154_v19, %v2170_v6  ;;  %v2174_v5 = vsel %vm2164_vm6, %v2160_v13, 1326507024  ;;  %v2165_v27 = vsel %vm2161_vm5, %v2145_v11, %v2148_v63  ;;  %v2167_v54 = vsel %vm2163_vm14, %v2151_v18, %v2166_v10 }
 0x341   :  { %v2172_v47 = vsel %vm2162_vm8, %v2169_v17, %v2171_v37  ;;  %v2175_v34 = vsel %vm2163_vm14, %v2157_v53, %v2174_v5  ;;  %v2086_v21 = vadd.s32 536870912, %v2085_v39  ;;  %v3977_v55 = vadd.s32 4294967169, %v2445_v29 }
 0x342   :  { %v2176_v31 = vsel %vm2162_vm8, %v2173_v40, %v2175_v34  ;;  %v6466_v41 = vmul.u32.u64.low %v6412_v38, %v2172_v47  ;;  %v6467_v23 = vmul.u32.u64.high %v6412_v38, %v2172_v47, %v6466_v41  ;;  %v2168_v59 = vsel %vm2162_vm8, %v2165_v27, %v2167_v54 }
 0x343   :  { %v6471_v0 = vmul.u32.u64.low %v6412_v38, %v2176_v31  ;;  %v6472_v60 = vmul.u32.u64.high %v6412_v38, %v2176_v31, %v6471_v0  ;;  %v6474_v28 = vshrl.u32 %v2086_v21, 30  ;;  %v8003_v26 = vand.u32 2147483647, %v6408_v15 }
 0x344   :  { %v2187_v20 = vadd.s32 1, %v6467_v23  ;;  %v2184_v42 = vmul.u32 %v6412_v38, %v2168_v59  ;;  %v2451_v25 = vadd.s32 1, %v3977_v55  ;;  %v6487_v44 = vadd.f32 %v6399_v12, %v6405_v51 }
 0x345   :  { %v2088_v22 = vshll.u32 %v6474_v28, 30  ;;  %vm2186_vm2 = vc.u32 %v6472_v60, %v6466_v41  ;;  %v2002_v58 = vpop.f32.mrb[0].mxu1  ;;  %v2448_v38 = vand.u32 8388607, %v8003_v26  ;;  %v6526_v31 = vadd.s32 %v6445_v45, %v6442_v30 }
 0x346   :  { %v2188_v46 = vsel %vm2186_vm2, %v2187_v20, %v6467_v23  ;;  %v6490_v9 = vadd.f32 %v2002_v58, %v6387_v24  ;;  %v2004_v18 = vpop.f32.mrb[1].mxu1  ;;  %vm2452_vm4 = vcmp.gt.s32.totalorder %v2451_v25, 0  ;;  %v2548_v11 = vand.u32 2139095040, %v6487_v44 }
 0x347   :  { %v6482_v33 = vsub.s32 %v2085_v39, %v2088_v22  ;;  %v2189_v63 = vadd.s32 %v2188_v46, %v2184_v42  ;;  %v6496_v14 = vadd.f32 %v2004_v18, %v6387_v24  ;;  %v2449_v57 = vor.u32 8388608, %v2448_v38 }
 0x348   :  { %8174 = vst [vmem:[#allocation26_spill] sm:$0xff] %v6490_v9  ;;  %v8006_v48 = vand.u32 2147483647, %v6490_v9  ;;  %v2236_v4 = vand.u32 2139095040, %v6490_v9  ;;  %v8002_v24 = vand.u32 2147483647, %v6487_v44  ;;  %v6540_v30 = vadd.s32 %v6466_v41, %v6472_v60 }
 0x349   :  { %v2091_v2 = vsub.s32 0, %v6482_v33  ;;  %v2190_v49 = vadd.s32 536870912, %v2189_v63  ;;  %v2340_v29 = vand.u32 2139095040, %v6496_v14  ;;  %v6502_v62 = vpop.f32.mrb[2].mxu1  ;;  %v2453_v52 = vsel %vm2452_vm4, %v2451_v25, 0 }
 0x34a   :  { %v2237_v19 = vshrl.u32 %v2236_v4, 23  ;;  %v2240_v13 = vand.u32 8388607, %v8006_v48  ;;  %v6510_v10 = vpop.f32.mrb[3].mxu1  ;;  %v2549_v5 = vshrl.u32 %v2548_v11, 23  ;;  %v6516_v47 = vand.u32 31, %v2453_v52 }
 0x34b   :  { %v3962_v12 = vmin.u32 %v2091_v2, %v6482_v33  ;;  %v6505_v43 = vshrl.u32 %v2190_v49, 30  ;;  %v2341_v17 = vshrl.u32 %v2340_v29, 23  ;;  %v6518_v34 = vshll.u32 %v2449_v57, 8 }
 0x34c   :  { %v3969_v6 = vadd.s32 4294967169, %v2237_v19  ;;  %v6522_v21 = vand.u32 8388607, %v8002_v24  ;;  %v2111_v23 = vsub.s32 4, %v6474_v28  ;;  %v2241_v0 = vor.u32 8388608, %v2240_v13 }
 0x34d   :  { %8175 = vst [vmem:[#allocation19_spill] sm:$0xff] %v6505_v43  ;;  %v2093_v53 = vclz %v3962_v12  ;;  %v2192_v40 = vshll.u32 %v6505_v43, 30  ;;  %v3973_v37 = vadd.s32 4294967169, %v2341_v17  ;;  %v6514_v27 = vpop.f32.mrb[4].mxu1  ;;  %v6533_v22 = vshrl.u32 %v2453_v52, 5 }
 0x34e   :  { %v2243_v54 = vadd.s32 1, %v3969_v6  ;;  %v6536_v58 = vadd.s32 4294967169, %v2549_v5  ;;  %v6543_v45 = vsub.s32 32, %v6516_v47  ;;  %v6551_v38 = vshll.u32 %v2241_v0, 8 }
 0x34f   :  { %v3963_v39 = vadd.s32 4294967294, %v2093_v53  ;;  %v6531_v59 = vsub.s32 %v2189_v63, %v2192_v40  ;;  %v2347_v25 = vadd.s32 1, %v3973_v37  ;;  %v6549_v63 = vsel %vm2027_vm9, %v2111_v23, %v6474_v28 }
 0x350   :  { %vm2244_vm13 = vcmp.gt.s32.totalorder %v2243_v54, 0  ;;  %v8005_v2 = vand.u32 2147483647, %v6496_v14  ;;  %v2458_v4 = vshll.u32 %v8086_v7, %v6516_v47  ;;  %vm6571_vm10 = vcmp.le.f32.partialorder %v2025_v16, 0.7853982 }
 0x351   :  { %vm3964_vm1 = vcmp.lt.s32.totalorder %v3963_v39, 0  ;;  %v2245_v42 = vsel %vm2244_vm13, %v2243_v54, 0  ;;  %v2195_v12 = vsub.s32 0, %v6531_v59  ;;  %vm2348_vm0 = vcmp.gt.s32.totalorder %v2347_v25, 0 }
 0x352   :  { %v6529_v55 = vsel %vm3964_vm1, 0, %v3963_v39  ;;  %v2247_v46 = vand.u32 31, %v2245_v42  ;;  %v2246_v60 = vshrl.u32 %v2245_v42, 5  ;;  %v2349_v42 = vsel %vm2348_vm0, %v2347_v25, 0 }
 0x353   :  { %v2101_v20 = vsub.s32 4294967266, %v6529_v55  ;;  %v2097_v41 = vsub.s32 32, %v6529_v55  ;;  %v3966_v54 = vmin.u32 %v2195_v12, %v6531_v59  ;;  %v2459_v26 = vshrl.u32 %v8088_v50, %v6543_v45 }
 0x354   :  { %v2248_v49 = vsub.s32 32, %v2247_v46  ;;  %v2250_v11 = vshll.u32 %v8086_v7, %v2247_v46  ;;  %v2253_v19 = vshll.u32 %v8088_v50, %v2247_v46  ;;  %v2256_v53 = vshll.u32 %v8083_v36, %v2247_v46 }
 0x355   :  { %v2102_v29 = vadd.s32 127, %v2101_v20  ;;  %v2259_v17 = vshll.u32 %v8084_v1, %v2247_v46  ;;  %v2262_v6 = vshll.u32 %v8085_v56, %v2247_v46  ;;  %vm2265_vm11 = vcmp.lt.s32.totalorder %v2246_v60, 1 }
 0x356   :  { %v2251_v28 = vshrl.u32 %v8088_v50, %v2248_v49  ;;  %v2254_v57 = vshrl.u32 %v8083_v36, %v2248_v49  ;;  %v2257_v13 = vshrl.u32 %v8084_v1, %v2248_v49  ;;  %v2260_v52 = vshrl.u32 %v8085_v56, %v2248_v49 }
 0x357   :  { %v2263_v40 = vshrl.u32 %v8081_v3, %v2248_v49  ;;  %v2103_v24 = vshll.u32 %v2102_v29, 23  ;;  %v2249_v46 = vshrl.u32 %v8086_v7, %v2248_v49  ;;  %vm2268_vm15 = vcmp.lt.s32.totalorder %v2246_v60, 4 }
 0x358   :  { %v2252_v39 = vor.u32 %v2251_v28, %v2250_v11  ;;  %v2255_v37 = vor.u32 %v2254_v57, %v2253_v19  ;;  %v2258_v5 = vor.u32 %v2257_v13, %v2256_v53  ;;  %v2261_v0 = vor.u32 %v2260_v52, %v2259_v17  ;;  %v6577_v19 = vpop.f32.mrb[5].mxu0 }
 0x359   :  { %v2264_v20 = vor.u32 %v2263_v40, %v2262_v6  ;;  %8178 = vst [vmem:[#allocation50_spill] sm:$0xff] %v6577_v19  ;;  %vm2267_vm3 = vcmp.lt.s32.totalorder %v2246_v60, 3  ;;  %vm2266_vm12 = vcmp.lt.s32.totalorder %v2246_v60, 2  ;;  %v2197_v13 = vclz %v3966_v54 }
 0x35a   :  { %v2273_v11 = vsel %vm2265_vm11, %v2252_v39, %v2255_v37  ;;  %v2270_v12 = vsel %vm2268_vm15, %v2258_v5, 2102212464  ;;  %v2274_v28 = vsel %vm2268_vm15, %v2261_v0, 920167782  ;;  %v2277_v57 = vsel %vm2265_vm11, %v2255_v37, %v2258_v5 }
 0x35b   :  { %v2275_v16 = vsel %vm2267_vm3, %v2258_v5, %v2274_v28  ;;  %v2278_v53 = vsel %vm2268_vm15, %v2264_v20, 1326507024  ;;  %v2269_v17 = vsel %vm2265_vm11, %v2249_v46, %v2252_v39  ;;  %v2271_v52 = vsel %vm2267_vm3, %v2255_v37, %v2270_v12 }
 0x35c   :  { %v2276_v6 = vsel %vm2266_vm12, %v2273_v11, %v2275_v16  ;;  %v2279_v40 = vsel %vm2267_vm3, %v2261_v0, %v2278_v53  ;;  %v3967_v60 = vadd.s32 4294967294, %v2197_v13  ;;  %v2344_v39 = vand.u32 8388607, %v8005_v2 }
 0x35d   :  { %v2280_v25 = vsel %vm2266_vm12, %v2277_v57, %v2279_v40  ;;  %v6580_v29 = vmul.u32.u64.low %v6551_v38, %v2276_v6  ;;  %v6581_v49 = vmul.u32.u64.high %v6551_v38, %v2276_v6, %v6580_v29  ;;  %v2272_v37 = vsel %vm2266_vm12, %v2269_v17, %v2271_v52 }
 0x35e   :  { %v6587_v18 = vmul.u32.u64.low %v6551_v38, %v2280_v25  ;;  %v6588_v35 = vmul.u32.u64.high %v6551_v38, %v2280_v25, %v6587_v18  ;;  %v2351_v5 = vand.u32 31, %v2349_v42  ;;  %v2461_v54 = vshll.u32 %v8088_v50, %v6516_v47 }
 0x35f   :  { %v2462_v0 = vshrl.u32 %v8083_v36, %v6543_v45  ;;  %v2099_v20 = vshrl.u32 %v6526_v31, %v2097_v41  ;;  %v2104_v46 = vor.u32 4788187, %v2103_v24  ;;  %vm3968_vm5 = vcmp.lt.s32.totalorder %v3967_v60, 0 }
 0x360   :  { %v6599_v11 = vshrl.u32 %v8086_v7, %v6543_v45  ;;  %v2291_v12 = vadd.s32 1, %v6581_v49  ;;  %v2352_v28 = vsub.s32 32, %v2351_v5  ;;  %v6605_v57 = vor.u32 %v2459_v26, %v2458_v4 }
 0x361   :  { %v2098_v16 = vshll.u32 %v6482_v33, %v6529_v55  ;;  %v2288_v31 = vmul.u32 %v6551_v38, %v2272_v37  ;;  %vm2290_vm14 = vc.u32 %v6588_v35, %v6580_v29  ;;  %v2345_v24 = vor.u32 8388608, %v2344_v39 }
 0x362   :  { %v2292_v41 = vsel %vm2290_vm14, %v2291_v12, %v6581_v49  ;;  %v6613_v53 = vsel %vm3968_vm5, 0, %v3967_v60  ;;  %v6615_v13 = vor.u32 %v2462_v0, %v2461_v54  ;;  %v2464_v17 = vshll.u32 %v8083_v36, %v6516_v47 }
 0x363   :  { %v2100_v26 = vor.u32 %v2099_v20, %v2098_v16  ;;  %v2105_v4 = vand.u32 2147483647, %v2104_v46  ;;  %v2293_v52 = vadd.s32 %v2292_v41, %v2288_v31  ;;  %v2355_v33 = vshrl.u32 %v8088_v50, %v2352_v28 }
 0x364   :  { %v2354_v55 = vshll.u32 %v8086_v7, %v2351_v5  ;;  %v2357_v38 = vshll.u32 %v8088_v50, %v2351_v5  ;;  %v2358_v6 = vshrl.u32 %v8083_v36, %v2352_v28  ;;  %v2361_v40 = vshrl.u32 %v8084_v1, %v2352_v28 }
 0x365   :  { %v2294_v25 = vadd.s32 536870912, %v2293_v52  ;;  %v2205_v49 = vsub.s32 4294967266, %v6613_v53  ;;  %v2350_v60 = vshrl.u32 %v2349_v42, 5  ;;  %v2360_v39 = vshll.u32 %v8083_v36, %v2351_v5 }
 0x366   :  { %v2356_v37 = vor.u32 %v2355_v33, %v2354_v55  ;;  %v2359_v54 = vor.u32 %v2358_v6, %v2357_v38  ;;  %v2363_v0 = vshll.u32 %v8084_v1, %v2351_v5  ;;  %v2364_v20 = vshrl.u32 %v8085_v56, %v2352_v28  ;;  %v6636_v33 = vpop.f32.mrb[5].mxu1 }
 0x367   :  { %v6628_v46 = vshrl.u32 %v2294_v25, 30  ;;  %v2362_v12 = vor.u32 %v2361_v40, %v2360_v39  ;;  %v2367_v16 = vshrl.u32 %v8081_v3, %v2352_v28  ;;  %v6631_v31 = vshll.u32 %v2345_v24, 8  ;;  %8179 = vst [vmem:[#allocation14_spill] sm:$0xff] %v6636_v33 }
 0x368   :  { %v2107_v41 = vcvt.s32.f32 %v2100_v26  ;;  %v2365_v2 = vor.u32 %v2364_v20, %v2363_v0  ;;  %v2366_v18 = vshll.u32 %v8085_v56, %v2351_v5  ;;  %v2465_v42 = vshrl.u32 %v8084_v1, %v6543_v45 }
 0x369   :  { %v2296_v55 = vshll.u32 %v6628_v46, 30  ;;  %v2206_v38 = vadd.s32 127, %v2205_v49  ;;  %vm2369_vm6 = vcmp.lt.s32.totalorder %v2350_v60, 1  ;;  %v2467_v6 = vshll.u32 %v8084_v1, %v6516_v47 }
 0x36a   :  { %v6641_v40 = vmul.f32 %v2107_v41, %v2105_v4  ;;  %v2368_v24 = vor.u32 %v2367_v16, %v2366_v18  ;;  %vm2372_vm8 = vcmp.lt.s32.totalorder %v2350_v60, 4  ;;  %v2377_v26 = vsel %vm2369_vm6, %v2356_v37, %v2359_v54 }
 0x36b   :  { %v6644_v25 = vsub.s32 %v2293_v52, %v2296_v55  ;;  %vm2371_vm2 = vcmp.lt.s32.totalorder %v2350_v60, 3  ;;  %v2374_v5 = vsel %vm2372_vm8, %v2362_v12, 2102212464  ;;  %v2378_v39 = vsel %vm2372_vm8, %v2365_v2, 920167782 }
 0x36c   :  { %v2353_v0 = vshrl.u32 %v8086_v7, %v2352_v28  ;;  %vm2370_vm4 = vcmp.lt.s32.totalorder %v2350_v60, 2  ;;  %v2379_v49 = vsel %vm2371_vm2, %v2362_v12, %v2378_v39  ;;  %v2468_v4 = vshrl.u32 %v8085_v56, %v6543_v45 }
 0x36d   :  { %v2299_v18 = vsub.s32 0, %v6644_v25  ;;  %v2201_v20 = vsub.s32 32, %v6613_v53  ;;  %v2207_v16 = vshll.u32 %v2206_v38, 23  ;;  %v2380_v52 = vsel %vm2370_vm4, %v2377_v26, %v2379_v49 }
 0x36e   :  { %v2373_v41 = vsel %vm2369_vm6, %v2353_v0, %v2356_v37  ;;  %v2375_v55 = vsel %vm2371_vm2, %v2359_v54, %v2374_v5  ;;  %v2381_v48 = vsel %vm2369_vm6, %v2359_v54, %v2362_v12  ;;  %v2382_v28 = vsel %vm2372_vm8, %v2368_v24, 1326507024 }
 0x36f   :  { %v3970_v39 = vmin.u32 %v2299_v18, %v6644_v25  ;;  %v2383_v43 = vsel %vm2371_vm2, %v2365_v2, %v2382_v28  ;;  %v6662_v33 = vmul.u32.u64.low %v6631_v31, %v2380_v52  ;;  %v6663_v19 = vmul.u32.u64.high %v6631_v31, %v2380_v52, %v6662_v33 }
 0x370   :  { %v2384_v38 = vsel %vm2370_vm4, %v2381_v48, %v2383_v43  ;;  %v2466_v26 = vor.u32 %v2465_v42, %v2464_v17  ;;  %v2469_v49 = vor.u32 %v2468_v4, %v2467_v6  ;;  %v2471_v37 = vshrl.u32 %v8081_v3, %v6543_v45 }
 0x371   :  { %v2301_v5 = vclz %v3970_v39  ;;  %v2376_v54 = vsel %vm2370_vm4, %v2373_v41, %v2375_v55  ;;  %v6671_v12 = vmul.u32.u64.low %v6631_v31, %v2384_v38  ;;  %v6672_v24 = vmul.u32.u64.high %v6631_v31, %v2384_v38, %v6671_v12 }
 0x372   :  { %v2109_v2 = vxor.u32 2147483648, %v6641_v40  ;;  %v2202_v0 = vshll.u32 %v6531_v59, %v6613_v53  ;;  %v2203_v18 = vshrl.u32 %v6540_v30, %v2201_v20  ;;  %v2470_v48 = vshll.u32 %v8085_v56, %v6516_v47 }
 0x373   :  { %v3971_v43 = vadd.s32 4294967294, %v2301_v5  ;;  %v2208_v17 = vor.u32 4788187, %v2207_v16  ;;  %v2395_v45 = vadd.s32 1, %v6663_v19  ;;  %vm2476_vm1 = vcmp.lt.s32.totalorder %v6533_v22, 4 }
 0x374   :  { %v2392_v60 = vmul.u32 %v6631_v31, %v2376_v54  ;;  %v2472_v42 = vor.u32 %v2471_v37, %v2470_v48  ;;  %vm2473_vm13 = vcmp.lt.s32.totalorder %v6533_v22, 1  ;;  %v2482_v6 = vsel %vm2476_vm1, %v2469_v49, 920167782 }
 0x375   :  { %vm3972_vm0 = vcmp.lt.s32.totalorder %v3971_v43, 0  ;;  %vm2394_vm11 = vc.u32 %v6672_v24, %v6662_v33  ;;  %vm2475_vm15 = vcmp.lt.s32.totalorder %v6533_v22, 3  ;;  %v2481_v47 = vsel %vm2473_vm13, %v6605_v57, %v6615_v13 }
 0x376   :  { %v6693_v59 = vsel %vm3972_vm0, 0, %v3971_v43  ;;  %v2396_v30 = vsel %vm2394_vm11, %v2395_v45, %v6663_v19  ;;  %v2478_v53 = vsel %vm2476_vm1, %v2466_v26, 2102212464  ;;  %v2483_v31 = vsel %vm2475_vm15, %v2466_v26, %v2482_v6 }
 0x377   :  { %v2309_v4 = vsub.s32 4294967266, %v6693_v59  ;;  %v2204_v20 = vor.u32 %v2203_v18, %v2202_v0  ;;  %v2397_v16 = vadd.s32 %v2396_v30, %v2392_v60  ;;  %vm2474_vm3 = vcmp.lt.s32.totalorder %v6533_v22, 2 }
 0x378   :  { %v2209_v52 = vand.u32 2147483647, %v2208_v17  ;;  %v2484_v41 = vsel %vm2474_vm3, %v2481_v47, %v2483_v31  ;;  %v2485_v19 = vsel %vm2473_vm13, %v6615_v13, %v2466_v26  ;;  %v2486_v55 = vsel %vm2476_vm1, %v2472_v42, 1326507024 }
 0x379   :  { %v2398_v28 = vadd.s32 536870912, %v2397_v16  ;;  %v2477_v39 = vsel %vm2473_vm13, %v6599_v11, %v6605_v57  ;;  %v2479_v38 = vsel %vm2475_vm15, %v6615_v13, %v2478_v53  ;;  %v2487_v37 = vsel %vm2475_vm15, %v2469_v49, %v2486_v55 }
 0x37a   :  { %v2488_v5 = vsel %vm2474_vm3, %v2485_v19, %v2487_v37  ;;  %v6721_v26 = vmul.u32.u64.low %v6518_v34, %v2484_v41  ;;  %v6722_v54 = vmul.u32.u64.high %v6518_v34, %v2484_v41, %v6721_v26  ;;  %v6727_v12 = vadd.f32 %v6502_v62, %v6405_v51 }
 0x37b   :  { %vm2235_vm12 = vcmp.lt.s32.totalorder %v6490_v9, 0  ;;  %v2310_v11 = vadd.s32 127, %v2309_v4  ;;  %v2211_v57 = vcvt.s32.f32 %v2204_v20  ;;  %v6730_v13 = vshrl.u32 %v2398_v28, 30 }
 0x37c   :  { %8180 = vst [vmem:[#allocation32_spill] sm:$0xff] %v6727_v12  ;;  %v2305_v49 = vsub.s32 32, %v6693_v59  ;;  %v2319_v0 = vsub.s32 4, %v6628_v46  ;;  %v6735_v18 = vmul.u32.u64.low %v6518_v34, %v2488_v5  ;;  %v6736_v48 = vmul.u32.u64.high %v6518_v34, %v2488_v5, %v6735_v18 }
 0x37d   :  { %v8181_v43 = vand.u32 2147483647, %v6490_v9  ;;  %vm2131_vm14 = vcmp.lt.s32.totalorder %v6393_v8, 0  ;;  %v2400_v62 = vshll.u32 %v6730_v13, 30  ;;  %v2480_v45 = vsel %vm2474_vm3, %v2477_v39, %v2479_v38  ;;  %v6778_v38 = vpop.permute.xlu1 %1827 }
 0x37e   :  { %v2652_v60 = vand.u32 2139095040, %v6727_v12  ;;  %v2110_v42 = vsel %vm2027_vm9, %v2109_v2, %v6641_v40  ;;  %v2289_v6 = vadd.s32 %v6580_v29, %v6588_v35  ;;  %v2212_v47 = vmul.f32 %v2211_v57, %v2209_v52 }
 0x37f   :  { %vm6740_vm5 = vcmp.le.f32.partialorder %v8181_v43, 0.7853982  ;;  %v2499_v30 = vadd.s32 1, %v6722_v54  ;;  %v2311_v53 = vshll.u32 %v2310_v11, 23  ;;  %v6755_v31 = vsub.s32 %v2397_v16, %v2400_v62  ;;  %v6799_v43 = vpop.f32.mrb[6].mxu0 }
 0x380   :  { %v8009_v4 = vand.u32 2147483647, %v6727_v12  ;;  %v2653_v20 = vshrl.u32 %v2652_v60, 23  ;;  %v2307_v22 = vshrl.u32 %v2289_v6, %v2305_v49  ;;  %v2320_v41 = vsel %vm2235_vm12, %v2319_v0, %v6628_v46 }
 0x381   :  { %v8184_v19 = vand.u32 2147483647, %v6393_v8  ;;  %v2496_v35 = vmul.u32 %v6518_v34, %v2480_v45  ;;  %vm2498_vm6 = vc.u32 %v6736_v48, %v6721_v26  ;;  %v2403_v29 = vsub.s32 0, %v6755_v31 }
 0x382   :  { %v2500_v2 = vsel %vm2498_vm6, %v2499_v30, %v6722_v54  ;;  %v3985_v16 = vadd.s32 4294967169, %v2653_v20  ;;  %v2555_v52 = vadd.s32 1, %v6536_v58  ;;  %v2113_v46 = vsel %vm6571_vm10, %v6390_v32, %v2110_v42  ;;  %v8220_v32 = vld [vmem:[#allocation14_spill] sm:$0xff] }
 0x383   :  { %vm6763_vm9 = vcmp.le.f32.partialorder %v8184_v19, 0.7853982  ;;  %v2306_v55 = vshll.u32 %v6644_v25, %v6693_v59  ;;  %v2213_v28 = vxor.u32 2147483648, %v2212_v47  ;;  %v2501_v39 = vadd.s32 %v2500_v2, %v2496_v35 }
 0x384   :  { %v2312_v34 = vor.u32 4788187, %v2311_v53  ;;  %v3974_v37 = vmin.u32 %v2403_v29, %v6755_v31  ;;  %v2656_v5 = vand.u32 8388607, %v8009_v4  ;;  %v2659_v54 = vadd.s32 1, %v3985_v16 }
 0x385   :  { %v8187_v58 = vsel %vm6571_vm10, 0, %v6549_v63  ;;  %v2322_v25 = vsel %vm6740_vm5, 0, %v2320_v41  ;;  %v2502_v59 = vadd.s32 536870912, %v2501_v39  ;;  %v6793_v57 = vadd.f32 %v6431_v61, %v6778_v38 }
 0x386   :  { %v6787_v11 = vadd.s32 3, %v8187_v58  ;;  %v2308_v49 = vor.u32 %v2307_v22, %v2306_v55  ;;  %v2405_v0 = vclz %v3974_v37  ;;  %vm2660_vm8 = vcmp.gt.s32.totalorder %v2659_v54, 0 }
 0x387   :  { %8189 = vst [vmem:[#allocation30_spill] sm:$0xff] %v6793_v57  ;;  %vm2556_vm2 = vcmp.gt.s32.totalorder %v2555_v52, 0  ;;  %4277 = vcosq.f32 %v2113_v46  ;;  %v2214_v23 = vsel %vm2131_vm14, %v2213_v28, %v2212_v47  ;;  %v6797_v18 = vshrl.u32 %v2502_v59, 30 }
 0x388   :  { %8188 = vst [vmem:[#allocation27_spill] sm:$0xff] %v6787_v11  ;;  %v2661_v63 = vsel %vm2660_vm8, %v2659_v54, 0  ;;  %v2313_v62 = vand.u32 2147483647, %v2312_v34  ;;  %v3975_v45 = vadd.s32 4294967294, %v2405_v0  ;;  %v2657_v60 = vor.u32 8388608, %v2656_v5 }
 0x389   :  { %v2663_v42 = vand.u32 31, %v2661_v63  ;;  %4279 = vsinq.f32 %v2113_v46  ;;  %v6801_v61 = vadd.s32 3, %v2322_v25  ;;  %v2504_v6 = vshll.u32 %v6797_v18, 30 }
 0x38a   :  { %v2557_v30 = vsel %vm2556_vm2, %v2555_v52, 0  ;;  %v2315_v53 = vcvt.s32.f32 %v2308_v49  ;;  %v6807_v47 = vsel %vm6763_vm9, %v6393_v8, %v2214_v23  ;;  %vm3976_vm10 = vcmp.lt.s32.totalorder %v3975_v45, 0 }
 0x38b   :  { %8190 = vst [vmem:[#allocation16_spill] sm:$0xff] %v6801_v61  ;;  %v2664_v20 = vsub.s32 32, %v2663_v42  ;;  %v2393_v22 = vadd.s32 %v6662_v33, %v6672_v24  ;;  %v2408_v41 = vsel %vm3976_vm10, 0, %v3975_v45  ;;  %v6813_v19 = vadd.s32 %v6721_v26, %v6736_v48 }
 0x38c   :  { %v6815_v35 = vsub.s32 %v2501_v39, %v2504_v6  ;;  %v6817_v29 = vmul.f32 %v2315_v53, %v2313_v62  ;;  %v6819_v2 = vshll.u32 %v2657_v60, 8  ;;  %v6821_v16 = vshrl.u32 %v2557_v30, 5 }
 0x38d   :  { %v6823_v52 = vand.u32 31, %v2557_v30  ;;  %v2413_v46 = vsub.s32 4294967266, %v2408_v41  ;;  %v2666_v33 = vshll.u32 %v8086_v7, %v2663_v42  ;;  %v2667_v24 = vshrl.u32 %v8088_v50, %v2664_v20 }
 0x38e   :  { %v2507_v55 = vsub.s32 0, %v6815_v35  ;;  %v2409_v28 = vsub.s32 32, %v2408_v41  ;;  %v2669_v26 = vshll.u32 %v8088_v50, %v2663_v42  ;;  %v2670_v48 = vshrl.u32 %v8083_v36, %v2664_v20 }
 0x38f   :  { %v2673_v39 = vshrl.u32 %v8084_v1, %v2664_v20  ;;  %v2662_v37 = vshrl.u32 %v2661_v63, 5  ;;  %v2675_v5 = vshll.u32 %v8084_v1, %v2663_v42  ;;  %v2676_v54 = vshrl.u32 %v8085_v56, %v2664_v20 }
 0x390   :  { %v3978_v34 = vmin.u32 %v2507_v55, %v6815_v35  ;;  %v2668_v25 = vor.u32 %v2667_v24, %v2666_v33  ;;  %v2671_v59 = vor.u32 %v2670_v48, %v2669_v26  ;;  %v2672_v49 = vshll.u32 %v8083_v36, %v2663_v42 }
 0x391   :  { %v6836_v0 = vpop.eup %4277  ;;  %v2414_v23 = vadd.s32 127, %v2413_v46  ;;  %v2677_v45 = vor.u32 %v2676_v54, %v2675_v5  ;;  %v2679_v60 = vshrl.u32 %v8081_v3, %v2664_v20  ;;  %v2411_v6 = vshrl.u32 %v2393_v22, %v2409_v28 }
 0x392   :  { %8191 = vst [vmem:[#allocation31_spill] sm:$0xff] %v6836_v0  ;;  %v2509_v62 = vclz %v3978_v34  ;;  %v2674_v30 = vor.u32 %v2673_v39, %v2672_v49  ;;  %v2678_v63 = vshll.u32 %v8085_v56, %v2663_v42  ;;  %v6841_v53 = vsub.s32 32, %v6823_v52  ;;  %v6851_v39 = vpop.f32.mrb[6].mxu1 }
 0x393   :  { %v6843_v55 = vpop.eup %4279  ;;  %v2410_v33 = vshll.u32 %v6755_v31, %v2408_v41  ;;  %vm2681_vm4 = vcmp.lt.s32.totalorder %v2662_v37, 1  ;;  %v2562_v46 = vshll.u32 %v8086_v7, %v6823_v52  ;;  %v2665_v26 = vshrl.u32 %v8086_v7, %v2664_v20 }
 0x394   :  { %8192 = vst [vmem:[#allocation28_spill] sm:$0xff] %v6843_v55  ;;  %v3979_v24 = vadd.s32 4294967294, %v2509_v62  ;;  %v2680_v48 = vor.u32 %v2679_v60, %v2678_v63  ;;  %vm2684_vm1 = vcmp.lt.s32.totalorder %v2662_v37, 4  ;;  %v2689_v22 = vsel %vm2681_vm4, %v2668_v25, %v2671_v59 }
 0x395   :  { %v2415_v28 = vshll.u32 %v2414_v23, 23  ;;  %vm2683_vm0 = vcmp.lt.s32.totalorder %v2662_v37, 3  ;;  %v2690_v42 = vsel %vm2684_vm1, %v2677_v45, 920167782  ;;  %v2412_v34 = vor.u32 %v2411_v6, %v2410_v33 }
 0x396   :  { %vm3980_vm13 = vcmp.lt.s32.totalorder %v3979_v24, 0  ;;  %vm2682_vm11 = vcmp.lt.s32.totalorder %v2662_v37, 2  ;;  %v2691_v41 = vsel %vm2683_vm0, %v2674_v30, %v2690_v42  ;;  %v2686_v54 = vsel %vm2684_vm1, %v2674_v30, 2102212464 }
 0x397   :  { %v2512_v31 = vsel %vm3980_vm13, 0, %v3979_v24  ;;  %v2692_v20 = vsel %vm2682_vm11, %v2689_v22, %v2691_v41  ;;  %v2693_v49 = vsel %vm2681_vm4, %v2671_v59, %v2674_v30  ;;  %v2694_v23 = vsel %vm2684_vm1, %v2680_v48, 1326507024 }
 0x398   :  { %v2517_v5 = vsub.s32 4294967266, %v2512_v31  ;;  %v2513_v62 = vsub.s32 32, %v2512_v31  ;;  %v6859_v60 = vmul.u32.u64.low %v6819_v2, %v2692_v20  ;;  %v6860_v63 = vmul.u32.u64.high %v6819_v2, %v2692_v20, %v6859_v60 }
 0x399   :  { %v2416_v6 = vor.u32 4788187, %v2415_v28  ;;  %v2695_v24 = vsel %vm2683_vm0, %v2677_v45, %v2694_v23  ;;  %v2565_v42 = vshll.u32 %v8088_v50, %v6823_v52  ;;  %v2685_v4 = vsel %vm2681_vm4, %v2665_v26, %v2668_v25 }
 0x39a   :  { %v2518_v33 = vadd.s32 127, %v2517_v5  ;;  %v2687_v22 = vsel %vm2683_vm0, %v2671_v59, %v2686_v54  ;;  %v2696_v30 = vsel %vm2682_vm11, %v2693_v49, %v2695_v24  ;;  %v2563_v48 = vshrl.u32 %v8088_v50, %v6841_v53 }
 0x39b   :  { %vm2577_vm15 = vcmp.lt.s32.totalorder %v6821_v16, 1  ;;  %v2566_v28 = vshrl.u32 %v8083_v36, %v6841_v53  ;;  %v2568_v45 = vshll.u32 %v8083_v36, %v6823_v52  ;;  %v2569_v5 = vshrl.u32 %v8084_v1, %v6841_v53 }
 0x39c   :  { %v2519_v41 = vshll.u32 %v2518_v33, 23  ;;  %v2419_v25 = vcvt.s32.f32 %v2412_v34  ;;  %v2515_v59 = vshrl.u32 %v6813_v19, %v2513_v62  ;;  %v2417_v20 = vand.u32 2147483647, %v2416_v6 }
 0x39d   :  { %v6880_v26 = vmul.u32.u64.low %v6819_v2, %v2696_v30  ;;  %v6881_v54 = vmul.u32.u64.high %v6819_v2, %v2696_v30, %v6880_v26  ;;  %v2514_v49 = vshll.u32 %v6815_v35, %v2512_v31  ;;  %v2688_v23 = vsel %vm2682_vm11, %v2685_v4, %v2687_v22 }
 0x39e   :  { %v2707_v33 = vadd.s32 1, %v6860_v63  ;;  %v2520_v24 = vor.u32 4788187, %v2519_v41  ;;  %v2564_v58 = vor.u32 %v2563_v48, %v2562_v46  ;;  %v2571_v61 = vshll.u32 %v8084_v1, %v6823_v52 }
 0x39f   :  { %v2572_v34 = vshrl.u32 %v8085_v56, %v6841_v53  ;;  %v2567_v19 = vor.u32 %v2566_v28, %v2565_v42  ;;  %v2570_v62 = vor.u32 %v2569_v5, %v2568_v45  ;;  %v2574_v30 = vshll.u32 %v8085_v56, %v6823_v52 }
 0x3a0   :  { %v2575_v35 = vshrl.u32 %v8081_v3, %v6841_v53  ;;  %v2516_v37 = vor.u32 %v2515_v59, %v2514_v49  ;;  %v2704_v4 = vmul.u32 %v6819_v2, %v2688_v23  ;;  %vm2706_vm3 = vc.u32 %v6881_v54, %v6859_v60 }
 0x3a1   :  { %v2573_v46 = vor.u32 %v2572_v34, %v2571_v61  ;;  %v2708_v31 = vsel %vm2706_vm3, %v2707_v33, %v6860_v63  ;;  %vm2578_vm6 = vcmp.lt.s32.totalorder %v6821_v16, 2  ;;  %vm2580_vm8 = vcmp.lt.s32.totalorder %v6821_v16, 4 }
 0x3a2   :  { %v2576_v6 = vor.u32 %v2575_v35, %v2574_v30  ;;  %vm8047_vm2 = vcmp.lt.s32.totalorder %v6496_v14, 0  ;;  %v2420_v52 = vmul.f32 %v2419_v25, %v2417_v20  ;;  %v2709_v42 = vadd.s32 %v2708_v31, %v2704_v4 }
 0x3a3   :  { %vm2579_vm10 = vcmp.lt.s32.totalorder %v6821_v16, 3  ;;  %v2586_v22 = vsel %vm2580_vm8, %v2573_v46, 920167782  ;;  %v2521_v48 = vand.u32 2147483647, %v2520_v24  ;;  %v2585_v2 = vsel %vm2577_vm15, %v2564_v58, %v2567_v19 }
 0x3a4   :  { %v2587_v61 = vsel %vm2579_vm10, %v2570_v62, %v2586_v22  ;;  %v2589_v63 = vsel %vm2577_vm15, %v2567_v19, %v2570_v62  ;;  %v8193_v41 = vxor.u32 2147483648, %v6817_v29  ;;  %v2523_v45 = vcvt.s32.f32 %v2516_v37 }
 0x3a5   :  { %v2710_v5 = vadd.s32 536870912, %v2709_v42  ;;  %v2590_v25 = vsel %vm2580_vm8, %v2576_v6, 1326507024  ;;  %vm2443_vm4 = vcmp.lt.s32.totalorder %v6408_v15, 0  ;;  %v2582_v59 = vsel %vm2580_vm8, %v2570_v62, 2102212464 }
 0x3a6   :  { %v2318_v28 = vsel %vm2235_vm12, %v8193_v41, %v6817_v29  ;;  %v2591_v26 = vsel %vm2579_vm10, %v2573_v46, %v2590_v25  ;;  %v8194_v20 = vor.u32 8388608, %v6522_v21  ;;  %v6920_v23 = vadd.f32 %v6510_v10, %v6405_v51 }
 0x3a7   :  { %v8195_v33 = vand.u32 2147483647, %v6496_v14  ;;  %v6928_v24 = vshrl.u32 %v2710_v5, 30  ;;  %v2561_v34 = vshrl.u32 %v8086_v7, %v6841_v53  ;;  %v2588_v62 = vsel %vm2578_vm6, %v2585_v2, %v2587_v61 }
 0x3a8   :  { %v2593_v49 = vshll.u32 %v8194_v20, 8  ;;  %v2592_v21 = vsel %vm2578_vm6, %v2589_v63, %v2591_v26  ;;  %v2421_v30 = vxor.u32 2147483648, %v2420_v52  ;;  %v2524_v51 = vmul.f32 %v2523_v45, %v2521_v48  ;;  %v6982_v20 = vpop.f32.mrb[7].mxu0 }
 0x3a9   :  { %vm6924_vm1 = vcmp.le.f32.partialorder %v8195_v33, 0.7853982  ;;  %v8198_v37 = vand.u32 2147483647, %v6408_v15  ;;  %v2712_v46 = vshll.u32 %v6928_v24, 30  ;;  %v2581_v53 = vsel %vm2577_vm15, %v2561_v34, %v2564_v58 }
 0x3aa   :  { %v6936_v10 = vmul.u32.u64.low %v2593_v49, %v2592_v21  ;;  %v6937_v35 = vmul.u32.u64.high %v2593_v49, %v2592_v21, %v6936_v10  ;;  %v2583_v31 = vsel %vm2579_vm10, %v2567_v19, %v2582_v59  ;;  %v8010_v6 = vand.u32 2147483647, %v6920_v23 }
 0x3ab   :  { %vm6941_vm12 = vcmp.le.f32.partialorder %v8198_v37, 0.7853982  ;;  %4281 = vcosq.f32 %v6807_v47  ;;  %v6952_v22 = vmul.u32.u64.low %v2593_v49, %v2588_v62  ;;  %v6953_v48 = vmul.u32.u64.high %v2593_v49, %v2588_v62, %v6952_v22 }
 0x3ac   :  { %v2756_v2 = vand.u32 2139095040, %v6920_v23  ;;  %v2321_v61 = vsel %vm6740_vm5, %v6490_v9, %v2318_v28  ;;  %4283 = vsinq.f32 %v6807_v47  ;;  %v2527_v58 = vsub.s32 4, %v6797_v18 }
 0x3ad   :  { %v6962_v63 = vsub.s32 %v2709_v42, %v2712_v46  ;;  %v2422_v19 = vsel %vm8047_vm2, %v2421_v30, %v2420_v52  ;;  %v2525_v41 = vxor.u32 2147483648, %v2524_v51  ;;  %v2584_v45 = vsel %vm2578_vm6, %v2581_v53, %v2583_v31 }
 0x3ae   :  { %v2757_v5 = vshrl.u32 %v2756_v2, 23  ;;  %vm2602_vm13 = vc.u32 %v6937_v35, %v6952_v22  ;;  %v2760_v17 = vand.u32 8388607, %v8010_v6  ;;  %v8011_v47 = vand.u32 2147483647, %v6793_v57 }
 0x3af   :  { %v2715_v25 = vsub.s32 0, %v6962_v63  ;;  %4285 = vcosq.f32 %v2321_v61  ;;  %v2603_v42 = vadd.s32 1, %v6953_v48  ;;  %v2860_v52 = vand.u32 2139095040, %v6793_v57 }
 0x3b0   :  { %v3989_v28 = vadd.s32 4294967169, %v2757_v5  ;;  %4287 = vsinq.f32 %v2321_v61  ;;  %v6979_v16 = vsel %vm2443_vm4, %v2527_v58, %v6797_v18  ;;  %v2600_v26 = vmul.u32 %v2593_v49, %v2584_v45 }
 0x3b1   :  { %v3986_v59 = vmin.u32 %v2715_v25, %v6962_v63  ;;  %v6987_v33 = vsel %vm6924_vm1, %v6496_v14, %v2422_v19  ;;  %v2526_v34 = vsel %vm2443_vm4, %v2525_v41, %v2524_v51  ;;  %v2604_v62 = vsel %vm2602_vm13, %v2603_v42, %v6953_v48 }
 0x3b2   :  { %v2763_v21 = vadd.s32 1, %v3989_v28  ;;  %v2605_v10 = vadd.s32 %v2604_v62, %v2600_v26  ;;  %v2761_v18 = vor.u32 8388608, %v2760_v17  ;;  %v6994_v37 = vand.u32 8388607, %v8011_v47 }
 0x3b3   :  { %v2717_v30 = vclz %v3986_v59  ;;  %v2861_v46 = vshrl.u32 %v2860_v52, 23  ;;  %v7001_v53 = vadd.f32 %v6514_v27, %v6778_v38  ;;  %4289 = vcosq.f32 %v6987_v33 }
 0x3b4   :  { %vm2764_vm5 = vcmp.gt.s32.totalorder %v2763_v21, 0  ;;  %v2606_v31 = vadd.s32 536870912, %v2605_v10  ;;  %v7009_v61 = vsel %vm6941_vm12, %v6408_v15, %v2526_v34  ;;  %v2705_v58 = vadd.s32 %v6859_v60, %v6881_v54 }
 0x3b5   :  { %8201 = vst [vmem:[#allocation51_spill] sm:$0xff] %v7001_v53  ;;  %v3987_v51 = vadd.s32 4294967294, %v2717_v30  ;;  %v2765_v48 = vsel %vm2764_vm5, %v2763_v21, 0  ;;  %v7004_v2 = vpop.eup %4281  ;;  %v7018_v5 = vshll.u32 %v2761_v18, 8  ;;  %v3993_v28 = vadd.s32 4294967169, %v2861_v46 }
 0x3b6   :  { %v2767_v41 = vand.u32 31, %v2765_v48  ;;  %v7014_v27 = vpop.eup %4283  ;;  %v7016_v45 = vshrl.u32 %v2606_v31, 30  ;;  %v2766_v54 = vshrl.u32 %v2765_v48, 5  ;;  %vm2651_vm13 = vcmp.lt.s32.totalorder %v6727_v12, 0 }
 0x3b7   :  { %vm3988_vm0 = vcmp.lt.s32.totalorder %v3987_v51, 0  ;;  %v2867_v0 = vadd.s32 1, %v3993_v28  ;;  %4291 = vsinq.f32 %v6987_v33  ;;  %v7204_v11 = vadd.f32 %v8220_v32, %v6778_v38 }
 0x3b8   :  { %v2720_v17 = vsel %vm3988_vm0, 0, %v3987_v51  ;;  %v2768_v42 = vsub.s32 32, %v2767_v41  ;;  %v2608_v60 = vshll.u32 %v7016_v45, 30  ;;  %v2770_v62 = vshll.u32 %v8086_v7, %v2767_v41 }
 0x3b9   :  { %v2721_v59 = vsub.s32 32, %v2720_v17  ;;  %v2725_v26 = vsub.s32 4294967266, %v2720_v17  ;;  %v7023_v34 = vpop.eup %4285  ;;  %v2776_v18 = vshll.u32 %v8083_v36, %v2767_v41  ;;  %v2722_v48 = vshll.u32 %v6962_v63, %v2720_v17 }
 0x3ba   :  { %8202 = vst [vmem:[#allocation34_spill] sm:$0xff] %v7023_v34  ;;  %v2771_v21 = vshrl.u32 %v8088_v50, %v2768_v42  ;;  %v2774_v30 = vshrl.u32 %v8083_v36, %v2768_v42  ;;  %v7029_v51 = vpop.eup %4287  ;;  %v7031_v6 = vsub.s32 %v2605_v10, %v2608_v60  ;;  %v2777_v47 = vshrl.u32 %v8084_v1, %v2768_v42 }
 0x3bb   :  { %8203 = vst [vmem:[#allocation43_spill] sm:$0xff] %v7029_v51  ;;  %v2723_v46 = vshrl.u32 %v2705_v58, %v2721_v59  ;;  %v2726_v31 = vadd.s32 127, %v2725_v26  ;;  %v2773_v49 = vshll.u32 %v8088_v50, %v2767_v41  ;;  %v2779_v19 = vshll.u32 %v8084_v1, %v2767_v41 }
 0x3bc   :  { %v2780_v52 = vshrl.u32 %v8085_v56, %v2768_v42  ;;  %v2611_v9 = vsub.s32 0, %v7031_v6  ;;  %v2772_v34 = vor.u32 %v2771_v21, %v2770_v62  ;;  %v2778_v15 = vor.u32 %v2777_v47, %v2776_v18 }
 0x3bd   :  { %v2727_v25 = vshll.u32 %v2726_v31, 23  ;;  %v2775_v51 = vor.u32 %v2774_v30, %v2773_v49  ;;  %v2782_v10 = vshll.u32 %v8085_v56, %v2767_v41  ;;  %v2783_v59 = vshrl.u32 %v8081_v3, %v2768_v42  ;;  %v7041_v26 = vpop.eup %4289 }
 0x3be   :  { %v2781_v58 = vor.u32 %v2780_v52, %v2779_v19  ;;  %8204 = vst [vmem:[#allocation44_spill] sm:$0xff] %v7041_v26  ;;  %v2724_v63 = vor.u32 %v2723_v46, %v2722_v48  ;;  %v3982_v60 = vmin.u32 %v2611_v9, %v7031_v6  ;;  %v2769_v55 = vshrl.u32 %v8086_v7, %v2768_v42  ;;  %v7045_v42 = vpop.f32.mrb[7].mxu1 }
 0x3bf   :  { %v2728_v17 = vor.u32 4788187, %v2727_v25  ;;  %v2784_v31 = vor.u32 %v2783_v59, %v2782_v10  ;;  %vm2785_vm11 = vcmp.lt.s32.totalorder %v2766_v54, 1  ;;  %vm2788_vm15 = vcmp.lt.s32.totalorder %v2766_v54, 4 }
 0x3c0   :  { %v2613_v47 = vclz %v3982_v60  ;;  %vm2787_vm3 = vcmp.lt.s32.totalorder %v2766_v54, 3  ;;  %v2790_v49 = vsel %vm2788_vm15, %v2778_v15, 2102212464  ;;  %v2793_v19 = vsel %vm2785_vm11, %v2772_v34, %v2775_v51 }
 0x3c1   :  { %v2729_v62 = vand.u32 2147483647, %v2728_v17  ;;  %v2794_v41 = vsel %vm2788_vm15, %v2781_v58, 920167782  ;;  %v2797_v52 = vsel %vm2785_vm11, %v2775_v51, %v2778_v15  ;;  %v2798_v21 = vsel %vm2788_vm15, %v2784_v31, 1326507024 }
 0x3c2   :  { %v2731_v30 = vcvt.s32.f32 %v2724_v63  ;;  %v3983_v18 = vadd.s32 4294967294, %v2613_v47  ;;  %vm2786_vm6 = vcmp.lt.s32.totalorder %v2766_v54, 2  ;;  %v2795_v25 = vsel %vm2787_vm3, %v2778_v15, %v2794_v41 }
 0x3c3   :  { %v2789_v46 = vsel %vm2785_vm11, %v2769_v55, %v2772_v34  ;;  %v2791_v9 = vsel %vm2787_vm3, %v2775_v51, %v2790_v49  ;;  %v2799_v28 = vsel %vm2787_vm3, %v2781_v58, %v2798_v21  ;;  %vm2868_vm8 = vcmp.gt.s32.totalorder %v2867_v0, 0 }
 0x3c4   :  { %vm3984_vm10 = vcmp.lt.s32.totalorder %v3983_v18, 0  ;;  %v2796_v48 = vsel %vm2786_vm6, %v2793_v19, %v2795_v25  ;;  %v2800_v10 = vsel %vm2786_vm6, %v2797_v52, %v2799_v28  ;;  %v2869_v59 = vsel %vm2868_vm8, %v2867_v0, 0 }
 0x3c5   :  { %v7049_v17 = vmul.f32 %v2731_v30, %v2729_v62  ;;  %v2616_v60 = vsel %vm3984_vm10, 0, %v3983_v18  ;;  %v7052_v63 = vmul.u32.u64.low %v7018_v5, %v2800_v10  ;;  %v7053_v31 = vmul.u32.u64.high %v7018_v5, %v2800_v10, %v7052_v63 }
 0x3c6   :  { %v2601_v15 = vadd.s32 %v6952_v22, %v6937_v35  ;;  %v2617_v55 = vsub.s32 32, %v2616_v60  ;;  %v2621_v34 = vsub.s32 4294967266, %v2616_v60  ;;  %v2792_v51 = vsel %vm2786_vm6, %v2789_v46, %v2791_v9 }
 0x3c7   :  { %v7059_v58 = vmul.u32.u64.low %v7018_v5, %v2796_v48  ;;  %v7060_v47 = vmul.u32.u64.high %v7018_v5, %v2796_v48, %v7059_v58  ;;  %v2871_v0 = vand.u32 31, %v2869_v59  ;;  %v8205_v41 = vor.u32 8388608, %v6994_v37 }
 0x3c8   :  { %v2619_v49 = vshrl.u32 %v2601_v15, %v2617_v55  ;;  %v2622_v19 = vadd.s32 127, %v2621_v34  ;;  %v8206_v35 = vand.u32 2139095040, %v7001_v53  ;;  %v2733_v54 = vxor.u32 2147483648, %v7049_v17 }
 0x3c9   :  { %v7066_v52 = vshll.u32 %v8205_v41, 8  ;;  %v2808_v21 = vmul.u32 %v7018_v5, %v2792_v51  ;;  %v2870_v30 = vshrl.u32 %v2869_v59, 5  ;;  %v2872_v18 = vsub.s32 32, %v2871_v0 }
 0x3ca   :  { %v7070_v22 = vshrl.u32 %v8206_v35, 23  ;;  %v2618_v25 = vshll.u32 %v7031_v6, %v2616_v60  ;;  %v2623_v46 = vshll.u32 %v2622_v19, 23  ;;  %vm2810_vm4 = vc.u32 %v7053_v31, %v7059_v58 }
 0x3cb   :  { %v2874_v37 = vshll.u32 %v8086_v7, %v2871_v0  ;;  %v2811_v9 = vadd.s32 1, %v7060_v47  ;;  %v2875_v28 = vshrl.u32 %v8088_v50, %v2872_v18  ;;  %v2877_v48 = vshll.u32 %v8088_v50, %v2871_v0 }
 0x3cc   :  { %v2878_v10 = vshrl.u32 %v8083_v36, %v2872_v18  ;;  %v2620_v63 = vor.u32 %v2619_v49, %v2618_v25  ;;  %v2624_v5 = vor.u32 4788187, %v2623_v46  ;;  %v2880_v59 = vshll.u32 %v8083_v36, %v2871_v0 }
 0x3cd   :  { %v2881_v6 = vshrl.u32 %v8084_v1, %v2872_v18  ;;  %v2812_v60 = vsel %vm2810_vm4, %v2811_v9, %v7060_v47  ;;  %v2876_v15 = vor.u32 %v2875_v28, %v2874_v37  ;;  %v2883_v34 = vshll.u32 %v8084_v1, %v2871_v0 }
 0x3ce   :  { %v2879_v55 = vor.u32 %v2878_v10, %v2877_v48  ;;  %v2625_v51 = vand.u32 2147483647, %v2624_v5  ;;  %v2813_v19 = vadd.s32 %v2812_v60, %v2808_v21  ;;  %v2884_v35 = vshrl.u32 %v8085_v56, %v2872_v18 }
 0x3cf   :  { %v2882_v41 = vor.u32 %v2881_v6, %v2880_v59  ;;  %v2873_v49 = vshrl.u32 %v8086_v7, %v2872_v18  ;;  %v2886_v25 = vshll.u32 %v8085_v56, %v2871_v0  ;;  %v2887_v46 = vshrl.u32 %v8081_v3, %v2872_v18 }
 0x3d0   :  { %vm2889_vm5 = vcmp.lt.s32.totalorder %v2870_v30, 1  ;;  %v8207_v62 = vand.u32 2147483647, %v6727_v12  ;;  %v2627_v37 = vcvt.s32.f32 %v2620_v63  ;;  %v2814_v9 = vadd.s32 536870912, %v2813_v19 }
 0x3d1   :  { %v2885_v28 = vor.u32 %v2884_v35, %v2883_v34  ;;  %vm2892_vm11 = vcmp.lt.s32.totalorder %v2870_v30, 4  ;;  %v2888_v21 = vor.u32 %v2887_v46, %v2886_v25  ;;  %vm2890_vm15 = vcmp.lt.s32.totalorder %v2870_v30, 2 }
 0x3d2   :  { %vm7093_vm0 = vcmp.le.f32.partialorder %v8207_v62, 0.7853982  ;;  %v2894_v48 = vsel %vm2892_vm11, %v2882_v41, 2102212464  ;;  %v2897_v10 = vsel %vm2889_vm5, %v2876_v15, %v2879_v55  ;;  %vm2547_vm3 = vcmp.lt.s32.totalorder %v6487_v44, 0 }
 0x3d3   :  { %v2628_v0 = vmul.f32 %v2627_v37, %v2625_v51  ;;  %v7099_v18 = vshrl.u32 %v2814_v9, 30  ;;  %vm2891_vm6 = vcmp.lt.s32.totalorder %v2870_v30, 3  ;;  %v2898_v5 = vsel %vm2892_vm11, %v2885_v28, 920167782  ;;  %v8210_v9 = vld [vmem:[#allocation50_spill] sm:$0xff] }
 0x3d4   :  { %v2893_v62 = vsel %vm2889_vm5, %v2873_v49, %v2876_v15  ;;  %v2899_v59 = vsel %vm2891_vm6, %v2882_v41, %v2898_v5  ;;  %v2901_v63 = vsel %vm2889_vm5, %v2879_v55, %v2882_v41  ;;  %v2902_v6 = vsel %vm2892_vm11, %v2888_v21, 1326507024 }
 0x3d5   :  { %v2816_v60 = vshll.u32 %v7099_v18, 30  ;;  %v2895_v34 = vsel %vm2891_vm6, %v2879_v55, %v2894_v48  ;;  %v2900_v35 = vsel %vm2890_vm15, %v2897_v10, %v2899_v59  ;;  %v2903_v25 = vsel %vm2891_vm6, %v2885_v28, %v2902_v6 }
 0x3d6   :  { %v2904_v46 = vsel %vm2890_vm15, %v2901_v63, %v2903_v25  ;;  %v7107_v51 = vmul.u32.u64.low %v7066_v52, %v2900_v35  ;;  %v7108_v37 = vmul.u32.u64.high %v7066_v52, %v2900_v35, %v7107_v51  ;;  %v7113_v15 = vadd.f32 %v8210_v9, %v6778_v38 }
 0x3d7   :  { %v8211_v41 = vsub.s32 4, %v6928_v24  ;;  %v8212_v49 = vand.u32 2147483647, %v6487_v44  ;;  %v7126_v21 = vsub.s32 %v2813_v19, %v2816_v60  ;;  %v2629_v5 = vxor.u32 2147483648, %v2628_v0 }
 0x3d8   :  { %v7129_v48 = vmul.u32.u64.low %v7066_v52, %v2904_v46  ;;  %v7130_v10 = vmul.u32.u64.high %v7066_v52, %v2904_v46, %v7129_v48  ;;  %v2896_v59 = vsel %vm2890_vm15, %v2893_v62, %v2895_v34  ;;  %v4001_v63 = vadd.s32 4294967169, %v7070_v22 }
 0x3d9   :  { %v2736_v55 = vsel %vm2651_vm13, %v8211_v41, %v6928_v24  ;;  %vm7122_vm8 = vcmp.le.f32.partialorder %v8212_v49, 0.7853982  ;;  %4293 = vcosq.f32 %v7009_v61  ;;  %v2734_v24 = vsel %vm2651_vm13, %v2733_v54, %v7049_v17 }
 0x3da   :  { %v2819_v19 = vsub.s32 0, %v7126_v21  ;;  %v8215_v6 = vand.u32 2147483647, %v7001_v53  ;;  %v2738_v33 = vsel %vm7093_vm0, 0, %v2736_v55  ;;  %v2915_v30 = vadd.s32 1, %v7108_v37 }
 0x3db   :  { %v3075_v62 = vadd.s32 1, %v4001_v63  ;;  %v2964_v22 = vand.u32 2139095040, %v7113_v15  ;;  %v2912_v35 = vmul.u32 %v7066_v52, %v2896_v59  ;;  %vm2914_vm10 = vc.u32 %v7130_v10, %v7107_v51 }
 0x3dc   :  { %v3072_v60 = vand.u32 8388607, %v8215_v6  ;;  %v3990_v34 = vmin.u32 %v2819_v19, %v7126_v21  ;;  %v8019_v17 = vand.u32 2147483647, %v7113_v15  ;;  %v2737_v54 = vsel %vm7093_vm0, %v6727_v12, %v2734_v24  ;;  %v7183_v6 = vpop.eup %4291 }
 0x3dd   :  { %v2630_v25 = vsel %vm2547_vm3, %v2629_v5, %v2628_v0  ;;  %v2916_v46 = vsel %vm2914_vm10, %v2915_v30, %v7108_v37  ;;  %vm3076_vm4 = vcmp.gt.s32.totalorder %v3075_v62, 0  ;;  %4295 = vsinq.f32 %v7009_v61 }
 0x3de   :  { %v2821_v9 = vclz %v3990_v34  ;;  %v2917_v41 = vadd.s32 %v2916_v46, %v2912_v35  ;;  %v3073_v55 = vor.u32 8388608, %v3072_v60  ;;  %v3077_v49 = vsel %vm3076_vm4, %v3075_v62, 0 }
 0x3df   :  { %v8216_v52 = vsel %vm6941_vm12, 0, %v6979_v16  ;;  %v3079_v47 = vand.u32 31, %v3077_v49  ;;  %v2965_v59 = vshrl.u32 %v2964_v22, 23  ;;  %4297 = vcosq.f32 %v2737_v54 }
 0x3e0   :  { %v7164_v48 = vadd.s32 3, %v8216_v52  ;;  %v7166_v63 = vadd.s32 3, %v2738_v33  ;;  %v3991_v0 = vadd.s32 4294967294, %v2821_v9  ;;  %v2918_v37 = vadd.s32 536870912, %v2917_v41 }
 0x3e1   :  { %4299 = vsinq.f32 %v2737_v54  ;;  %v7171_v5 = vsel %vm7122_vm8, %v6487_v44, %v2630_v25  ;;  %v2809_v4 = vadd.s32 %v7059_v58, %v7053_v31  ;;  %v3080_v61 = vsub.s32 32, %v3079_v47 }
 0x3e2   :  { %8217 = vst [vmem:[#allocation38_spill] sm:$0xff] %v7164_v48  ;;  %8218 = vst [vmem:[#allocation22_spill] sm:$0xff] %v7166_v63  ;;  %vm3992_vm12 = vcmp.lt.s32.totalorder %v3991_v0, 0  ;;  %v7175_v16 = vshrl.u32 %v2918_v37, 30  ;;  %v7177_v24 = vshll.u32 %v3073_v55, 8  ;;  %v3997_v62 = vadd.s32 4294967169, %v2965_v59 }
 0x3e3   :  { %v7181_v19 = vand.u32 8388607, %v8019_v17  ;;  %v2824_v60 = vsel %vm3992_vm12, 0, %v3991_v0  ;;  %v3083_v33 = vshrl.u32 %v8088_v50, %v3080_v61  ;;  %v3086_v30 = vshrl.u32 %v8083_v36, %v3080_v61  ;;  %v7187_v22 = vpop.eup %4293 }
 0x3e4   :  { %8219 = vst [vmem:[#allocation18_spill] sm:$0xff] %v7187_v22  ;;  %v2829_v31 = vsub.s32 4294967266, %v2824_v60  ;;  %v2920_v58 = vshll.u32 %v7175_v16, 30  ;;  %v3078_v34 = vshrl.u32 %v3077_v49, 5  ;;  %v3082_v35 = vshll.u32 %v8086_v7, %v3079_v47 }
 0x3e5   :  { %v3085_v54 = vshll.u32 %v8088_v50, %v3079_v47  ;;  %v3088_v25 = vshll.u32 %v8083_v36, %v3079_v47  ;;  %v3089_v46 = vshrl.u32 %v8084_v1, %v3080_v61  ;;  %v3091_v9 = vshll.u32 %v8084_v1, %v3079_v47 }
 0x3e6   :  { %v2830_v55 = vadd.s32 127, %v2829_v31  ;;  %v7195_v52 = vsub.s32 %v2917_v41, %v2920_v58  ;;  %v3092_v59 = vshrl.u32 %v8085_v56, %v3080_v61  ;;  %v3094_v0 = vshll.u32 %v8085_v56, %v3079_v47 }
 0x3e7   :  { %v2825_v37 = vsub.s32 32, %v2824_v60  ;;  %v3084_v17 = vor.u32 %v3083_v33, %v3082_v35  ;;  %v3087_v49 = vor.u32 %v3086_v30, %v3085_v54  ;;  %v3095_v12 = vshrl.u32 %v8081_v3, %v3080_v61  ;;  %v7206_v41 = vpop.eup %4295 }
 0x3e8   :  { %v2923_v63 = vsub.s32 0, %v7195_v52  ;;  %v3090_v22 = vor.u32 %v3089_v46, %v3088_v25  ;;  %v2969_v48 = vor.u32 8388608, %v7181_v19  ;;  %8221 = vst [vmem:[#allocation45_spill] sm:$0xff] %v7206_v41  ;;  %v3081_v31 = vshrl.u32 %v8086_v7, %v3080_v61 }
 0x3e9   :  { %v3093_v58 = vor.u32 %v3092_v59, %v3091_v9  ;;  %v3096_v47 = vor.u32 %v3095_v12, %v3094_v0  ;;  %v2971_v26 = vadd.s32 1, %v3997_v62  ;;  %v7209_v33 = vpop.eup %4297  ;;  %v2826_v30 = vshll.u32 %v7126_v21, %v2824_v60 }
 0x3ea   :  { %8222 = vst [vmem:[#allocation39_spill] sm:$0xff] %v7209_v33  ;;  %v2831_v35 = vshll.u32 %v2830_v55, 23  ;;  %v3994_v54 = vmin.u32 %v2923_v63, %v7195_v52  ;;  %vm3097_vm13 = vcmp.lt.s32.totalorder %v3078_v34, 1  ;;  %v2827_v25 = vshrl.u32 %v2809_v4, %v2825_v37 }
 0x3eb   :  { %v7213_v19 = vpop.eup %4299  ;;  %vm3098_vm5 = vcmp.lt.s32.totalorder %v3078_v34, 2  ;;  %vm3100_vm0 = vcmp.lt.s32.totalorder %v3078_v34, 4  ;;  %v3105_v32 = vsel %vm3097_vm13, %v3084_v17, %v3087_v49  ;;  %vm3099_vm11 = vcmp.lt.s32.totalorder %v3078_v34, 3 }
 0x3ec   :  { %8223 = vst [vmem:[#allocation24_spill] sm:$0xff] %v7213_v19  ;;  %v2925_v38 = vclz %v3994_v54  ;;  %v3102_v61 = vsel %vm3100_vm0, %v3090_v22, 2102212464  ;;  %v3106_v12 = vsel %vm3100_vm0, %v3093_v58, 920167782  ;;  %v3109_v46 = vsel %vm3097_vm13, %v3087_v49, %v3090_v22 }
 0x3ed   :  { %v3107_v62 = vsel %vm3099_vm11, %v3090_v22, %v3106_v12  ;;  %v3110_v9 = vsel %vm3100_vm0, %v3096_v47, 1326507024  ;;  %vm2972_vm15 = vcmp.gt.s32.totalorder %v2971_v26, 0  ;;  %v2832_v21 = vor.u32 4788187, %v2831_v35 }
 0x3ee   :  { %v3995_v60 = vadd.s32 4294967294, %v2925_v38  ;;  %v3101_v63 = vsel %vm3097_vm13, %v3081_v31, %v3084_v17  ;;  %v3108_v55 = vsel %vm3098_vm5, %v3105_v32, %v3107_v62  ;;  %v3103_v4 = vsel %vm3099_vm11, %v3087_v49, %v3102_v61 }
 0x3ef   :  { %v3111_v59 = vsel %vm3099_vm11, %v3093_v58, %v3110_v9  ;;  %v7220_v0 = vmul.u32.u64.low %v7177_v24, %v3108_v55  ;;  %v7221_v37 = vmul.u32.u64.high %v7177_v24, %v3108_v55, %v7220_v0  ;;  %v2828_v54 = vor.u32 %v2827_v25, %v2826_v30 }
 0x3f0   :  { %vm3996_vm6 = vcmp.lt.s32.totalorder %v3995_v60, 0  ;;  %v3112_v12 = vsel %vm3098_vm5, %v3109_v46, %v3111_v59  ;;  %v2973_v22 = vsel %vm2972_vm15, %v2971_v26, 0  ;;  %v2913_v47 = vadd.s32 %v7107_v51, %v7130_v10 }
 0x3f1   :  { %v2928_v35 = vsel %vm3996_vm6, 0, %v3995_v60  ;;  %v7228_v17 = vmul.u32.u64.low %v7177_v24, %v3112_v12  ;;  %v7229_v31 = vmul.u32.u64.high %v7177_v24, %v3112_v12, %v7228_v17  ;;  %v2833_v49 = vand.u32 2147483647, %v2832_v21 }
 0x3f2   :  { %v2929_v58 = vsub.s32 32, %v2928_v35  ;;  %v2933_v32 = vsub.s32 4294967266, %v2928_v35  ;;  %v3104_v38 = vsel %vm3098_vm5, %v3101_v63, %v3103_v4  ;;  %4301 = vcosq.f32 %v7171_v5 }
 0x3f3   :  { %v3123_v30 = vadd.s32 1, %v7221_v37  ;;  %v2975_v25 = vand.u32 31, %v2973_v22  ;;  %v7234_v61 = vshll.u32 %v2969_v48, 8  ;;  %v2835_v26 = vcvt.s32.f32 %v2828_v54 }
 0x3f4   :  { %v2931_v62 = vshrl.u32 %v2913_v47, %v2929_v58  ;;  %v2934_v51 = vadd.s32 127, %v2933_v32  ;;  %v8026_v10 = vand.u32 2147483647, %v7204_v11  ;;  %v2943_v46 = vsub.s32 4, %v7175_v16 }
 0x3f5   :  { %v3120_v9 = vmul.u32 %v7177_v24, %v3104_v38  ;;  %vm3122_vm10 = vc.u32 %v7229_v31, %v7220_v0  ;;  %v2976_v34 = vsub.s32 32, %v2975_v25  ;;  %v2836_v21 = vmul.f32 %v2835_v26, %v2833_v49 }
 0x3f6   :  { %v2930_v60 = vshll.u32 %v7195_v52, %v2928_v35  ;;  %v2935_v63 = vshll.u32 %v2934_v51, 23  ;;  %v3124_v48 = vsel %vm3122_vm10, %v3123_v30, %v7221_v37  ;;  %vm8044_vm4 = vcmp.lt.s32.totalorder %v6920_v23, 0 }
 0x3f7   :  { %vm2859_vm12 = vcmp.lt.s32.totalorder %v6793_v57, 0  ;;  %v3125_v55 = vadd.s32 %v3124_v48, %v3120_v9  ;;  %v7245_v4 = vshrl.u32 %v2973_v22, 5  ;;  %v2978_v59 = vshll.u32 %v8086_v7, %v2975_v25 }
 0x3f8   :  { %v2979_v24 = vshrl.u32 %v8088_v50, %v2976_v34  ;;  %v2932_v54 = vor.u32 %v2931_v62, %v2930_v60  ;;  %v2936_v12 = vor.u32 4788187, %v2935_v63  ;;  %v2981_v47 = vshll.u32 %v8088_v50, %v2975_v25 }
 0x3f9   :  { %v2982_v52 = vshrl.u32 %v8083_v36, %v2976_v34  ;;  %v3126_v35 = vadd.s32 536870912, %v3125_v55  ;;  %v2984_v37 = vshll.u32 %v8083_v36, %v2975_v25  ;;  %v2985_v49 = vshrl.u32 %v8084_v1, %v2976_v34 }
 0x3fa   :  { %v2980_v17 = vor.u32 %v2979_v24, %v2978_v59  ;;  %v8224_v58 = vand.u32 2147483647, %v6793_v57  ;;  %v2937_v32 = vand.u32 2147483647, %v2936_v12  ;;  %v2987_v30 = vshll.u32 %v8084_v1, %v2975_v25 }
 0x3fb   :  { %v2983_v38 = vor.u32 %v2982_v52, %v2981_v47  ;;  %v2988_v26 = vshrl.u32 %v8085_v56, %v2976_v34  ;;  %v8227_v62 = vand.u32 2147483647, %v6920_v23  ;;  %v8228_v51 = vmov 0 }
 0x3fc   :  { %vm7255_vm13 = vcmp.le.f32.partialorder %v8224_v58, 0.7853982  ;;  %v3127_v9 = vshrl.u32 %v3126_v35, 30  ;;  %v2986_v60 = vor.u32 %v2985_v49, %v2984_v37  ;;  %v2990_v63 = vshll.u32 %v8085_v56, %v2975_v25  ;;  %v7271_v12 = vpop.eup %4301 }
 0x3fd   :  { %vm7263_vm5 = vcmp.le.f32.partialorder %v8227_v62, 0.7853982  ;;  %v2991_v48 = vshrl.u32 %v8081_v3, %v2976_v34  ;;  %v2837_v59 = vxor.u32 2147483648, %v2836_v21  ;;  %v2989_v24 = vor.u32 %v2988_v26, %v2987_v30 }
 0x3fe   :  { %v8229_v51 = vsel %vm7263_vm5, 4294967295, %v8228_v51  ;;  %vm2993_vm0 = vcmp.lt.s32.totalorder %v7245_v4, 1  ;;  %vm2994_vm11 = vcmp.lt.s32.totalorder %v7245_v4, 2  ;;  %v2939_v47 = vcvt.s32.f32 %v2932_v54 }
 0x3ff   :  { %8230 = vst [vmem:[#allocation15_spill] sm:$0xff] %v8229_v51  ;;  %vm3067_vm15 = vcmp.lt.s32.totalorder %v7001_v53, 0  ;;  %v3128_v52 = vshll.u32 %v3127_v9, 30  ;;  %v2992_v58 = vor.u32 %v2991_v48, %v2990_v63  ;;  %vm2996_vm6 = vcmp.lt.s32.totalorder %v7245_v4, 4 }
 0x400   :  { %v2977_v35 = vshrl.u32 %v8086_v7, %v2976_v34  ;;  %vm2995_vm10 = vcmp.lt.s32.totalorder %v7245_v4, 3  ;;  %v3001_v25 = vsel %vm2993_vm0, %v2980_v17, %v2983_v38  ;;  %v3002_v37 = vsel %vm2996_vm6, %v2989_v24, 920167782 }
 0x401   :  { %v2940_v49 = vmul.f32 %v2939_v47, %v2937_v32  ;;  %v7281_v30 = vsub.s32 %v3125_v55, %v3128_v52  ;;  %v2998_v54 = vsel %vm2996_vm6, %v2986_v60, 2102212464  ;;  %v3003_v26 = vsel %vm2995_vm10, %v2986_v60, %v3002_v37 }
 0x402   :  { %v2838_v34 = vsel %vm8044_vm4, %v2837_v59, %v2836_v21  ;;  %v2944_v62 = vsel %vm2859_vm12, %v2943_v46, %v7175_v16  ;;  %v8231_v63 = vand.u32 2147483647, %v7001_v53  ;;  %v3004_v55 = vsel %vm2994_vm11, %v3001_v25, %v3003_v26 }
 0x403   :  { %v3005_v32 = vsel %vm2993_vm0, %v2983_v38, %v2986_v60  ;;  %v3131_v47 = vsub.s32 0, %v7281_v30  ;;  %v3151_v52 = vsub.s32 4, %v3127_v9  ;;  %v2997_v21 = vsel %vm2993_vm0, %v2977_v35, %v2980_v17  ;;  %v7321_v35 = vpop.permute.xlu1 %1831 }
 0x404   :  { %vm7294_vm7 = vcmp.le.f32.partialorder %v8231_v63, 0.7853982  ;;  %v3006_v16 = vsel %vm2996_vm6, %v2992_v58, 1326507024  ;;  %v2999_v46 = vsel %vm2995_vm10, %v2983_v38, %v2998_v54  ;;  %v2941_v60 = vxor.u32 2147483648, %v2940_v49 }
 0x405   :  { %v3007_v59 = vsel %vm2995_vm10, %v2989_v24, %v3006_v16  ;;  %v7312_v25 = vmul.u32.u64.low %v7234_v61, %v3004_v55  ;;  %v7313_v37 = vmul.u32.u64.high %v7234_v61, %v3004_v55, %v7312_v25  ;;  %v2946_v26 = vsel %vm7255_vm13, 0, %v2944_v62 }
 0x406   :  { %v4002_v17 = vmin.u32 %v3131_v47, %v7281_v30  ;;  %v3008_v58 = vsel %vm2994_vm11, %v3005_v32, %v3007_v59  ;;  %v2841_v38 = vsel %vm7263_vm5, %v6920_v23, %v2838_v34  ;;  %v3172_v63 = vand.u32 2139095040, %v7204_v11 }
 0x407   :  { %v7327_v24 = vmul.u32.u64.low %v7234_v61, %v3008_v58  ;;  %v7328_v54 = vmul.u32.u64.high %v7234_v61, %v3008_v58, %v7327_v24  ;;  %4303 = vsinq.f32 %v7171_v5  ;;  %v3000_v55 = vsel %vm2994_vm11, %v2997_v21, %v2999_v46 }
 0x408   :  { %v3133_v62 = vclz %v4002_v17  ;;  %v7336_v32 = vadd.f32 %v6799_v43, %v7321_v35  ;;  %v7338_v47 = vadd.s32 3, %v2946_v26  ;;  %v3152_v34 = vsel %vm3067_vm15, %v3151_v52, %v3127_v9 }
 0x409   :  { %v3019_v16 = vadd.s32 1, %v7313_v37  ;;  %v3173_v59 = vshrl.u32 %v3172_v63, 23  ;;  %4305 = vcosq.f32 %v2841_v38  ;;  %v2942_v5 = vsel %vm2859_vm12, %v2941_v60, %v2940_v49 }
 0x40a   :  { %8234 = vst [vmem:[#allocation25_spill] sm:$0xff] %v7338_v47  ;;  %v4003_v17 = vadd.s32 4294967294, %v3133_v62  ;;  %v3176_v4 = vand.u32 8388607, %v8026_v10  ;;  %v3016_v21 = vmul.u32 %v7234_v61, %v3000_v55  ;;  %vm3018_vm0 = vc.u32 %v7328_v54, %v7312_v25 }
 0x40b   :  { %v4005_v43 = vadd.s32 4294967169, %v3173_v59  ;;  %v3276_v46 = vand.u32 2139095040, %v7336_v32  ;;  %v3121_v9 = vadd.s32 %v7220_v0, %v7229_v31  ;;  %v3154_v52 = vsel %vm7294_vm7, 0, %v3152_v34 }
 0x40c   :  { %vm4004_vm11 = vcmp.lt.s32.totalorder %v4003_v17, 0  ;;  %v3020_v49 = vsel %vm3018_vm0, %v3019_v16, %v7313_v37  ;;  %v7359_v60 = vsel %vm7255_vm13, %v6793_v57, %v2942_v5  ;;  %v3177_v62 = vor.u32 8388608, %v3176_v4 }
 0x40d   :  { %v3136_v61 = vsel %vm4004_vm11, 0, %v4003_v17  ;;  %v3021_v26 = vadd.s32 %v3020_v49, %v3016_v21  ;;  %v3179_v58 = vadd.s32 1, %v4005_v43  ;;  %v3277_v55 = vshrl.u32 %v3276_v46, 23 }
 0x40e   :  { %v3137_v24 = vsub.s32 32, %v3136_v61  ;;  %v3141_v63 = vsub.s32 4294967266, %v3136_v61  ;;  %4307 = vsinq.f32 %v2841_v38  ;;  %v7361_v0 = vadd.s32 3, %v3154_v52 }
 0x40f   :  { %v3022_v31 = vadd.s32 536870912, %v3021_v26  ;;  %vm3180_vm12 = vcmp.gt.s32.totalorder %v3179_v58, 0  ;;  %4309 = vcosq.f32 %v7359_v60  ;;  %v3138_v22 = vshll.u32 %v7281_v30, %v3136_v61 }
 0x410   :  { %8235 = vst [vmem:[#allocation29_spill] sm:$0xff] %v7361_v0  ;;  %v3139_v37 = vshrl.u32 %v3121_v9, %v3137_v24  ;;  %v3142_v34 = vadd.s32 127, %v3141_v63  ;;  %v3181_v16 = vsel %vm3180_vm12, %v3179_v58, 0  ;;  %v7369_v17 = vadd.f32 %v6851_v39, %v7321_v35 }
 0x411   :  { %v7365_v59 = vshrl.u32 %v3022_v31, 30  ;;  %v3183_v5 = vand.u32 31, %v3181_v16  ;;  %v7371_v4 = vpop.eup %4303  ;;  %v7373_v21 = vshll.u32 %v3177_v62, 8  ;;  %v4009_v46 = vadd.s32 4294967169, %v3277_v55 }
 0x412   :  { %v3143_v38 = vshll.u32 %v3142_v34, 23  ;;  %v3140_v9 = vor.u32 %v3139_v37, %v3138_v22  ;;  %v3182_v49 = vshrl.u32 %v3181_v16, 5  ;;  %4311 = vsinq.f32 %v7359_v60 }
 0x413   :  { %8236 = vst [vmem:[#allocation33_spill] sm:$0xff] %v7365_v59  ;;  %v3024_v52 = vshll.u32 %v7365_v59, 30  ;;  %v3184_v30 = vsub.s32 32, %v3183_v5  ;;  %v7377_v61 = vpop.eup %4305  ;;  %v3186_v24 = vshll.u32 %v8086_v7, %v3183_v5  ;;  %v3189_v39 = vshll.u32 %v8088_v50, %v3183_v5 }
 0x414   :  { %8237 = vst [vmem:[#allocation41_spill] sm:$0xff] %v7377_v61  ;;  %v3144_v58 = vor.u32 4788187, %v3143_v38  ;;  %v3192_v63 = vshll.u32 %v8083_v36, %v3183_v5  ;;  %v3195_v37 = vshll.u32 %v8084_v1, %v3183_v5  ;;  %v3198_v38 = vshll.u32 %v8085_v56, %v3183_v5 }
 0x415   :  { %v7382_v31 = vsub.s32 %v3021_v26, %v3024_v52  ;;  %v3187_v62 = vshrl.u32 %v8088_v50, %v3184_v30  ;;  %v3190_v55 = vshrl.u32 %v8083_v36, %v3184_v30  ;;  %v3193_v16 = vshrl.u32 %v8084_v1, %v3184_v30 }
 0x416   :  { %v3145_v34 = vand.u32 2147483647, %v3144_v58  ;;  %v3196_v22 = vshrl.u32 %v8085_v56, %v3184_v30  ;;  %v3199_v26 = vshrl.u32 %v8081_v3, %v3184_v30  ;;  %v3147_v52 = vcvt.s32.f32 %v3140_v9 }
 0x417   :  { %v3027_v10 = vsub.s32 0, %v7382_v31  ;;  %v3188_v43 = vor.u32 %v3187_v62, %v3186_v24  ;;  %v3191_v0 = vor.u32 %v3190_v55, %v3189_v39  ;;  %v3194_v57 = vor.u32 %v3193_v16, %v3192_v63 }
 0x418   :  { %v3197_v47 = vor.u32 %v3196_v22, %v3195_v37  ;;  %v8238_v59 = vand.u32 2147483647, %v7336_v32  ;;  %v7394_v19 = vpop.eup %4307  ;;  %v3200_v41 = vor.u32 %v3199_v26, %v3198_v38  ;;  %vm3201_vm13 = vcmp.lt.s32.totalorder %v3182_v49, 1 }
 0x419   :  { %v3998_v58 = vmin.u32 %v3027_v10, %v7382_v31  ;;  %v3283_v61 = vadd.s32 1, %v4009_v46  ;;  %v7397_v5 = vpop.eup %4309  ;;  %v3148_v51 = vmul.f32 %v3147_v52, %v3145_v34  ;;  %v3185_v24 = vshrl.u32 %v8086_v7, %v3184_v30 }
 0x41a   :  { %v3280_v33 = vand.u32 8388607, %v8238_v59  ;;  %8239 = vst [vmem:[#allocation42_spill] sm:$0xff] %v7397_v5  ;;  %vm3204_vm6 = vcmp.lt.s32.totalorder %v3182_v49, 4  ;;  %v3209_v9 = vsel %vm3201_vm13, %v3188_v43, %v3191_v0  ;;  %vm3203_vm10 = vcmp.lt.s32.totalorder %v3182_v49, 3 }
 0x41b   :  { %v3029_v39 = vclz %v3998_v58  ;;  %v3206_v63 = vsel %vm3204_vm6, %v3194_v57, 2102212464  ;;  %v3210_v62 = vsel %vm3204_vm6, %v3197_v47, 920167782  ;;  %vm3202_vm0 = vcmp.lt.s32.totalorder %v3182_v49, 2 }
 0x41c   :  { %v3211_v59 = vsel %vm3203_vm10, %v3194_v57, %v3210_v62  ;;  %v3213_v55 = vsel %vm3201_vm13, %v3191_v0, %v3194_v57  ;;  %v3214_v10 = vsel %vm3204_vm6, %v3200_v41, 1326507024  ;;  %v3017_v46 = vadd.s32 %v7312_v25, %v7328_v54 }
 0x41d   :  { %v3999_v37 = vadd.s32 4294967294, %v3029_v39  ;;  %v3205_v34 = vsel %vm3201_vm13, %v3185_v24, %v3188_v43  ;;  %v3212_v30 = vsel %vm3202_vm0, %v3209_v9, %v3211_v59  ;;  %v3207_v16 = vsel %vm3203_vm10, %v3191_v0, %v3206_v63 }
 0x41e   :  { %v3215_v22 = vsel %vm3203_vm10, %v3197_v47, %v3214_v10  ;;  %v7407_v38 = vmul.u32.u64.low %v7373_v21, %v3212_v30  ;;  %v7408_v26 = vmul.u32.u64.high %v7373_v21, %v3212_v30, %v7407_v38  ;;  %v3149_v52 = vxor.u32 2147483648, %v3148_v51 }
 0x41f   :  { %vm4000_vm11 = vcmp.lt.s32.totalorder %v3999_v37, 0  ;;  %v3216_v57 = vsel %vm3202_vm0, %v3213_v55, %v3215_v22  ;;  %v3281_v41 = vor.u32 8388608, %v3280_v33  ;;  %vm3284_vm12 = vcmp.gt.s32.totalorder %v3283_v61, 0 }
 0x420   :  { %v3032_v58 = vsel %vm4000_vm11, 0, %v3999_v37  ;;  %v7413_v25 = vmul.u32.u64.low %v7373_v21, %v3216_v57  ;;  %v7414_v54 = vmul.u32.u64.high %v7373_v21, %v3216_v57, %v7413_v25  ;;  %v3208_v47 = vsel %vm3202_vm0, %v3205_v34, %v3207_v16 }
 0x421   :  { %v3033_v43 = vsub.s32 32, %v3032_v58  ;;  %v3037_v24 = vsub.s32 4294967266, %v3032_v58  ;;  %v3285_v0 = vsel %vm3284_vm12, %v3283_v61, 0  ;;  %v3227_v9 = vadd.s32 1, %v7408_v26 }
 0x422   :  { %v3287_v39 = vand.u32 31, %v3285_v0  ;;  %v7421_v62 = vadd.f32 %v6982_v20, %v7321_v35  ;;  %v3034_v33 = vshll.u32 %v7382_v31, %v3032_v58  ;;  %v7424_v10 = vshll.u32 %v3281_v41, 8 }
 0x423   :  { %v3035_v59 = vshrl.u32 %v3017_v46, %v3033_v43  ;;  %v3038_v55 = vadd.s32 127, %v3037_v24  ;;  %v3150_v49 = vsel %vm3067_vm15, %v3149_v52, %v3148_v51  ;;  %v3224_v61 = vmul.u32 %v7373_v21, %v3208_v47 }
 0x424   :  { %vm3226_vm13 = vc.u32 %v7414_v54, %v7407_v38  ;;  %v3288_v37 = vsub.s32 32, %v3287_v39  ;;  %v3290_v16 = vshll.u32 %v8086_v7, %v3287_v39  ;;  %v3293_v22 = vshll.u32 %v8088_v50, %v3287_v39 }
 0x425   :  { %v3036_v34 = vor.u32 %v3035_v59, %v3034_v33  ;;  %v3039_v30 = vshll.u32 %v3038_v55, 23  ;;  %v3228_v20 = vsel %vm3226_vm13, %v3227_v9, %v7408_v26  ;;  %v3286_v52 = vshrl.u32 %v3285_v0, 5 }
 0x426   :  { %v3229_v31 = vadd.s32 %v3228_v20, %v3224_v61  ;;  %v3291_v46 = vshrl.u32 %v8088_v50, %v3288_v37  ;;  %v3294_v57 = vshrl.u32 %v8083_v36, %v3288_v37  ;;  %v3296_v21 = vshll.u32 %v8083_v36, %v3287_v39 }
 0x427   :  { %v3040_v51 = vor.u32 4788187, %v3039_v30  ;;  %v3297_v41 = vshrl.u32 %v8084_v1, %v3288_v37  ;;  %vm8043_vm15 = vcmp.lt.s32.totalorder %v7113_v15, 0  ;;  %v3043_v58 = vcvt.s32.f32 %v3036_v34 }
 0x428   :  { %v3230_v25 = vadd.s32 536870912, %v3229_v31  ;;  %v3292_v26 = vor.u32 %v3291_v46, %v3290_v16  ;;  %v3295_v43 = vor.u32 %v3294_v57, %v3293_v22  ;;  %v3299_v9 = vshll.u32 %v8084_v1, %v3287_v39 }
 0x429   :  { %v3041_v24 = vand.u32 2147483647, %v3040_v51  ;;  %v3298_v47 = vor.u32 %v3297_v41, %v3296_v21  ;;  %v3300_v33 = vshrl.u32 %v8085_v56, %v3288_v37  ;;  %v3302_v0 = vshll.u32 %v8085_v56, %v3287_v39 }
 0x42a   :  { %v7441_v59 = vshrl.u32 %v3230_v25, 30  ;;  %v3303_v55 = vshrl.u32 %v8081_v3, %v3288_v37  ;;  %v3484_v61 = vand.u32 2139095040, %v7369_v17  ;;  %v8241_v30 = vand.u32 2147483647, %v7113_v15 }
 0x42b   :  { %v3044_v20 = vmul.f32 %v3043_v58, %v3041_v24  ;;  %v3289_v16 = vshrl.u32 %v8086_v7, %v3288_v37  ;;  %v3301_v46 = vor.u32 %v3300_v33, %v3299_v9  ;;  %vm3305_vm10 = vcmp.lt.s32.totalorder %v3286_v52, 1 }
 0x42c   :  { %8240 = vst [vmem:[#allocation36_spill] sm:$0xff] %v7441_v59  ;;  %vm7448_vm6 = vcmp.le.f32.partialorder %v8241_v30, 0.7853982  ;;  %v3232_v22 = vshll.u32 %v7441_v59, 30  ;;  %v3304_v57 = vor.u32 %v3303_v55, %v3302_v0  ;;  %vm3307_vm0 = vcmp.lt.s32.totalorder %v3286_v52, 3 }
 0x42d   :  { %vm3308_vm11 = vcmp.lt.s32.totalorder %v3286_v52, 4  ;;  %v3045_v39 = vxor.u32 2147483648, %v3044_v20  ;;  %v3313_v21 = vsel %vm3305_vm10, %v3292_v26, %v3295_v43  ;;  %vm3306_vm12 = vcmp.lt.s32.totalorder %v3286_v52, 2 }
 0x42e   :  { %v3310_v51 = vsel %vm3308_vm11, %v3298_v47, 2102212464  ;;  %v3314_v41 = vsel %vm3308_vm11, %v3301_v46, 920167782  ;;  %v7454_v25 = vsub.s32 %v3229_v31, %v3232_v22  ;;  %v3317_v63 = vsel %vm3305_vm10, %v3295_v43, %v3298_v47 }
 0x42f   :  { %v3315_v30 = vsel %vm3307_vm0, %v3298_v47, %v3314_v41  ;;  %v3153_v37 = vsel %vm7294_vm7, %v7001_v53, %v3150_v49  ;;  %v3309_v58 = vsel %vm3305_vm10, %v3289_v16, %v3292_v26  ;;  %v3318_v9 = vsel %vm3308_vm11, %v3304_v57, 1326507024 }
 0x430   :  { %v3316_v24 = vsel %vm3306_vm12, %v3313_v21, %v3315_v30  ;;  %v3235_v33 = vsub.s32 0, %v7454_v25  ;;  %v3311_v0 = vsel %vm3307_vm0, %v3295_v43, %v3310_v51  ;;  %v3319_v55 = vsel %vm3307_vm0, %v3301_v46, %v3318_v9 }
 0x431   :  { %v3485_v31 = vshrl.u32 %v3484_v61, 23  ;;  %v3046_v22 = vsel %vm8043_vm15, %v3045_v39, %v3044_v20  ;;  %v3320_v47 = vsel %vm3306_vm12, %v3317_v63, %v3319_v55  ;;  %v8244_v43 = vand.u32 2147483647, %v7369_v17 }
 0x432   :  { %v7468_v41 = vmul.u32.u64.low %v7424_v10, %v3316_v24  ;;  %v7469_v48 = vmul.u32.u64.high %v7424_v10, %v3316_v24, %v7468_v41  ;;  %v4006_v49 = vmin.u32 %v3235_v33, %v7454_v25  ;;  %v3312_v61 = vsel %vm3306_vm12, %v3309_v58, %v3311_v0 }
 0x433   :  { %v7474_v26 = vmul.u32.u64.low %v7424_v10, %v3320_v47  ;;  %v7475_v16 = vmul.u32.u64.high %v7424_v10, %v3320_v47, %v7474_v26  ;;  %v3488_v46 = vand.u32 8388607, %v8244_v43  ;;  %v4017_v20 = vadd.s32 4294967169, %v3485_v31 }
 0x434   :  { %v7483_v63 = vadd.f32 %v7045_v42, %v7321_v35  ;;  %4313 = vcosq.f32 %v3153_v37  ;;  %v3049_v57 = vsel %vm7448_vm6, %v7113_v15, %v3046_v22  ;;  %v3237_v39 = vclz %v4006_v49 }
 0x435   :  { %v3380_v51 = vand.u32 2139095040, %v7421_v62  ;;  %4315 = vsinq.f32 %v3153_v37  ;;  %v3225_v21 = vadd.s32 %v7407_v38, %v7414_v54  ;;  %v3331_v60 = vadd.s32 1, %v7469_v48 }
 0x436   :  { %v3491_v52 = vadd.s32 1, %v4017_v20  ;;  %v4007_v30 = vadd.s32 4294967294, %v3237_v39  ;;  %v3328_v58 = vmul.u32 %v7424_v10, %v3312_v61  ;;  %vm3330_vm7 = vc.u32 %v7475_v16, %v7468_v41 }
 0x437   :  { %v3489_v42 = vor.u32 8388608, %v3488_v46  ;;  %4317 = vcosq.f32 %v3049_v57  ;;  %v3332_v35 = vsel %vm3330_vm7, %v3331_v60, %v7469_v48  ;;  %v3381_v24 = vshrl.u32 %v3380_v51, 23 }
 0x438   :  { %vm3492_vm13 = vcmp.gt.s32.totalorder %v3491_v52, 0  ;;  %4319 = vsinq.f32 %v3049_v57  ;;  %vm4008_vm10 = vcmp.lt.s32.totalorder %v4007_v30, 0  ;;  %v3333_v37 = vadd.s32 %v3332_v35, %v3328_v58  ;;  %v7505_v57 = vpop.eup %4311 }
 0x439   :  { %v3493_v9 = vsel %vm3492_vm13, %v3491_v52, 0  ;;  %v3240_v38 = vsel %vm4008_vm10, 0, %v4007_v30  ;;  %vm3275_vm0 = vcmp.lt.s32.totalorder %v7336_v32, 0  ;;  %v7499_v22 = vshll.u32 %v3489_v42, 8  ;;  %8245 = vst [vmem:[#allocation21_spill] sm:$0xff] %v7505_v57 }
 0x43a   :  { %v3495_v54 = vand.u32 31, %v3493_v9  ;;  %v3241_v0 = vsub.s32 32, %v3240_v38  ;;  %v3245_v55 = vsub.s32 4294967266, %v3240_v38  ;;  %v3334_v31 = vadd.s32 536870912, %v3333_v37 }
 0x43b   :  { %v3242_v47 = vshll.u32 %v7454_v25, %v3240_v38  ;;  %v7502_v48 = vshrl.u32 %v3493_v9, 5  ;;  %v4013_v26 = vadd.s32 4294967169, %v3381_v24  ;;  %v8248_v24 = vand.u32 2147483647, %v7336_v32 }
 0x43c   :  { %v3496_v49 = vsub.s32 32, %v3495_v54  ;;  %v3243_v43 = vshrl.u32 %v3225_v21, %v3241_v0  ;;  %v3246_v46 = vadd.s32 127, %v3245_v55  ;;  %v3335_v61 = vshrl.u32 %v3334_v31, 30 }
 0x43d   :  { %v3498_v20 = vshll.u32 %v8086_v7, %v3495_v54  ;;  %v3504_v60 = vshll.u32 %v8083_v36, %v3495_v54  ;;  %vm7517_vm11 = vcmp.le.f32.partialorder %v8248_v24, 0.7853982  ;;  %v3501_v0 = vshll.u32 %v8088_v50, %v3495_v54 }
 0x43e   :  { %v3499_v39 = vshrl.u32 %v8088_v50, %v3496_v49  ;;  %v3502_v51 = vshrl.u32 %v8083_v36, %v3496_v49  ;;  %v3505_v52 = vshrl.u32 %v8084_v1, %v3496_v49  ;;  %v7511_v25 = vpop.eup %4313  ;;  %v3244_v30 = vor.u32 %v3243_v43, %v3242_v47 }
 0x43f   :  { %8246 = vst [vmem:[#allocation48_spill] sm:$0xff] %v7511_v25  ;;  %v3247_v58 = vshll.u32 %v3246_v46, 23  ;;  %v3336_v42 = vshll.u32 %v3335_v61, 30  ;;  %v3359_v21 = vsub.s32 4, %v3335_v61  ;;  %v7513_v35 = vpop.eup %4315  ;;  %v3497_v38 = vshrl.u32 %v8086_v7, %v3496_v49 }
 0x440   :  { %8247 = vst [vmem:[#allocation17_spill] sm:$0xff] %v7513_v35  ;;  %v3507_v55 = vshll.u32 %v8084_v1, %v3495_v54  ;;  %v3508_v31 = vshrl.u32 %v8085_v56, %v3496_v49  ;;  %v3500_v46 = vor.u32 %v3499_v39, %v3498_v20  ;;  %v3506_v10 = vor.u32 %v3505_v52, %v3504_v60 }
 0x441   :  { %v3248_v47 = vor.u32 4788187, %v3247_v58  ;;  %v7525_v43 = vsub.s32 %v3333_v37, %v3336_v42  ;;  %v7527_v33 = vpop.eup %4317  ;;  %vm8046_vm12 = vcmp.lt.s32.totalorder %v7204_v11, 0  ;;  %v3503_v24 = vor.u32 %v3502_v51, %v3501_v0 }
 0x442   :  { %v3509_v53 = vor.u32 %v3508_v31, %v3507_v55  ;;  %v3510_v25 = vshll.u32 %v8085_v56, %v3495_v54  ;;  %v3511_v35 = vshrl.u32 %v8081_v3, %v3496_v49  ;;  %v7532_v5 = vpop.eup %4319  ;;  %v3251_v59 = vcvt.s32.f32 %v3244_v30 }
 0x443   :  { %v3249_v57 = vand.u32 2147483647, %v3248_v47  ;;  %v3339_v58 = vsub.s32 0, %v7525_v43  ;;  %v3360_v37 = vsel %vm3275_vm0, %v3359_v21, %v3335_v61  ;;  %vm3513_vm7 = vcmp.lt.s32.totalorder %v7502_v48, 1 }
 0x444   :  { %v3512_v20 = vor.u32 %v3511_v35, %v3510_v25  ;;  %vm3514_vm13 = vcmp.lt.s32.totalorder %v7502_v48, 2  ;;  %vm3516_vm10 = vcmp.lt.s32.totalorder %v7502_v48, 4  ;;  %v8251_v54 = vand.u32 2147483647, %v7204_v11 }
 0x445   :  { %v8252_v49 = vmov 0  ;;  %v3252_v39 = vmul.f32 %v3251_v59, %v3249_v57  ;;  %v4010_v51 = vmin.u32 %v3339_v58, %v7525_v43  ;;  %vm3515_vm4 = vcmp.lt.s32.totalorder %v7502_v48, 3 }
 0x446   :  { %vm7542_vm15 = vcmp.le.f32.partialorder %v8251_v54, 0.7853982  ;;  %v3518_v60 = vsel %vm3516_vm10, %v3506_v10, 2102212464  ;;  %v3517_v61 = vsel %vm3513_vm7, %v3497_v38, %v3500_v46  ;;  %v3521_v25 = vsel %vm3513_vm7, %v3500_v46, %v3503_v24 }
 0x447   :  { %v8253_v49 = vsel %vm7542_vm15, 4294967295, %v8252_v49  ;;  %v3519_v52 = vsel %vm3515_vm4, %v3503_v24, %v3518_v60  ;;  %v3522_v30 = vsel %vm3516_vm10, %v3509_v53, 920167782  ;;  %v3253_v42 = vxor.u32 2147483648, %v3252_v39 }
 0x448   :  { %8254 = vst [vmem:[#allocation37_spill] sm:$0xff] %v8253_v49  ;;  %v3341_v21 = vclz %v4010_v51  ;;  %v3523_v35 = vsel %vm3515_vm4, %v3506_v10, %v3522_v30  ;;  %v3525_v0 = vsel %vm3513_vm7, %v3503_v24, %v3506_v10  ;;  %v3526_v57 = vsel %vm3516_vm10, %v3512_v20, 1326507024 }
 0x449   :  { %v3524_v59 = vsel %vm3514_vm13, %v3521_v25, %v3523_v35  ;;  %v8255_v55 = vand.u32 2147483647, %v7421_v62  ;;  %v3387_v38 = vadd.s32 1, %v4013_v26  ;;  %v3329_v47 = vadd.s32 %v7468_v41, %v7475_v16 }
 0x44a   :  { %v4011_v46 = vadd.s32 4294967294, %v3341_v21  ;;  %v3362_v58 = vsel %vm7517_vm11, 0, %v3360_v37  ;;  %v3527_v54 = vsel %vm3515_vm4, %v3509_v53, %v3526_v57  ;;  %v3520_v10 = vsel %vm3514_vm13, %v3517_v61, %v3519_v52 }
 0x44b   :  { %v7556_v31 = vand.u32 8388607, %v8255_v55  ;;  %v3528_v24 = vsel %vm3514_vm13, %v3525_v0, %v3527_v54  ;;  %v7569_v20 = vmul.u32.u64.low %v7499_v22, %v3524_v59  ;;  %v7570_v51 = vmul.u32.u64.high %v7499_v22, %v3524_v59, %v7569_v20 }
 0x44c   :  { %v3254_v41 = vsel %vm8046_vm12, %v3253_v42, %v3252_v39  ;;  %vm4012_vm7 = vcmp.lt.s32.totalorder %v4011_v46, 0  ;;  %v7576_v16 = vmul.u32.u64.low %v7499_v22, %v3528_v24  ;;  %v7577_v26 = vmul.u32.u64.high %v7499_v22, %v3528_v24, %v7576_v16 }
 0x44d   :  { %v3344_v53 = vsel %vm4012_vm7, 0, %v4011_v46  ;;  %v7579_v37 = vadd.s32 3, %v3362_v58  ;;  %vm3388_vm4 = vcmp.gt.s32.totalorder %v3387_v38, 0  ;;  %v3536_v52 = vmul.u32 %v7499_v22, %v3520_v10 }
 0x44e   :  { %v3345_v48 = vsub.s32 32, %v3344_v53  ;;  %v3349_v61 = vsub.s32 4294967266, %v3344_v53  ;;  %v3389_v25 = vsel %vm3388_vm4, %v3387_v38, 0  ;;  %v3257_v39 = vsel %vm7542_vm15, %v7204_v11, %v3254_v41 }
 0x44f   :  { %8256 = vst [vmem:[#allocation35_spill] sm:$0xff] %v7579_v37  ;;  %v3539_v30 = vadd.s32 1, %v7570_v51  ;;  %v3391_v42 = vand.u32 31, %v3389_v25  ;;  %v3588_v21 = vand.u32 2139095040, %v7483_v63  ;;  %v3346_v35 = vshll.u32 %v7525_v43, %v3344_v53 }
 0x450   :  { %v3347_v0 = vshrl.u32 %v3329_v47, %v3345_v48  ;;  %v3350_v59 = vadd.s32 127, %v3349_v61  ;;  %vm3538_vm13 = vc.u32 %v7577_v26, %v7569_v20  ;;  %v3390_v22 = vshrl.u32 %v3389_v25, 5 }
 0x451   :  { %v3540_v57 = vsel %vm3538_vm13, %v3539_v30, %v7570_v51  ;;  %v3392_v55 = vsub.s32 32, %v3391_v42  ;;  %v3394_v38 = vshll.u32 %v8086_v7, %v3391_v42  ;;  %v3397_v10 = vshll.u32 %v8088_v50, %v3391_v42 }
 0x452   :  { %v3348_v46 = vor.u32 %v3347_v0, %v3346_v35  ;;  %v3351_v58 = vshll.u32 %v3350_v59, 23  ;;  %v3541_v54 = vadd.s32 %v3540_v57, %v3536_v52  ;;  %v3400_v47 = vshll.u32 %v8083_v36, %v3391_v42 }
 0x453   :  { %v3395_v24 = vshrl.u32 %v8088_v50, %v3392_v55  ;;  %v3398_v43 = vshrl.u32 %v8083_v36, %v3392_v55  ;;  %v3401_v41 = vshrl.u32 %v8084_v1, %v3392_v55  ;;  %vm3483_vm10 = vcmp.lt.s32.totalorder %v7369_v17, 0 }
 0x454   :  { %v3352_v16 = vor.u32 4788187, %v3351_v58  ;;  %v3355_v53 = vcvt.s32.f32 %v3348_v46  ;;  %v3542_v51 = vadd.s32 536870912, %v3541_v54  ;;  %v3403_v48 = vshll.u32 %v8084_v1, %v3391_v42 }
 0x455   :  { %v3396_v61 = vor.u32 %v3395_v24, %v3394_v38  ;;  %v3399_v25 = vor.u32 %v3398_v43, %v3397_v10  ;;  %v3402_v52 = vor.u32 %v3401_v41, %v3400_v47  ;;  %v3404_v30 = vshrl.u32 %v8085_v56, %v3392_v55 }
 0x456   :  { %v3353_v35 = vand.u32 2147483647, %v3352_v16  ;;  %v3543_v0 = vshrl.u32 %v3542_v51, 30  ;;  %v3406_v59 = vshll.u32 %v8085_v56, %v3391_v42  ;;  %v3407_v57 = vshrl.u32 %v8081_v3, %v3392_v55 }
 0x457   :  { %4321 = vcosq.f32 %v3257_v39  ;;  %v3393_v58 = vshrl.u32 %v8086_v7, %v3392_v55  ;;  %v3405_v46 = vor.u32 %v3404_v30, %v3403_v48  ;;  %v3589_v60 = vshrl.u32 %v3588_v21, 23 }
 0x458   :  { %v3356_v37 = vmul.f32 %v3355_v53, %v3353_v35  ;;  %v8257_v49 = vand.u32 2147483647, %v7369_v17  ;;  %v3544_v10 = vshll.u32 %v3543_v0, 30  ;;  %v3408_v24 = vor.u32 %v3407_v57, %v3406_v59 }
 0x459   :  { %vm3409_vm4 = vcmp.lt.s32.totalorder %v3390_v22, 1  ;;  %v3567_v43 = vsub.s32 4, %v3543_v0  ;;  %vm3411_vm13 = vcmp.lt.s32.totalorder %v3390_v22, 3  ;;  %vm3412_vm12 = vcmp.lt.s32.totalorder %v3390_v22, 4 }
 0x45a   :  { %vm7606_vm7 = vcmp.le.f32.partialorder %v8257_v49, 0.7853982  ;;  %v3413_v42 = vsel %vm3409_vm4, %v3393_v58, %v3396_v61  ;;  %v3357_v47 = vxor.u32 2147483648, %v3356_v37  ;;  %v7610_v41 = vsub.s32 %v3541_v54, %v3544_v10 }
 0x45b   :  { %v3414_v55 = vsel %vm3412_vm12, %v3402_v52, 2102212464  ;;  %v3417_v16 = vsel %vm3409_vm4, %v3396_v61, %v3399_v25  ;;  %v3418_v53 = vsel %vm3412_vm12, %v3405_v46, 920167782  ;;  %v3421_v51 = vsel %vm3409_vm4, %v3399_v25, %v3402_v52 }
 0x45c   :  { %v3415_v21 = vsel %vm3411_vm13, %v3399_v25, %v3414_v55  ;;  %v3422_v49 = vsel %vm3412_vm12, %v3408_v24, 1326507024  ;;  %4323 = vsinq.f32 %v3257_v39  ;;  %v3358_v48 = vsel %vm3275_vm0, %v3357_v47, %v3356_v37 }
 0x45d   :  { %v3547_v30 = vsub.s32 0, %v7610_v41  ;;  %v8260_v35 = vor.u32 8388608, %v7556_v31  ;;  %v7620_v54 = vsel %vm3483_vm10, %v3567_v43, %v3543_v0  ;;  %vm3410_vm2 = vcmp.lt.s32.totalorder %v3390_v22, 2 }
 0x45e   :  { %v3419_v61 = vsel %vm3411_vm13, %v3402_v52, %v3418_v53  ;;  %v3423_v57 = vsel %vm3411_vm13, %v3405_v46, %v3422_v49  ;;  %v3416_v39 = vsel %vm3410_vm2, %v3413_v42, %v3415_v21  ;;  %v3361_v37 = vsel %vm7517_vm11, %v7336_v32, %v3358_v48  ;;  %v8262_v21 = vld [vmem:[#allocation19_spill] sm:$0xff] }
 0x45f   :  { %v3425_v59 = vshll.u32 %v8260_v35, 8  ;;  %v4018_v25 = vmin.u32 %v3547_v30, %v7610_v41  ;;  %v3420_v58 = vsel %vm3410_vm2, %v3417_v16, %v3419_v61  ;;  %v3424_v10 = vsel %vm3410_vm2, %v3421_v51, %v3423_v57 }
 0x460   :  { %v4021_v47 = vadd.s32 4294967169, %v3589_v60  ;;  %v8261_v22 = vand.u32 2147483647, %v7483_v63  ;;  %v3537_v42 = vadd.s32 %v7569_v20, %v7577_v26  ;;  %v2215_v60 = vsub.s32 4, %v8262_v21 }
 0x461   :  { %v7628_v31 = vmul.u32.u64.low %v3425_v59, %v3424_v10  ;;  %v7629_v24 = vmul.u32.u64.high %v3425_v59, %v3424_v10, %v7628_v31  ;;  %v3549_v0 = vclz %v4018_v25  ;;  %v7637_v46 = vpop.eup %4321  ;;  %4325 = vcosq.f32 %v3361_v37 }
 0x462   :  { %v7631_v43 = vmul.u32.u64.low %v3425_v59, %v3420_v58  ;;  %v7632_v55 = vmul.u32.u64.high %v3425_v59, %v3420_v58, %v7631_v43  ;;  %v3592_v52 = vand.u32 8388607, %v8261_v22  ;;  %v3595_v16 = vadd.s32 1, %v4021_v47 }
 0x463   :  { %v4019_v53 = vadd.s32 4294967294, %v3549_v0  ;;  %v3432_v51 = vmul.u32 %v3425_v59, %v3416_v39  ;;  %4327 = vsinq.f32 %v3361_v37  ;;  %v7650_v20 = vsel %vm2131_vm14, %v2215_v60, %v8262_v21 }
 0x464   :  { %v3593_v49 = vor.u32 8388608, %v3592_v52  ;;  %vm3434_vm2 = vc.u32 %v7629_v24, %v7631_v43  ;;  %vm3596_vm0 = vcmp.gt.s32.totalorder %v3595_v16, 0  ;;  %v3435_v26 = vadd.s32 1, %v7632_v55 }
 0x465   :  { %vm4020_vm11 = vcmp.lt.s32.totalorder %v4019_v53, 0  ;;  %v3597_v48 = vsel %vm3596_vm0, %v3595_v16, 0  ;;  %v2218_v37 = vsel %vm6763_vm9, 0, %v7650_v20  ;;  %vm2221_vm13 = vweird.f32 %v6393_v8 }
 0x466   :  { %v3552_v35 = vsel %vm4020_vm11, 0, %v4019_v53  ;;  %v3598_v61 = vshrl.u32 %v3597_v48, 5  ;;  %v3599_v59 = vand.u32 31, %v3597_v48  ;;  %v7654_v57 = vshll.u32 %v3593_v49, 8  ;;  %v7656_v25 = vpop.eup %4323 }
 0x467   :  { %v3553_v39 = vsub.s32 32, %v3552_v35  ;;  %v3557_v58 = vsub.s32 4294967266, %v3552_v35  ;;  %v3436_v10 = vsel %vm3434_vm2, %v3435_v26, %v7632_v55  ;;  %v3554_v31 = vshll.u32 %v7610_v41, %v3552_v35 }
 0x468   :  { %v3437_v47 = vadd.s32 %v3436_v10, %v3432_v51  ;;  %v3600_v0 = vsub.s32 32, %v3599_v59  ;;  %v3602_v22 = vshll.u32 %v8086_v7, %v3599_v59  ;;  %v3605_v21 = vshll.u32 %v8088_v50, %v3599_v59 }
 0x469   :  { %v3555_v52 = vshrl.u32 %v3537_v42, %v3553_v39  ;;  %v3558_v16 = vadd.s32 127, %v3557_v58  ;;  %v3608_v60 = vshll.u32 %v8083_v36, %v3599_v59  ;;  %v3611_v40 = vshll.u32 %v8084_v1, %v3599_v59 }
 0x46a   :  { %v3438_v53 = vadd.s32 536870912, %v3437_v47  ;;  %v3603_v49 = vshrl.u32 %v8088_v50, %v3600_v0  ;;  %v3606_v55 = vshrl.u32 %v8083_v36, %v3600_v0  ;;  %v3609_v41 = vshrl.u32 %v8084_v1, %v3600_v0 }
 0x46b   :  { %v3556_v20 = vor.u32 %v3555_v52, %v3554_v31  ;;  %v3559_v26 = vshll.u32 %v3558_v16, 23  ;;  %v3612_v51 = vshrl.u32 %v8085_v56, %v3600_v0  ;;  %v3601_v42 = vshrl.u32 %v8086_v7, %v3600_v0  ;;  %v7674_v58 = vpop.eup %4325 }
 0x46c   :  { %v7671_v48 = vshrl.u32 %v3438_v53, 30  ;;  %v3604_v35 = vor.u32 %v3603_v49, %v3602_v22  ;;  %v3607_v39 = vor.u32 %v3606_v55, %v3605_v21  ;;  %v3610_v50 = vor.u32 %v3609_v41, %v3608_v60 }
 0x46d   :  { %v3560_v10 = vor.u32 4788187, %v3559_v26  ;;  %v3613_v9 = vor.u32 %v3612_v51, %v3611_v40  ;;  %v3614_v36 = vshll.u32 %v8085_v56, %v3599_v59  ;;  %v7677_v30 = vpop.eup %4327  ;;  %v3563_v31 = vcvt.s32.f32 %v3556_v20 }
 0x46e   :  { %v3440_v1 = vshll.u32 %v7671_v48, 30  ;;  %v3615_v52 = vshrl.u32 %v8081_v3, %v3600_v0  ;;  %vm3617_vm14 = vcmp.lt.s32.totalorder %v3598_v61, 1  ;;  %vm3619_vm9 = vcmp.lt.s32.totalorder %v3598_v61, 3 }
 0x46f   :  { %v3561_v16 = vand.u32 2147483647, %v3560_v10  ;;  %vm3620_vm12 = vcmp.lt.s32.totalorder %v3598_v61, 4  ;;  %v3621_v7 = vsel %vm3617_vm14, %v3601_v42, %v3604_v35  ;;  %v3625_v60 = vsel %vm3617_vm14, %v3604_v35, %v3607_v39 }
 0x470   :  { %v7681_v22 = vsub.s32 %v3437_v47, %v3440_v1  ;;  %v3616_v21 = vor.u32 %v3615_v52, %v3614_v36  ;;  %v3622_v53 = vsel %vm3620_vm12, %v3610_v50, 2102212464  ;;  %v3626_v59 = vsel %vm3620_vm12, %v3613_v9, 920167782 }
 0x471   :  { %v3564_v49 = vmul.f32 %v3563_v31, %v3561_v16  ;;  %v3623_v56 = vsel %vm3619_vm9, %v3607_v39, %v3622_v53  ;;  %v3629_v55 = vsel %vm3617_vm14, %v3607_v39, %v3610_v50  ;;  %vm3618_vm4 = vcmp.lt.s32.totalorder %v3598_v61, 2 }
 0x472   :  { %v3443_v40 = vsub.s32 0, %v7681_v22  ;;  %v3627_v3 = vsel %vm3619_vm9, %v3610_v50, %v3626_v59  ;;  %v3630_v0 = vsel %vm3620_vm12, %v3616_v21, 1326507024  ;;  %v3624_v26 = vsel %vm3618_vm4, %v3621_v7, %v3623_v56 }
 0x473   :  { %v3565_v20 = vxor.u32 2147483648, %v3564_v49  ;;  %v3628_v41 = vsel %vm3618_vm4, %v3625_v60, %v3627_v3  ;;  %v3631_v47 = vsel %vm3619_vm9, %v3613_v9, %v3630_v0  ;;  %v2222_v31 = vadd.s32 3, %v2218_v37 }
 0x474   :  { %v4014_v51 = vmin.u32 %v3443_v40, %v7681_v22  ;;  %v3632_v42 = vsel %vm3618_vm4, %v3629_v55, %v3631_v47  ;;  %v7689_v35 = vmul.u32.u64.low %v7654_v57, %v3628_v41  ;;  %v7690_v10 = vmul.u32.u64.high %v7654_v57, %v3628_v41, %v7689_v35 }
 0x475   :  { %v3566_v39 = vsel %vm3483_vm10, %v3565_v20, %v3564_v49  ;;  %v7697_v50 = vmul.u32.u64.low %v7654_v57, %v3632_v42  ;;  %v7698_v36 = vmul.u32.u64.high %v7654_v57, %v3632_v42, %v7697_v50  ;;  %v2226_v9 = vxor.u32 2147483648, %v7014_v27 }
 0x476   :  { %v3445_v61 = vclz %v4014_v51  ;;  %v2229_v1 = vxor.u32 2147483648, %v7004_v2  ;;  %v8263_v52 = vsub.s32 4, %v7016_v45  ;;  %v3433_v7 = vadd.s32 %v7631_v43, %v7629_v24 }
 0x477   :  { %v3640_v21 = vmul.u32 %v7654_v57, %v3624_v26  ;;  %v2223_v53 = vand.u32 3, %v2222_v31  ;;  %v3569_v60 = vsel %vm7606_vm7, %v7369_v17, %v3566_v39  ;;  %v3643_v56 = vadd.s32 1, %v7690_v10 }
 0x478   :  { %v2632_v16 = vsel %vm2547_vm3, %v8263_v52, %v7016_v45  ;;  %v4015_v49 = vadd.s32 4294967294, %v3445_v61  ;;  %vm3642_vm3 = vc.u32 %v7698_v36, %v7689_v35  ;;  %v2642_v45 = vxor.u32 2147483648, %v7371_v4 }
 0x479   :  { %v2634_v37 = vsel %vm7122_vm8, 0, %v2632_v16  ;;  %vm2224_vm10 = vcmp.lt.s32.totalorder %v2223_v53, 2  ;;  %vm2225_vm2 = vcmp.eq.s32.totalorder %v2223_v53, 0  ;;  %v3644_v24 = vsel %vm3642_vm3, %v3643_v56, %v7690_v10 }
 0x47a   :  { %v2638_v59 = vadd.s32 3, %v2634_v37  ;;  %vm4016_vm0 = vcmp.lt.s32.totalorder %v4015_v49, 0  ;;  %v2227_v28 = vsel %vm2225_vm2, %v7004_v2, %v2226_v9  ;;  %vm2228_vm8 = vcmp.eq.s32.totalorder %v2223_v53, 2  ;;  %v8268_v53 = vld [vmem:[#allocation44_spill] sm:$0xff] }
 0x47b   :  { %v3448_v43 = vsel %vm4016_vm0, 0, %v4015_v49  ;;  %v3645_v57 = vadd.s32 %v3644_v24, %v3640_v21  ;;  %v2230_v55 = vsel %vm2228_vm8, %v2229_v1, %v7014_v27  ;;  %vm2637_vm11 = vweird.f32 %v6487_v44 }
 0x47c   :  { %v2639_v40 = vand.u32 3, %v2638_v59  ;;  %v3449_v3 = vsub.s32 32, %v3448_v43  ;;  %v3453_v0 = vsub.s32 4294967266, %v3448_v43  ;;  %v2231_v20 = vsel %vm2224_vm10, %v2227_v28, %v2230_v55  ;;  %v8278_v28 = vld [vmem:[#allocation18_spill] sm:$0xff] }
 0x47d   :  { %4329 = vcosq.f32 %v3569_v60  ;;  %v3450_v26 = vshll.u32 %v7681_v22, %v3448_v43  ;;  %v3646_v41 = vadd.s32 536870912, %v3645_v57  ;;  %v2232_v47 = vsel %vm2221_vm13, nan, %v2231_v20 }
 0x47e   :  { %v3451_v51 = vshrl.u32 %v3433_v7, %v3449_v3  ;;  %v3454_v2 = vadd.s32 127, %v3453_v0  ;;  %vm2640_vm14 = vcmp.lt.s32.totalorder %v2639_v40, 2  ;;  %vm2641_vm9 = vcmp.eq.s32.totalorder %v2639_v40, 0  ;;  %v8271_v0 = vld [vmem:[#allocation27_spill] sm:$0xff] }
 0x47f   :  { %v7726_v42 = vshrl.u32 %v3646_v41, 30  ;;  %v2643_v27 = vsel %vm2641_vm9, %v7271_v12, %v2642_v45  ;;  %v2645_v10 = vxor.u32 2147483648, %v7271_v12  ;;  %v2423_v39 = vsub.s32 4, %v6730_v13 }
 0x480   :  { %v3452_v50 = vor.u32 %v3451_v51, %v3450_v26  ;;  %v3455_v31 = vshll.u32 %v3454_v2, 23  ;;  %vm2644_vm12 = vcmp.eq.s32.totalorder %v2639_v40, 2  ;;  %v2434_v22 = vxor.u32 2147483648, %v7183_v6 }
 0x481   :  { %vm3379_vm4 = vcmp.lt.s32.totalorder %v7421_v62, 0  ;;  %v3648_v8 = vshll.u32 %v7726_v42, 30  ;;  %v2646_v61 = vsel %vm2644_vm12, %v2645_v10, %v7371_v4  ;;  %vm8264_vm13 = vcmp.lt.s32.totalorder %v6496_v14, 0 }
 0x482   :  { %v2424_v9 = vsel %vm8264_vm13, %v2423_v39, %v6730_v13  ;;  %v2839_v1 = vsub.s32 4, %v7099_v18  ;;  %v8265_v12 = vand.u32 2147483647, %v7421_v62  ;;  %v3456_v16 = vor.u32 4788187, %v3455_v31 }
 0x483   :  { %v2647_v7 = vsel %vm2640_vm14, %v2643_v27, %v2646_v61  ;;  %v2426_v21 = vsel %vm6924_vm1, 0, %v2424_v9  ;;  %v2437_v4 = vxor.u32 2147483648, %v8268_v53  ;;  %v7749_v37 = vsub.s32 %v3645_v57, %v3648_v8  ;;  %v8274_v8 = vld [vmem:[#allocation28_spill] sm:$0xff] }
 0x484   :  { %vm7741_vm3 = vcmp.le.f32.partialorder %v8265_v12, 0.7853982  ;;  %v2648_v13 = vsel %vm2637_vm11, nan, %v2647_v7  ;;  %v2430_v49 = vadd.s32 3, %v2426_v21  ;;  %vm8269_vm10 = vcmp.lt.s32.totalorder %v6920_v23, 0  ;;  %v8275_v12 = vld [vmem:[#allocation31_spill] sm:$0xff] }
 0x485   :  { %v2840_v56 = vsel %vm8269_vm10, %v2839_v1, %v7099_v18  ;;  %v3457_v59 = vand.u32 2147483647, %v3456_v16  ;;  %v3459_v45 = vcvt.s32.f32 %v3452_v50  ;;  %v4043_v24 = vpack.c.bf16 %v2648_v13, %v2232_v47 }
 0x486   :  { %v2842_v43 = vsel %vm7263_vm5, 0, %v2840_v56  ;;  %4331 = vsinq.f32 %v3569_v60  ;;  %v3651_v29 = vsub.s32 0, %v7749_v37  ;;  %v2431_v55 = vand.u32 3, %v2430_v49  ;;  %v8272_v60 = vld [vmem:[#allocation41_spill] sm:$0xff] }
 0x487   :  { %v2846_v57 = vadd.s32 3, %v2842_v43  ;;  %v3460_v40 = vmul.f32 %v3459_v45, %v3457_v59  ;;  %v3641_v44 = vadd.s32 %v7689_v35, %v7698_v36  ;;  %4044 = vmatprep.subr.bf16.mxu0 %v4043_v24  ;;  %v2850_v3 = vxor.u32 2147483648, %v7394_v19  ;;  %v7763_v20 = vpop.eup %4329  ;;  %v8277_v45 = vld [vmem:[#allocation45_spill] sm:$0xff] }
 0x488   :  { %v2119_v18 = vand.u32 3, %v8271_v0  ;;  %v4022_v26 = vmin.u32 %v3651_v29, %v7749_v37  ;;  %vm2433_vm1 = vcmp.eq.s32.totalorder %v2431_v55, 0  ;;  %vm2436_vm5 = vcmp.eq.s32.totalorder %v2431_v55, 2 }
 0x489   :  { %v2853_v41 = vxor.u32 2147483648, %v8272_v60  ;;  %v3461_v47 = vxor.u32 2147483648, %v3460_v40  ;;  %v2435_v51 = vsel %vm2433_vm1, %v8268_v53, %v2434_v22  ;;  %v2438_v2 = vsel %vm2436_vm5, %v2437_v4, %v7183_v6  ;;  %v8273_v22 = vld [vmem:[#allocation13_spill] sm:$0xff] }
 0x48a   :  { %v2847_v27 = vand.u32 3, %v2846_v57  ;;  %v3653_v35 = vclz %v4022_v26  ;;  %vm2429_vm2 = vweird.f32 %v6496_v14  ;;  %vm2432_vm0 = vcmp.lt.s32.totalorder %v2431_v55, 2  ;;  %v8276_v14 = vld [vmem:[#allocation38_spill] sm:$0xff]  ;;  %v8279_v57 = vld [vmem:[#allocation20_spill] sm:$0xff] }
 0x48b   :  { %vm2845_vm8 = vweird.f32 %v6920_v23  ;;  %v3462_v36 = vsel %vm3379_vm4, %v3461_v47, %v3460_v40  ;;  %v2439_v10 = vsel %vm2432_vm0, %v2435_v51, %v2438_v2  ;;  %vm2120_vm14 = vcmp.lt.s32.totalorder %v2119_v18, 2  ;;  %v8281_v47 = vld [vmem:[#allocation43_spill] sm:$0xff]  ;;  %v8282_v2 = vld [vmem:[#allocation34_spill] sm:$0xff] }
 0x48c   :  { %vm2849_vm11 = vcmp.eq.s32.totalorder %v2847_v27, 0  ;;  %v3465_v39 = vsel %vm7741_vm3, %v7421_v62, %v3462_v36  ;;  %v4023_v50 = vadd.s32 4294967294, %v3653_v35  ;;  %vm2852_vm9 = vcmp.eq.s32.totalorder %v2847_v27, 2 }
 0x48d   :  { %v2851_v6 = vsel %vm2849_vm11, %v8272_v60, %v2850_v3  ;;  %vm2848_vm12 = vcmp.lt.s32.totalorder %v2847_v27, 2  ;;  %v2854_v31 = vsel %vm2852_vm9, %v2853_v41, %v7394_v19  ;;  %vm2117_vm13 = vweird.f32 %v8273_v22  ;;  %v8287_v22 = vld [vmem:[#allocation24_spill] sm:$0xff] }
 0x48e   :  { %vm2121_vm10 = vcmp.eq.s32.totalorder %v2119_v18, 0  ;;  %v2122_v61 = vxor.u32 2147483648, %v8274_v8  ;;  %vm4024_vm1 = vcmp.lt.s32.totalorder %v4023_v50, 0  ;;  %v2440_v9 = vsel %vm2429_vm2, nan, %v2439_v10 }
 0x48f   :  { %v2855_v1 = vsel %vm2848_vm12, %v2851_v6, %v2854_v31  ;;  %v2125_v16 = vxor.u32 2147483648, %v8275_v12  ;;  %4333 = vcosq.f32 %v3465_v39  ;;  %v3656_v7 = vsel %vm4024_vm1, 0, %v4023_v50 }
 0x490   :  { %v2856_v21 = vsel %vm2845_vm8, nan, %v2855_v1  ;;  %vm2124_vm5 = vcmp.eq.s32.totalorder %v2119_v18, 2  ;;  %v7785_v53 = vpop.eup %4331  ;;  %v3657_v19 = vsub.s32 32, %v3656_v7  ;;  %v3661_v4 = vsub.s32 4294967266, %v3656_v7 }
 0x491   :  { %v4051_v13 = vpack.c.bf16 %v2856_v21, %v2440_v9  ;;  %v2123_v49 = vsel %vm2121_vm10, %v8275_v12, %v2122_v61  ;;  %v2126_v56 = vsel %vm2124_vm5, %v2125_v16, %v8274_v8  ;;  %v2535_v59 = vand.u32 3, %v8276_v14  ;;  %v8286_v9 = vld [vmem:[#allocation22_spill] sm:$0xff]  ;;  %v8291_v14 = vld [vmem:[#allocation32_spill] sm:$0xff] }
 0x492   :  { %v2538_v24 = vxor.u32 2147483648, %v8277_v45  ;;  %v2541_v43 = vxor.u32 2147483648, %v8278_v28  ;;  %v3658_v29 = vshll.u32 %v7749_v37, %v3656_v7  ;;  %v3659_v23 = vshrl.u32 %v3641_v44, %v3657_v19  ;;  %v8280_v37 = vld [vmem:[#allocation16_spill] sm:$0xff]  ;;  %v8288_v7 = vld [vmem:[#allocation39_spill] sm:$0xff]  ;;  %v8289_v19 = vld [vmem:[#allocation33_spill] sm:$0xff] }
 0x493   :  { %v3662_v55 = vadd.s32 127, %v3661_v4  ;;  %4052 = vmatprep.subr.bf16.mxu1 %v4051_v13  ;;  %vm2533_vm2 = vweird.f32 %v8279_v57  ;;  %v2127_v40 = vsel %vm2120_vm14, %v2123_v49, %v2126_v56  ;;  %vm2536_vm0 = vcmp.lt.s32.totalorder %v2535_v59, 2  ;;  %v8290_v49 = vld [vmem:[#allocation26_spill] sm:$0xff] }
 0x494   :  { %vm2537_vm8 = vcmp.eq.s32.totalorder %v2535_v59, 0  ;;  %vm2540_vm11 = vcmp.eq.s32.totalorder %v2535_v59, 2  ;;  %v3660_v3 = vor.u32 %v3659_v23, %v3658_v29  ;;  %vm3587_vm9 = vcmp.lt.s32.totalorder %v7483_v63, 0 }
 0x495   :  { %v3663_v0 = vshll.u32 %v3662_v55, 23  ;;  %v2539_v26 = vsel %vm2537_vm8, %v8278_v28, %v2538_v24  ;;  %v2542_v60 = vsel %vm2540_vm11, %v2541_v43, %v8277_v45  ;;  %v2327_v44 = vand.u32 3, %v8280_v37 }
 0x496   :  { %v2543_v41 = vsel %vm2536_vm0, %v2539_v26, %v2542_v60  ;;  %v2330_v51 = vxor.u32 2147483648, %v8281_v47  ;;  %v2333_v27 = vxor.u32 2147483648, %v8282_v2  ;;  %4335 = vsinq.f32 %v3465_v39 }
 0x497   :  { %v8283_v18 = vand.u32 2147483647, %v7483_v63  ;;  %v3664_v36 = vor.u32 4788187, %v3663_v0  ;;  %v2128_v10 = vsel %vm2117_vm13, nan, %v2127_v40  ;;  %v2544_v50 = vsel %vm2533_vm2, nan, %v2543_v41 }
 0x498   :  { %v3667_v6 = vcvt.s32.f32 %v3660_v3  ;;  %v4045_v31 = vpack.c.bf16 %v2544_v50, %v2128_v10  ;;  %vm2329_vm12 = vcmp.eq.s32.totalorder %v2327_v44, 0  ;;  %vm2332_vm10 = vcmp.eq.s32.totalorder %v2327_v44, 2 }
 0x499   :  { %vm7803_vm14 = vcmp.le.f32.partialorder %v8283_v18, 0.7853982  ;;  %v3665_v8 = vand.u32 2147483647, %v3664_v36  ;;  %v2331_v39 = vsel %vm2329_vm12, %v8282_v2, %v2330_v51  ;;  %v2334_v61 = vsel %vm2332_vm10, %v2333_v27, %v8281_v47  ;;  %v7814_v12 = vpop.eup %4333  ;;  %v8294_v27 = vld [vmem:[#allocation36_spill] sm:$0xff] }
 0x49a   :  { %v2743_v1 = vand.u32 3, %v8286_v9  ;;  %4046 = vmatpush1.bf16.msra.mxu0 %v4045_v31  ;;  %vm2328_vm1 = vcmp.lt.s32.totalorder %v2327_v44, 2  ;;  %v2746_v16 = vxor.u32 2147483648, %v8287_v22  ;;  %v2749_v21 = vxor.u32 2147483648, %v8288_v7 }
 0x49b   :  { %v3047_v4 = vsub.s32 4, %v8289_v19  ;;  %v3668_v13 = vmul.f32 %v3667_v6, %v3665_v8  ;;  %vm2325_vm13 = vweird.f32 %v8290_v49  ;;  %v2335_v56 = vsel %vm2328_vm1, %v2331_v39, %v2334_v61  ;;  %v60_v6 = vld [vmem:[#allocation5 + $0x20] sm:$0x1] }
 0x49c   :  { %vm2745_vm5 = vcmp.eq.s32.totalorder %v2743_v1, 0  ;;  %vm2741_vm2 = vweird.f32 %v8291_v14  ;;  %vm2748_vm0 = vcmp.eq.s32.totalorder %v2743_v1, 2  ;;  %vm8292_vm8 = vcmp.lt.s32.totalorder %v7113_v15, 0 }
 0x49d   :  { %v2747_v59 = vsel %vm2745_vm5, %v8288_v7, %v2746_v16  ;;  %v3048_v45 = vsel %vm8292_vm8, %v3047_v4, %v8289_v19  ;;  %v3669_v24 = vxor.u32 2147483648, %v3668_v13  ;;  %vm2744_vm11 = vcmp.lt.s32.totalorder %v2743_v1, 2 }
 0x49e   :  { %v2750_v28 = vsel %vm2748_vm0, %v2749_v21, %v8287_v22  ;;  %v3050_v43 = vsel %vm7448_vm6, 0, %v3048_v45  ;;  %v2336_v29 = vsel %vm2325_vm13, nan, %v2335_v56  ;;  %v3463_v57 = vsub.s32 4, %v7671_v48  ;;  %v8297_v22 = vld [vmem:[#allocation25_spill] sm:$0xff] }
 0x49f   :  { %v2751_v23 = vsel %vm2744_vm11, %v2747_v59, %v2750_v28  ;;  %v3054_v55 = vadd.s32 3, %v3050_v43  ;;  %v3670_v40 = vsel %vm3587_vm9, %v3669_v24, %v3668_v13  ;;  %v3058_v0 = vxor.u32 2147483648, %v7532_v5 }
 0x4a0   :  { %v2752_v3 = vsel %vm2741_vm2, nan, %v2751_v23  ;;  %v3061_v26 = vxor.u32 2147483648, %v7527_v33  ;;  %v3673_v60 = vsel %vm7803_vm14, %v7483_v63, %v3670_v40  ;;  %v3464_v37 = vsel %vm3379_vm4, %v3463_v57, %v7671_v48  ;;  %v4336_v44 = vpop.eup %4335 }
 0x4a1   :  { %v4053_v41 = vpack.c.bf16 %v2752_v3, %v2336_v29  ;;  %v3055_v34 = vand.u32 3, %v3054_v55  ;;  %v8293_v47 = vsel %vm7606_vm7, 0, %v7620_v54  ;;  %4337 = vcosq.f32 %v3673_v60  ;;  %v8301_v55 = vld [vmem:[#allocation35_spill] sm:$0xff] }
 0x4a2   :  { %v7843_v51 = vadd.s32 3, %v8293_v47  ;;  %v3466_v2 = vsel %vm7741_vm3, 0, %v3464_v37  ;;  %v3255_v18 = vsub.s32 4, %v8294_v27  ;;  %4339 = vsinq.f32 %v3673_v60 }
 0x4a3   :  { %4054 = vmatpush1.bf16.msra.mxu1 %v4053_v41  ;;  %vm3056_vm6 = vcmp.lt.s32.totalorder %v3055_v34, 2  ;;  %vm3057_vm12 = vcmp.eq.s32.totalorder %v3055_v34, 0  ;;  %vm3060_vm10 = vcmp.eq.s32.totalorder %v3055_v34, 2  ;;  %v3470_v38 = vadd.s32 3, %v3466_v2 }
 0x4a4   :  { %v3059_v48 = vsel %vm3057_vm12, %v7527_v33, %v3058_v0  ;;  %v3062_v36 = vsel %vm3060_vm10, %v3061_v26, %v7532_v5  ;;  %vm8295_vm7 = vcmp.lt.s32.totalorder %v7204_v11, 0  ;;  %v3474_v50 = vxor.u32 2147483648, %v4336_v44 }
 0x4a5   :  { %v3256_v54 = vsel %vm8295_vm7, %v3255_v18, %v8294_v27  ;;  %v3063_v10 = vsel %vm3056_vm6, %v3059_v48, %v3062_v36  ;;  %v3477_v52 = vxor.u32 2147483648, %v7814_v12  ;;  %vm3053_vm4 = vweird.f32 %v7113_v15  ;;  %v8302_v18 = vld [vmem:[#allocation29_spill] sm:$0xff] }
 0x4a6   :  { %v3258_v31 = vsel %vm7542_vm15, 0, %v3256_v54  ;;  %vm3469_vm3 = vweird.f32 %v7421_v62  ;;  %v3471_v8 = vand.u32 3, %v3470_v38  ;;  %v3064_v39 = vsel %vm3053_vm4, nan, %v3063_v10  ;;  %v8299_v62 = vld [vmem:[#allocation21_spill] sm:$0xff]  ;;  %v8304_v10 = vld [vmem:[#allocation48_spill] sm:$0xff] }
 0x4a7   :  { %v3262_v33 = vadd.s32 3, %v3258_v31  ;;  %vm3261_vm1 = vweird.f32 %v7204_v11  ;;  %v3266_v5 = vxor.u32 2147483648, %v7656_v25  ;;  %v3269_v61 = vxor.u32 2147483648, %v7637_v46  ;;  %v8303_v36 = vld [vmem:[#allocation17_spill] sm:$0xff] }
 0x4a8   :  { %v3671_v9 = vsub.s32 4, %v7726_v42  ;;  %vm3473_vm13 = vcmp.eq.s32.totalorder %v3471_v8, 0  ;;  %vm3476_vm5 = vcmp.eq.s32.totalorder %v3471_v8, 2  ;;  %v2951_v16 = vand.u32 3, %v8297_v22 }
 0x4a9   :  { %v3263_v1 = vand.u32 3, %v3262_v33  ;;  %vm3472_vm15 = vcmp.lt.s32.totalorder %v3471_v8, 2  ;;  %v3475_v15 = vsel %vm3473_vm13, %v7814_v12, %v3474_v50  ;;  %v3478_v7 = vsel %vm3476_vm5, %v3477_v52, %v4336_v44  ;;  %v59_v33 = vld [vmem:[#allocation5] sm:$0x1] }
 0x4aa   :  { %v3672_v21 = vsel %vm3587_vm9, %v3671_v9, %v7726_v42  ;;  %v3479_v19 = vsel %vm3472_vm15, %v3475_v15, %v3478_v7  ;;  %vm3677_vm8 = vweird.f32 %v7483_v63  ;;  %v8298_v42 = vld [vmem:[#allocation30_spill] sm:$0xff]  ;;  %vm2952_vm6 = vcmp.lt.s32.totalorder %v2951_v16, 2  ;;  %v8305_v9 = vld [vmem:[#allocation51_spill] sm:$0xff] }
 0x4ab   :  { %vm3265_vm2 = vcmp.eq.s32.totalorder %v3263_v1, 0  ;;  %vm3268_vm0 = vcmp.eq.s32.totalorder %v3263_v1, 2  ;;  %v3480_v4 = vsel %vm3469_vm3, nan, %v3479_v19  ;;  %v3674_v12 = vsel %vm7803_vm14, 0, %v3672_v21  ;;  %v4338_v56 = vpop.eup %4337 }
 0x4ac   :  { %v3267_v13 = vsel %vm3265_vm2, %v7637_v46, %v3266_v5  ;;  %v3270_v49 = vsel %vm3268_vm0, %v3269_v61, %v7656_v25  ;;  %v4047_v14 = vpack.c.bf16 %v3480_v4, %v3064_v39  ;;  %vm3264_vm11 = vcmp.lt.s32.totalorder %v3263_v1, 2  ;;  %v4340_v45 = vpop.eup %4339  ;;  %v8300_v25 = vld [vmem:[#allocation42_spill] sm:$0xff] }
 0x4ad   :  { %v3678_v59 = vadd.s32 3, %v3674_v12  ;;  %vm2949_vm9 = vweird.f32 %v8298_v42  ;;  %v3271_v24 = vsel %vm3264_vm11, %v3267_v13, %v3270_v49  ;;  %v3685_v28 = vxor.u32 2147483648, %v4338_v56 }
 0x4ae   :  { %vm2953_vm12 = vcmp.eq.s32.totalorder %v2951_v16, 0  ;;  %v2954_v43 = vxor.u32 2147483648, %v8299_v62  ;;  %4048 = vmatprep.subr.bf16.mxu0 %v4047_v14  ;;  %v3682_v29 = vxor.u32 2147483648, %v4340_v45  ;;  %vm2956_vm10 = vcmp.eq.s32.totalorder %v2951_v16, 2 }
 0x4af   :  { %v3679_v46 = vand.u32 3, %v3678_v59  ;;  %v2957_v35 = vxor.u32 2147483648, %v8300_v25  ;;  %v3367_v57 = vand.u32 3, %v8301_v55  ;;  %v3370_v40 = vxor.u32 2147483648, %v7677_v30 }
 0x4b0   :  { %v2955_v23 = vsel %vm2953_vm12, %v8300_v25, %v2954_v43  ;;  %v3373_v3 = vxor.u32 2147483648, %v7674_v58  ;;  %v3272_v0 = vsel %vm3261_vm1, nan, %v3271_v24  ;;  %vm3365_vm3 = vweird.f32 %v7336_v32 }
 0x4b1   :  { %vm3681_vm14 = vcmp.eq.s32.totalorder %v3679_v46, 0  ;;  %vm3684_vm7 = vcmp.eq.s32.totalorder %v3679_v46, 2  ;;  %v2958_v26 = vsel %vm2956_vm10, %v2957_v35, %v8299_v62  ;;  %vm3680_vm4 = vcmp.lt.s32.totalorder %v3679_v46, 2 }
 0x4b2   :  { %v3683_v60 = vsel %vm3681_vm14, %v4338_v56, %v3682_v29  ;;  %v3686_v41 = vsel %vm3684_vm7, %v3685_v28, %v4340_v45  ;;  %v2959_v37 = vsel %vm2952_vm6, %v2955_v23, %v2958_v26  ;;  %vm3369_vm13 = vcmp.eq.s32.totalorder %v3367_v57, 0  ;;  %v8308_v56 = vld [vmem:[#allocation12_spill] sm:$0xff] }
 0x4b3   :  { %v3687_v34 = vsel %vm3680_vm4, %v3683_v60, %v3686_v41  ;;  %vm3372_vm5 = vcmp.eq.s32.totalorder %v3367_v57, 2  ;;  %vm3368_vm15 = vcmp.lt.s32.totalorder %v3367_v57, 2  ;;  %v3371_v11 = vsel %vm3369_vm13, %v7674_v58, %v3370_v40 }
 0x4b4   :  { %v3688_v44 = vsel %vm3677_vm8, nan, %v3687_v34  ;;  %v3374_v47 = vsel %vm3372_vm5, %v3373_v3, %v7677_v30  ;;  %v3159_v48 = vand.u32 3, %v8302_v18  ;;  %v3162_v38 = vxor.u32 2147483648, %v8303_v36 }
 0x4b5   :  { %v4055_v2 = vpack.c.bf16 %v3688_v44, %v3272_v0  ;;  %v3375_v27 = vsel %vm3368_vm15, %v3371_v11, %v3374_v47  ;;  %v2960_v32 = vsel %vm2949_vm9, nan, %v2959_v37  ;;  %v3165_v50 = vxor.u32 2147483648, %v8304_v10 }
 0x4b6   :  { %v3376_v54 = vsel %vm3365_vm3, nan, %v3375_v27  ;;  %v3575_v63 = vand.u32 3, %v7843_v51  ;;  %vm3161_vm1 = vcmp.eq.s32.totalorder %v3159_v48, 0  ;;  %vm3164_vm2 = vcmp.eq.s32.totalorder %v3159_v48, 2 }
 0x4b7   :  { %4056 = vmatprep.subr.bf16.mxu1 %v4055_v2  ;;  %v4049_v52 = vpack.c.bf16 %v3376_v54, %v2960_v32  ;;  %v3163_v30 = vsel %vm3161_vm1, %v8304_v10, %v3162_v38  ;;  %v3166_v58 = vsel %vm3164_vm2, %v3165_v50, %v8303_v36  ;;  %vm3160_vm0 = vcmp.lt.s32.totalorder %v3159_v48, 2 }
 0x4b8   :  { %v3578_v31 = vxor.u32 2147483648, %v7785_v53  ;;  %v3581_v8 = vxor.u32 2147483648, %v7763_v20  ;;  %v3167_v39 = vsel %vm3160_vm0, %v3163_v30, %v3166_v58  ;;  %vm3577_vm8 = vcmp.eq.s32.totalorder %v3575_v63, 0 }
 0x4b9   :  { %4050 = vmatpush1.bf16.msra.mxu0 %v4049_v52  ;;  %vm3580_vm11 = vcmp.eq.s32.totalorder %v3575_v63, 2  ;;  %vm3576_vm9 = vcmp.lt.s32.totalorder %v3575_v63, 2  ;;  %v4454_v61 = vmov 3   ;;  %vm3157_vm6 = vweird.f32 %v8305_v9 }
 0x4ba   :  { %v3579_v51 = vsel %vm3577_vm8, %v7763_v20, %v3578_v31  ;;  %v3582_v5 = vsel %vm3580_vm11, %v3581_v8, %v7785_v53  ;;  %4212 = vset.pattern.permute.xlu0 %v4454_v61  ;;  %vm3573_vm12 = vweird.f32 %v7369_v17  ;;  %vm8306_vm10 = vcmask 261120  }
 0x4bb   :  { %v3583_v1 = vsel %vm3576_vm9, %v3579_v51, %v3582_v5  ;;  %3691 = vperm.xlu0 %4212, %v59_v33   ;;  %v3168_v22 = vsel %vm3157_vm6, nan, %v3167_v39  ;;  %vm8307_vm14 = vmmov %vm8306_vm10  ;;  %v4455_v20 = vmov 1966171168   ;;  %v8309_v46 = vlaneseq }
 0x4bc   :  { %4025 = vmatmul.mubr.msk.f32.vlgmr.msra.gmra.mrb[8].mxu0 %vm8306_vm10, %v60_v6  ;;  %v3584_v16 = vsel %vm3573_vm12, nan, %v3583_v1  ;;  %v3846_v21 = vunpack.c.l.s4 %v4455_v20 }
 0x4bd   :  { %v4057_v15 = vpack.c.bf16 %v3584_v16, %v3168_v22  ;;  %vm3870_vm7 = vcmp.lt.s32.totalorder %v8309_v46, 512 }
 0x4be   :  { %v3847_v49 = vunpack.c.0.s8 %v3846_v21 }
 0x4bf   :  { %4058 = vmatpush1.bf16.msra.mxu1 %v4057_v15 }
 0x4c0   :  { %v3850_v14 = vsub.s32 %v3847_v49, %v8308_v56 }
 0x4c2   :  { %4026 = vmatmul.mubr.msk.f32.vlgmr.msra.gmra.mrb[8].mxu1 %vm8307_vm14, %v60_v6 }
 0x53a   :  { %v3692_v7 = vpop.permute.xlu0 %3691 }
 0x58f   :  { %v3763_v53 = vpop.f32.mrb[8].mxu0 }
 0x590   :  { %v3764_v19 = vadd.f32 %v3763_v53, %v3692_v7  ;;  %v3765_v4 = vpop.f32.mrb[9].mxu0 }
 0x591   :  { %v3766_v13 = vadd.f32 %v3765_v4, %v3692_v7 }
 0x593   :  { %v3843_v12 = vcombine.low %v3764_v19, %v3766_v13 }
 0x595   :  { %v3834_v17 = vpop.f32.mrb[8].mxu1  ;;  %v3851_v24 = vrot.slane %v3843_v12, %v3850_v14 }
 0x596   :  { %v3835_v59 = vadd.f32 %v3834_v17, %v3692_v7  ;;  %v3836_v42 = vpop.f32.mrb[9].mxu1 }
 0x597   :  { %v3837_v45 = vadd.f32 %v3836_v42, %v3692_v7 }
 0x599   :  { %v3844_v28 = vcombine.low %v3835_v59, %v3837_v45 }
 0x59b   :  { %v3858_v62 = vrot.slane %v3844_v28, %v3850_v14 }
 0x59d   :  { %v3859_v43 = vcombine.low %v3851_v24, %v3858_v62 }
 0x59f   :  { %v3866_v29 = vrot.slane %v3859_v43, %v3850_v14 }
 0x5a1   :  { %3872 = vst.msk [vmem:[#allocation8] sm:$0xf] %vm3870_vm7, %v3866_v29 }
 0x5a2   :  { %4422 = shalt.err (!%p4419_p0)
}
 0x5a3   :  { %s4423_s25 = scalar_lea.hbm %s7923_s3, 64 }
 0x5a4   :  { %p4424_p1 = scmp.ne.s32.totalorder %s7923_s3, %s4423_s25  ;;  %p4427_p2 = scmp.lt.u32.totalorder %s4423_s25, %s7923_s3 }
 0x5a6   :  { %p4429_p3 = pnand %p4427_p2, %p4424_p1 }
 0x5a8   :  { %4432 = shalt.err (!%p4429_p3)
}
 0x5a9   :  { %3882 = dma.vmem_to_hbm [thread:$0]  %s3880_s21, 64, %s7923_s3, [#allocation4]  }
 0x5aa   :  { %4437 = dma.done.wait [#allocation4], 64  }
 0x5ab   :  { %4438 = vsyncadd [#allocation4], 4294967232 }
 0x5ac   :  { %3886 = vsyncpa [#allocation3], 1 }
 0x5ad   :  { %3887 = vsyncpa [#allocation6], 1 }
 0x5ae   :  { %3888 = vsyncpa [#allocation4], 1 }

</bundles_post_ra>
